<compile_context>
chip_gen: v7x
topology: tpu7x:2x2x1
jax: 0.10.0
libtpu: 0.0.40
codegen_flags: <defaults>
</compile_context>

<pallas_src>
import functools

import jax
import jax.numpy as jnp
from jax.experimental import pallas as pl
from jax.experimental.pallas import tpu as pltpu

IN_FEATURES = 4096
OUT_FEATURES = 512
NEG_SLOPE = 0.01  # nn.LeakyReLU default negative_slope


def _linear_leakyrelu_kernel(x_ref, w_ref, b_ref, o_ref, *, tk):
    """Fused matmul + bias + LeakyReLU.

    Grid: axis 0 = N tiles ('parallel'), axis 1 = K chunks ('arbitrary',
    reduction). o_ref's block index is constant across K, so it stays resident
    and doubles as the f32 accumulator (no scratch needed).
    """
    k = pl.program_id(1)

    @pl.when(k == 0)
    def _():
        o_ref[...] = jnp.zeros_like(o_ref)

    start = pl.multiple_of(k * tk, tk)
    x_chunk = x_ref[:, pl.ds(start, tk)]  # x is fully resident; slice K-chunk
    o_ref[...] += jnp.dot(x_chunk, w_ref[...], preferred_element_type=jnp.float32)

    @pl.when(k == pl.num_programs(1) - 1)
    def _():
        y = o_ref[...] + b_ref[...]  # bias broadcast over rows
        o_ref[...] = jnp.where(y >= 0, y, NEG_SLOPE * y).astype(o_ref.dtype)


@functools.partial(jax.jit, static_argnames=("tk", "tn"))
def converter_forward(x, w_t, b, *, tk=2048, tn=OUT_FEATURES):
    """x: (B, 4096) f32, w_t: (4096, 512) f32, b: (1, 512) f32 -> (B, 512) f32."""
    B, K = x.shape
    _, N = w_t.shape
    assert K % tk == 0 and N % tn == 0

    grid = (N // tn, K // tk)
    kernel = functools.partial(_linear_leakyrelu_kernel, tk=tk)
    cost = pl.CostEstimate(
        flops=2 * B * K * N,
        transcendentals=0,
        bytes_accessed=K * N * 4 + B * K * 4 + B * N * 4,
    )
    return pl.pallas_call(
        kernel,
        out_shape=jax.ShapeDtypeStruct((B, N), x.dtype),
        grid_spec=pltpu.PrefetchScalarGridSpec(
            num_scalar_prefetch=0,
            grid=grid,
            in_specs=[
                pl.BlockSpec((B, K), lambda n, k: (0, 0)),    # x (resident)
                pl.BlockSpec((tk, tn), lambda n, k: (k, n)),  # weight K-chunk
                pl.BlockSpec((1, tn), lambda n, k: (0, n)),   # bias (resident)
            ],
            out_specs=pl.BlockSpec((B, tn), lambda n, k: (0, n)),
        ),
        compiler_params=pltpu.CompilerParams(
            dimension_semantics=("parallel", "arbitrary"),  # N parallel, K reduce
        ),
        cost_estimate=cost,
    )(x, w_t, b)


def _pick_n_tile():
    """Split N across the two TensorCores on v7x; single tile elsewhere."""
    try:
        kind = jax.devices()[0].device_kind.lower()
    except Exception:
        return OUT_FEATURES
    if "v7" in kind:
        return OUT_FEATURES // 2  # 256-wide tiles, still a multiple of 128 lanes
    return OUT_FEATURES


def init_params(key):
    """Deterministic params matching the PyTorch __init__.

    nn.Linear(4096, 512) weight kaiming_normal_(mode='fan_out',
    nonlinearity='relu') -> std = sqrt(2 / fan_out) = sqrt(2 / 512).
    Bias keeps the default nn.Linear init: U(-1/sqrt(fan_in), 1/sqrt(fan_in)).
    """
    kw, kb = jax.random.split(key)
    std = (2.0 / OUT_FEATURES) ** 0.5
    # PyTorch weight is (out, in); store transposed (in, out) for the kernel.
    w = jax.random.normal(kw, (OUT_FEATURES, IN_FEATURES), jnp.float32) * std
    bound = 1.0 / (IN_FEATURES ** 0.5)
    b = jax.random.uniform(
        kb, (OUT_FEATURES,), jnp.float32, minval=-bound, maxval=bound
    )
    return w.T, b.reshape(1, OUT_FEATURES)


if __name__ == "__main__":
    key = jax.random.PRNGKey(0)
    k_x, k_p = jax.random.split(key)

    B = 8  # small batch (8 sublanes -> no masked partial stores)
    x = jax.random.normal(k_x, (B, IN_FEATURES), jnp.float32)
    w_t, b = init_params(k_p)

    out = converter_forward(x, w_t, b, tk=2048, tn=_pick_n_tile())
    jax.block_until_ready(out)

    # sanity check against a plain-JAX reference
    ref = x @ w_t + b
    ref = jnp.where(ref >= 0, ref, NEG_SLOPE * ref)
    assert out.shape == (B, OUT_FEATURES)
    assert jnp.allclose(out, ref, atol=1e-4, rtol=1e-4)

    print("KERNEL_OK")
</pallas_src>

<mosaic_0001>
module attributes {stable_mosaic.version = 11 : i64} {
  func.func @_linear_leakyrelu_kernel(%arg0: i32, %arg1: i32, %arg2: memref<8x4096xf32, #tpu.memory_space<vmem>>, %arg3: memref<2048x512xf32, #tpu.memory_space<vmem>>, %arg4: memref<1x512xf32, #tpu.memory_space<vmem>>, %arg5: memref<8x512xf32, #tpu.memory_space<vmem>>) attributes {dimension_semantics = [#tpu.dimension_semantics<parallel>, #tpu.dimension_semantics<arbitrary>], iteration_bounds = array<i64: 1, 2>, scalar_prefetch = 0 : i64, scratch_operands = 0 : i64, tpu.core_type = #tpu.core_type<tc>, window_params = [{pipeline_mode = #tpu.pipeline_mode<synchronous>, transform_indices = @transform_0, window_bounds = array<i64: 8, 4096>}, {transform_indices = @transform_1, window_bounds = array<i64: 2048, 512>}, {transform_indices = @transform_2, window_bounds = array<i64: 1, 512>}, {transform_indices = @transform_3, window_bounds = array<i64: 8, 512>}]} {
    %c0_i32 = arith.constant 0 : i32
    %0 = arith.cmpi eq, %arg1, %c0_i32 : i32
    %1 = arith.extui %0 : i1 to i32
    %c0_i32_0 = arith.constant 0 : i32
    %2 = arith.cmpi ne, %1, %c0_i32_0 : i32
    scf.if %2 {
      %cst_8 = arith.constant 0.000000e+00 : f32
      %15 = vector.broadcast %cst_8 : f32 to vector<8x512xf32>
      %c0_9 = arith.constant 0 : index
      %c0_10 = arith.constant 0 : index
      %16 = vector.load %arg5[%c0_9, %c0_10] : memref<8x512xf32, #tpu.memory_space<vmem>>, vector<8x512xf32>
      tpu.vector_store %arg5[%c0_9, %c0_10], %15 {strides = array<i32>} : memref<8x512xf32, #tpu.memory_space<vmem>>, vector<8x512xf32>,
    } else {
    }
    %c2048_i32 = arith.constant 2048 : i32
    %3 = arith.muli %arg1, %c2048_i32 : i32
    %4 = tpu.assume_multiple %3, 2048 : i32
    %c0 = arith.constant 0 : index
    %5 = arith.index_cast %4 : i32 to index
    %6 = vector.load %arg2[%c0, %5] : memref<8x4096xf32, #tpu.memory_space<vmem>>, vector<8x2048xf32>
    %c0_1 = arith.constant 0 : index
    %c0_2 = arith.constant 0 : index
    %7 = vector.load %arg5[%c0_1, %c0_2] : memref<8x512xf32, #tpu.memory_space<vmem>>, vector<8x512xf32>
    %c0_3 = arith.constant 0 : index
    %c0_4 = arith.constant 0 : index
    %8 = vector.load %arg3[%c0_3, %c0_4] : memref<2048x512xf32, #tpu.memory_space<vmem>>, vector<2048x512xf32>
    %cst = arith.constant dense<0.000000e+00> : vector<8x512xf32>
    %9 = tpu.matmul %6, %8, %cst {dimension_numbers = #tpu.dot_dimension_numbers<[1], [0], [0], [1], [0, 0, 1, 1], [], []>} : vector<8x2048xf32>, vector<2048x512xf32>, vector<8x512xf32> -> vector<8x512xf32>
    %10 = arith.addf %7, %9 : vector<8x512xf32>
    %c0_5 = arith.constant 0 : index
    %c0_6 = arith.constant 0 : index
    %11 = vector.load %arg5[%c0_5, %c0_6] : memref<8x512xf32, #tpu.memory_space<vmem>>, vector<8x512xf32>
    tpu.vector_store %arg5[%c0_5, %c0_6], %10 {strides = array<i32>} : memref<8x512xf32, #tpu.memory_space<vmem>>, vector<8x512xf32>,
    %c1_i32 = arith.constant 1 : i32
    %12 = arith.cmpi eq, %arg1, %c1_i32 : i32
    %13 = arith.extui %12 : i1 to i32
    %c0_i32_7 = arith.constant 0 : i32
    %14 = arith.cmpi ne, %13, %c0_i32_7 : i32
    scf.if %14 {
      %c0_8 = arith.constant 0 : index
      %c0_9 = arith.constant 0 : index
      %15 = vector.load %arg5[%c0_8, %c0_9] : memref<8x512xf32, #tpu.memory_space<vmem>>, vector<8x512xf32>
      %c0_10 = arith.constant 0 : index
      %c0_11 = arith.constant 0 : index
      %16 = vector.load %arg4[%c0_10, %c0_11] : memref<1x512xf32, #tpu.memory_space<vmem>>, vector<1x512xf32>
      %17 = vector.broadcast %16 : vector<1x512xf32> to vector<8x512xf32>
      %18 = arith.addf %15, %17 : vector<8x512xf32>
      %cst_12 = arith.constant 0.000000e+00 : f32
      %19 = vector.broadcast %cst_12 : f32 to vector<8x512xf32>
      %20 = arith.cmpf oge, %18, %19 : vector<8x512xf32>
      %cst_13 = arith.constant 0.00999999977 : f32
      %21 = vector.broadcast %cst_13 : f32 to vector<8x512xf32>
      %22 = arith.mulf %21, %18 : vector<8x512xf32>
      %23 = arith.select %20, %18, %22 : vector<8x512xi1>, vector<8x512xf32>
      %c0_14 = arith.constant 0 : index
      %c0_15 = arith.constant 0 : index
      %24 = vector.load %arg5[%c0_14, %c0_15] : memref<8x512xf32, #tpu.memory_space<vmem>>, vector<8x512xf32>
      tpu.vector_store %arg5[%c0_14, %c0_15], %23 {strides = array<i32>} : memref<8x512xf32, #tpu.memory_space<vmem>>, vector<8x512xf32>,
    } else {
    }
    return
  }
  func.func @transform_0(%arg0: i32, %arg1: i32) -> (i32, i32) {
    %c0_i32 = arith.constant 0 : i32
    %c0_i32_0 = arith.constant 0 : i32
    %c0_i32_1 = arith.constant 0 : i32
    return %c0_i32, %c0_i32_0 : i32, i32
  }
  func.func @transform_1(%arg0: i32, %arg1: i32) -> (i32, i32) {
    %c0_i32 = arith.constant 0 : i32
    return %arg1, %arg0 : i32, i32
  }
  func.func @transform_2(%arg0: i32, %arg1: i32) -> (i32, i32) {
    %c0_i32 = arith.constant 0 : i32
    %c0_i32_0 = arith.constant 0 : i32
    return %c0_i32, %arg0 : i32, i32
  }
  func.func @transform_3(%arg0: i32, %arg1: i32) -> (i32, i32) {
    %c0_i32 = arith.constant 0 : i32
    %c0_i32_0 = arith.constant 0 : i32
    return %c0_i32, %arg0 : i32, i32
  }
}

</mosaic_0001>

<bundles_post_ra>
// kernel: converter_forward.1
= control target key start
LH: loop header
LB: loop body
LE: loop exit
PB: predicated region body
PF: predicated region fallthrough
CT: control target
= control target key end

     0   :  { %8 = vsyncpa [#allocation3], 0  ;;  %s5209_s0 = inlined_call_operand.hbm [shape: f32[8,4096], index: 0, kind: input, shape index: {}]   ;;  %s5210_s1 = inlined_call_operand.hbm [shape: f32[4096,512], index: 1, kind: input, shape index: {}]   ;;  %s5211_s2 = inlined_call_operand.hbm [shape: f32[1,512], index: 2, kind: input, shape index: {}]   ;;  %s5212_s3 = inlined_call_operand.hbm [shape: f32[8,512], index: 3, kind: output, shape index: {}]  }
   0x1   :  { %9 = vsyncpa [#allocation6], 0 }
   0x2   :  { %11 = vsyncpa [#allocation6 + $0x1], 0 }
   0x3   :  { %12 = vsyncpa [#allocation4], 0  ;;  %s3950_s12 = smov 0   ;;  %s3952_s13 = smov 0  }
   0x4   :  { %s3954_s14 = smov 0   ;;  %s3956_s15 = smov 0  }
   0x5   :  { %s3958_s16 = smov 0   ;;  %s3960_s17 = smov 0  }
   0x6 LB: > { %s3979_s18 = sadd.s32 4294967295, %s3921_s17   ;;  %s60_s19 = sadd.s32 1, %s3909_s14  ;;  %s3921_s17 = sphi %s3960_s17, %s18_s17   ;;  %s3917_s16 = sphi %s3958_s16, %s5232_s16   ;;  %s3913_s15 = sphi %s3956_s15, %s5231_s15   ;;  %s3909_s14 = sphi %s3954_s14, %s5230_s14   ;;  %s3905_s13 = sphi %s3952_s13, %s5229_s13   ;;  %s3901_s12 = sphi %s3950_s12, %s5228_s12  }
   0x7   : > { %p67_p0 = scmp.ne.s32.totalorder %s3909_s14, %s3905_s13  ;;  %p68_p1 = scmp.eq.s32.totalorder %s3921_s17, 0 }
   0x8   : > { %p73_p2 = scmp.ne.s32.totalorder %s3905_s13, %s3901_s12  ;;  %p5213_p3 = scmp.eq.s32.totalorder %s3979_s18, 0 }
   0x9   : > { %p69_p4 = por %p68_p1, %p67_p0  ;;  %p2587_p5 = scmp.ge.s32.totalorder %s3921_s17, 1 }
   0xa   : > { %p3990_p6 = por %p5213_p3, %p73_p2  ;;  %p136_p7 = scmp.lt.s32.totalorder %s3921_s17, 3 }
   0xb   : > { %s3923_s22 = smov [#allocation7]   ;;  %p3688_p10 = scmp.lt.s32.totalorder %s3921_s17, 2 }
   0xc   : > { %s5217_s20 = scalar_select %p3990_p6, 1, 0 }
   0xd   : > { %p3995_p8 = pnand %p2587_p5, %p136_p7  ;;  %s163_s23 = sshll.u32 %s3923_s22, 4  ;;  %s164_s23 = int_to_ptr.vmem [resolvable:$true] %s163_s23 }
   0xe   : > { %p4008_p12 = pnand %p3688_p10, %p69_p4  ;;  %s3924_s26 = smov [#allocation2]  }
   0xf   : > { %s5218_s21 = scalar_select %p3995_p8, 1, 0 }
  0x10   : > { %p3675_p9 = pneg %p3995_p8  ;;  %s149_s27 = sshll.u32 %s3924_s26, 4  ;;  %s150_s27 = int_to_ptr.vmem [resolvable:$true] %s149_s27 }
  0x11   : > { %s5220_s25 = scalar_select %p4008_p12, 1, 0 }
  0x12   : > { %p4004_p11 = pnand %p3675_p9, %p5213_p3  ;;  %s3747_s30 = scalar_lea.hbm %s5211_s2, 64 }
  0x13   : > { %p3748_p13 = scmp.ne.s32.totalorder %s5211_s2, %s3747_s30  ;;  %p3754_p4 = scmp.lt.u32.totalorder %s3747_s30, %s5211_s2 }
  0x14   : > { %p3749_p0 = pneg %p4004_p11 }
  0x16   : > { %p3750_p1 = pnand %p3749_p0, %p3748_p13 }
  0x18   : > { %p3751_p2 = pneg %p3750_p1 }
  0x1a   : > { %p3756_p5 = pnand %p3754_p4, %p3751_p2 }
  0x1c   : > { %3759 = shalt.err (!%p3756_p5)
}
  0x1d   : > { %s3760_s8 = scalar_lea.vmem %s164_s23, 64  ;;  %p3768_p3 = scmp.lt.s32.totalorder %s164_s23, %s164_s23 }
  0x1e   : > { %p3761_p7 = scmp.ne.s32.totalorder %s164_s23, %s3760_s8  ;;  %p3769_p6 = scmp.lt.s32.totalorder %s3760_s8, %s3760_s8 }
  0x20   : > { %p3763_p9 = pnand %p3761_p7, %p3749_p0  ;;  %p3770_p8 = por %p3769_p6, %p3768_p3 }
  0x22   : > { %p3764_p10 = pneg %p3763_p9 }
  0x24   : > { %p3771_p12 = pnand %p3770_p8, %p3764_p10 }
  0x26   : > { %3774 = shalt.err (!%p3771_p12)
}
  0x27   : > { %3681 = dma.hbm_to_vmem [thread:$0]  (!%p4004_p11), %s5211_s2, 64, %s164_s23, [#allocation6]  }
  0x28   : > { %s3775_s22 = scalar_lea.hbm %s5209_s0, 4096 }
  0x29   : > { %p3776_p13 = scmp.ne.s32.totalorder %s5209_s0, %s3775_s22  ;;  %p3782_p8 = scmp.lt.u32.totalorder %s3775_s22, %s5209_s0 }
  0x2b   : > { %p3778_p3 = pnand %p3776_p13, %p3749_p0 }
  0x2d   : > { %p3779_p6 = pneg %p3778_p3 }
  0x2f   : > { %p3784_p12 = pnand %p3782_p8, %p3779_p6 }
  0x31   : > { %3787 = shalt.err (!%p3784_p12)
}
  0x32   : > { %s3788_s23 = scalar_lea.vmem %s150_s27, 4096  ;;  %p3796_p5 = scmp.lt.s32.totalorder %s150_s27, %s150_s27 }
  0x33   : > { %p3789_p1 = scmp.ne.s32.totalorder %s150_s27, %s3788_s23  ;;  %p3797_p7 = scmp.lt.s32.totalorder %s3788_s23, %s3788_s23 }
  0x35   : > { %p3791_p2 = pnand %p3789_p1, %p3749_p0  ;;  %p3798_p9 = por %p3797_p7, %p3796_p5 }
  0x37   : > { %p3792_p4 = pneg %p3791_p2 }
  0x39   : > { %p3799_p10 = pnand %p3798_p9, %p3792_p4 }
  0x3b   : > { %3802 = shalt.err (!%p3799_p10)
}
  0x3c   : > { %3678 = dma.hbm_to_vmem [thread:$0]  (!%p4004_p11), %s5209_s0, 4096, %s150_s27, [#allocation3]  }
  0x3d   : > { %s174_s6 = sand.u32 1, %s3921_s17   ;;  %s27_s7 = sadd.s32 1, %s3917_s16 }
  0x3e   : > { %p28_p0 = scmp.ge.s32.totalorder %s27_s7, 2  ;;  %s176_s8 = sand.u32 1, %s3909_s14  }
  0x3f   : > { %s2591_s9 = sshll.u32 %s176_s8, 13  ;;  %s2608_s10 = sshll.u32 %s3917_s16, 17 }
  0x40   : > { %s5234_s7 = smov (%p28_p0, %s27_s7), 0  ;;  %s4063_s12 = scalar_lea.hbm %s5210_s1, %s2608_s10 }
  0x41   : > { %s55_s27 = ssub.s32 %s3917_s16, %s5234_s7  ;;  %s178_s22 = scalar_lea.vmem [#allocation5], %s2591_s9 }
  0x42   : > { %s188_s26 = sshll.u32 %s178_s22, 4  ;;  %p58_p11 = scmp.eq.s32.totalorder %s55_s27, 0  ;;  %s4067_s26 = int_to_ptr.vmem [resolvable:$true] %s188_s26 }
  0x43   : > { %s4074_s29 = scalar_lea.sflag [#allocation6], %s174_s6  ;;  %s3803_s30 = scalar_lea.hbm %s4063_s12, 131072 }
  0x44   : > { %s4072_s28 = scalar_select %p58_p11, %s3909_s14, %s60_s19  }
  0x45   : > { %p3804_p13 = scmp.ne.s32.totalorder %s4063_s12, %s3803_s30  ;;  %p5221_p3 = scmp.ne.s32.totalorder %s5220_s25, 0 }
  0x46   : > { %s3808_s5 = scalar_lea.hbm %s5210_s1, 262144  ;;  %p3809_p1 = scmp.lt.u32.totalorder %s4063_s12, %s5210_s1 }
  0x47   : > { %p3805_p6 = pneg %p5221_p3  ;;  %p3810_p2 = scmp.lt.u32.totalorder %s3808_s5, %s3803_s30 }
  0x48   : > { %p3812_p5 = scmp.lt.u32.totalorder %s3803_s30, %s4063_s12 }
  0x49   : > { %p3806_p8 = pnand %p3805_p6, %p3804_p13  ;;  %p3811_p4 = por %p3810_p2, %p3809_p1 }
  0x4b   : > { %p3807_p12 = pneg %p3806_p8  ;;  %p3813_p7 = por %p3812_p5, %p3811_p4 }
  0x4d   : > { %p3814_p9 = pnand %p3813_p7, %p3807_p12 }
  0x4f   : > { %3817 = shalt.err (!%p3814_p9)
}
  0x50   : > { %s3818_s19 = scalar_lea.vmem %s4067_s26, 131072  ;;  %s3925_s6 = smov [#allocation5]  }
  0x51   : > { %p3819_p10 = scmp.ne.s32.totalorder %s4067_s26, %s3818_s19  ;;  %s3823_s10 = sshll.u32 %s3925_s6, 4  ;;  %s3824_s10 = int_to_ptr.vmem [resolvable:$false] %s3823_s10 }
  0x52   : > { %s3825_s24 = scalar_lea.vmem %s3824_s10, 262144  ;;  %p3826_p13 = scmp.lt.s32.totalorder %s4067_s26, %s3824_s10 }
  0x53   : > { %p3821_p0 = pnand %p3819_p10, %p3805_p6  ;;  %p3827_p8 = scmp.lt.s32.totalorder %s3825_s24, %s3818_s19 }
  0x55   : > { %p3822_p11 = pneg %p3821_p0  ;;  %p3828_p1 = por %p3827_p8, %p3826_p13 }
  0x57   : > { %p3829_p2 = pnand %p3828_p1, %p3822_p11 }
  0x59   : > { %3832 = shalt.err (!%p3829_p2)
}
  0x5a   : > { %s3926_s11 = smov 512   ;;  %s3927_s27 = smov 32  }
  0x5b   : > { %3685 = dma.hbm_to_vmem [thread:$0]  (!%p5221_p3), %s4063_s12, 131072, %s4067_s26, %s4074_s29, %s3926_s11, %s3926_s11, %s3927_s27  }
  0x5c   : > { %p5222_p6 = scmp.ne.s32.totalorder %s5218_s21, 0 }
  0x5d   : > { %p5223_p12 = scmp.eq.s32.totalorder (!%p5222_p6), %s3979_s18, 0 }
  0x5e   : > { %200 = sbr.rel (%p5222_p6) target bundleno = 890 (0x37a), region = 32 }
  0x65   : > { %3884 = dma.done.wait (%p5223_p12), [#allocation3], 4096   ;;  %p5224_p4 = pmov %p5223_p12 }
  0x66   : > { %s206_s22 = sand.u32 1, %s3979_s18   ;;  %s208_s30 = sand.u32 1, %s3905_s13  }
  0x67   : > { %3886 = vsyncadd (%p5224_p4), [#allocation3], 4294963200  ;;  %s2597_s23 = sshll.u32 %s208_s30, 13  ;;  %s207_s4 = scalar_lea.sflag [#allocation6], %s206_s22 }
  0x68   : > { %s4110_s5 = scalar_lea.vmem [#allocation5], %s2597_s23  ;;  %p5225_p5 = scmp.ne.s32.totalorder %s5217_s20, 0 }
  0x6a   : > { %3888 = dma.done.wait (%p5225_p5), %s207_s4, 131072  }
  0x6b   : > { %3890 = vsyncadd (%p5225_p5), %s207_s4, 4294836224  ;;  %p5226_p3 = pmov %p5224_p4 }
  0x6d   : > { %3892 = dma.done.wait (%p5226_p3), [#allocation6], 64   ;;  %p5227_p7 = pmov %p5226_p3 }
  0x6e   : > { %p2599_p9 = scmp.ne.s32.totalorder %s3913_s15, 0 }
  0x6f   : > { %3894 = vsyncadd (%p5227_p7), [#allocation6], 4294967232  ;;  %v3928_v0 = vmov (!%p2599_p9), 0.0  }
  0x70   : > { %239 = sbr.rel (%p2599_p9) target bundleno = 119 (0x77), region = 48  ;;  %240 = vst [vmem:[#allocation8] sm:$0xff] (!%p2599_p9), %v3928_v0  ;;  %241 = vst [vmem:[#allocation8 + $0x8] sm:$0xff] (!%p2599_p9), %v3928_v0 }
  0x71   : > { %242 = vst [vmem:[#allocation8 + $0x10] sm:$0xff] (!%p2599_p9), %v3928_v0  ;;  %243 = vst [vmem:[#allocation8 + $0x18] sm:$0xff] (!%p2599_p9), %v3928_v0 }
  0x77 PF: > { %v270_v1 = vld [vmem:[%s4110_s5 + $0x8] sm:$0xff]  ;;  %v272_v3 = vld [vmem:[%s4110_s5 + $0x18] sm:$0xff]  ;;  %v269_v6 = vld [vmem:[%s4110_s5] sm:$0xff]  ;;  %s2600_s20 = sshll.u32 %s3913_s15, 11  ;;  %p2602_p10 = scmp.ne.s32.totalorder %s3913_s15, 1 }
  0x78   : > { %v274_v2 = vld [vmem:[%s4110_s5 + $0x28] sm:$0xff]  ;;  %v276_v5 = vld [vmem:[%s4110_s5 + $0x38] sm:$0xff]  ;;  %v273_v7 = vld [vmem:[%s4110_s5 + $0x20] sm:$0xff]  ;;  %s4201_s21 = sshra.s32 %s2600_s20, 7 }
  0x79   : > { %v2609_v4 = vpack.c.bf16 %v274_v2, %v270_v1  ;;  %v3121_v8 = vpack.c.bf16 %v276_v5, %v272_v3  ;;  %v2611_v9 = vpack.c.bf16 %v273_v7, %v269_v6  ;;  %v271_v10 = vld [vmem:[%s4110_s5 + $0x10] sm:$0xff]  ;;  %v278_v12 = vld [vmem:[%s4110_s5 + $0x48] sm:$0xff]  ;;  %v280_v15 = vld [vmem:[%s4110_s5 + $0x58] sm:$0xff]  ;;  %s2601_s25 = sshll.u32 %s4201_s21, 3 }
  0x7a   : > { %v275_v11 = vld [vmem:[%s4110_s5 + $0x30] sm:$0xff]  ;;  %v282_v14 = vld [vmem:[%s4110_s5 + $0x68] sm:$0xff]  ;;  %v284_v16 = vld [vmem:[%s4110_s5 + $0x78] sm:$0xff]  ;;  %s4223_s12 = scalar_lea.vmem [#allocation2], %s2601_s25 }
  0x7b   : > { %2610 = vmatprep.subr.bf16.mxu0 %v2609_v4  ;;  %v3123_v13 = vpack.c.bf16 %v275_v11, %v271_v10  ;;  %3122 = vmatprep.subr.bf16.mxu1 %v3121_v8  ;;  %v2613_v17 = vpack.c.bf16 %v282_v14, %v278_v12  ;;  %v3125_v18 = vpack.c.bf16 %v284_v16, %v280_v15  ;;  %v277_v19 = vld [vmem:[%s4110_s5 + $0x40] sm:$0xff]  ;;  %v279_v21 = vld [vmem:[%s4110_s5 + $0x50] sm:$0xff]  ;;  %v286_v24 = vld [vmem:[%s4110_s5 + $0x88] sm:$0xff] }
  0x7c   : > { %2612 = vmatpush1.bf16.msra.mxu0 %v2611_v9  ;;  %v281_v20 = vld [vmem:[%s4110_s5 + $0x60] sm:$0xff]  ;;  %v283_v23 = vld [vmem:[%s4110_s5 + $0x70] sm:$0xff]  ;;  %v290_v25 = vld [vmem:[%s4110_s5 + $0xa8] sm:$0xff] }
  0x7d   : > { %3124 = vmatpush1.bf16.msra.mxu1 %v3123_v13  ;;  %v2615_v22 = vpack.c.bf16 %v281_v20, %v277_v19  ;;  %2614 = vmatprep.subr.bf16.mxu0 %v2613_v17  ;;  %v3127_v26 = vpack.c.bf16 %v283_v23, %v279_v21  ;;  %v2617_v27 = vpack.c.bf16 %v290_v25, %v286_v24  ;;  %v288_v28 = vld [vmem:[%s4110_s5 + $0x98] sm:$0xff]  ;;  %v285_v30 = vld [vmem:[%s4110_s5 + $0x80] sm:$0xff]  ;;  %v287_v33 = vld [vmem:[%s4110_s5 + $0x90] sm:$0xff] }
  0x7e   : > { %3126 = vmatprep.subr.bf16.mxu1 %v3125_v18  ;;  %v292_v29 = vld [vmem:[%s4110_s5 + $0xb8] sm:$0xff]  ;;  %v289_v32 = vld [vmem:[%s4110_s5 + $0xa0] sm:$0xff]  ;;  %v291_v34 = vld [vmem:[%s4110_s5 + $0xb0] sm:$0xff] }
  0x7f   : > { %v3129_v31 = vpack.c.bf16 %v292_v29, %v288_v28  ;;  %v2619_v35 = vpack.c.bf16 %v289_v32, %v285_v30  ;;  %v294_v36 = vld [vmem:[%s4110_s5 + $0xc8] sm:$0xff]  ;;  %v296_v38 = vld [vmem:[%s4110_s5 + $0xd8] sm:$0xff]  ;;  %v3131_v39 = vpack.c.bf16 %v291_v34, %v287_v33  ;;  %v293_v42 = vld [vmem:[%s4110_s5 + $0xc0] sm:$0xff] }
  0x80   : > { %2616 = vmatpush1.bf16.msra.mxu0 %v2615_v22  ;;  %v298_v37 = vld [vmem:[%s4110_s5 + $0xe8] sm:$0xff]  ;;  %v300_v41 = vld [vmem:[%s4110_s5 + $0xf8] sm:$0xff]  ;;  %v297_v43 = vld [vmem:[%s4110_s5 + $0xe0] sm:$0xff] }
  0x81   : > { %3128 = vmatpush1.bf16.msra.mxu1 %v3127_v26  ;;  %2618 = vmatprep.subr.bf16.mxu0 %v2617_v27  ;;  %v2621_v40 = vpack.c.bf16 %v298_v37, %v294_v36  ;;  %v3133_v44 = vpack.c.bf16 %v300_v41, %v296_v38  ;;  %v295_v45 = vld [vmem:[%s4110_s5 + $0xd0] sm:$0xff]  ;;  %v302_v47 = vld [vmem:[%s4110_s5 + $0x108] sm:$0xff]  ;;  %v304_v49 = vld [vmem:[%s4110_s5 + $0x118] sm:$0xff]  ;;  %v2623_v51 = vpack.c.bf16 %v297_v43, %v293_v42 }
  0x82   : > { %3130 = vmatprep.subr.bf16.mxu1 %v3129_v31  ;;  %v299_v46 = vld [vmem:[%s4110_s5 + $0xf0] sm:$0xff]  ;;  %v306_v48 = vld [vmem:[%s4110_s5 + $0x128] sm:$0xff]  ;;  %v308_v50 = vld [vmem:[%s4110_s5 + $0x138] sm:$0xff] }
  0x83   : > { %v3135_v52 = vpack.c.bf16 %v299_v46, %v295_v45  ;;  %v2625_v53 = vpack.c.bf16 %v306_v48, %v302_v47  ;;  %v301_v54 = vld [vmem:[%s4110_s5 + $0x100] sm:$0xff]  ;;  %v303_v56 = vld [vmem:[%s4110_s5 + $0x110] sm:$0xff]  ;;  %v3137_v57 = vpack.c.bf16 %v308_v50, %v304_v49  ;;  %v310_v59 = vld [vmem:[%s4110_s5 + $0x148] sm:$0xff] }
  0x84   : > { %2620 = vmatpush1.bf16.msra.mxu0 %v2619_v35  ;;  %v305_v55 = vld [vmem:[%s4110_s5 + $0x120] sm:$0xff]  ;;  %v307_v58 = vld [vmem:[%s4110_s5 + $0x130] sm:$0xff]  ;;  %v314_v60 = vld [vmem:[%s4110_s5 + $0x168] sm:$0xff] }
  0x85   : > { %3132 = vmatpush1.bf16.msra.mxu1 %v3131_v39  ;;  %2622 = vmatprep.subr.bf16.mxu0 %v2621_v40  ;;  %v312_v61 = vld [vmem:[%s4110_s5 + $0x158] sm:$0xff]  ;;  %v2627_v63 = vpack.c.bf16 %v305_v55, %v301_v54  ;;  %v3139_v0 = vpack.c.bf16 %v307_v58, %v303_v56  ;;  %v2629_v1 = vpack.c.bf16 %v314_v60, %v310_v59  ;;  %v309_v2 = vld [vmem:[%s4110_s5 + $0x140] sm:$0xff]  ;;  %v311_v4 = vld [vmem:[%s4110_s5 + $0x150] sm:$0xff] }
  0x86   : > { %3134 = vmatprep.subr.bf16.mxu1 %v3133_v44  ;;  %v316_v62 = vld [vmem:[%s4110_s5 + $0x178] sm:$0xff]  ;;  %v313_v3 = vld [vmem:[%s4110_s5 + $0x160] sm:$0xff]  ;;  %v315_v6 = vld [vmem:[%s4110_s5 + $0x170] sm:$0xff] }
  0x87   : > { %v3141_v5 = vpack.c.bf16 %v316_v62, %v312_v61  ;;  %v318_v7 = vld [vmem:[%s4110_s5 + $0x188] sm:$0xff]  ;;  %v320_v9 = vld [vmem:[%s4110_s5 + $0x198] sm:$0xff]  ;;  %v2631_v11 = vpack.c.bf16 %v313_v3, %v309_v2  ;;  %v3143_v12 = vpack.c.bf16 %v315_v6, %v311_v4  ;;  %v317_v14 = vld [vmem:[%s4110_s5 + $0x180] sm:$0xff] }
  0x88   : > { %2624 = vmatpush1.bf16.msra.mxu0 %v2623_v51  ;;  %v322_v8 = vld [vmem:[%s4110_s5 + $0x1a8] sm:$0xff]  ;;  %v324_v10 = vld [vmem:[%s4110_s5 + $0x1b8] sm:$0xff]  ;;  %v321_v15 = vld [vmem:[%s4110_s5 + $0x1a0] sm:$0xff] }
  0x89   : > { %3136 = vmatpush1.bf16.msra.mxu1 %v3135_v52  ;;  %2626 = vmatprep.subr.bf16.mxu0 %v2625_v53  ;;  %v2633_v13 = vpack.c.bf16 %v322_v8, %v318_v7  ;;  %v319_v16 = vld [vmem:[%s4110_s5 + $0x190] sm:$0xff]  ;;  %v3145_v17 = vpack.c.bf16 %v324_v10, %v320_v9  ;;  %v326_v19 = vld [vmem:[%s4110_s5 + $0x1c8] sm:$0xff]  ;;  %v328_v21 = vld [vmem:[%s4110_s5 + $0x1d8] sm:$0xff]  ;;  %v2635_v23 = vpack.c.bf16 %v321_v15, %v317_v14 }
  0x8a   : > { %3138 = vmatprep.subr.bf16.mxu1 %v3137_v57  ;;  %v323_v18 = vld [vmem:[%s4110_s5 + $0x1b0] sm:$0xff]  ;;  %v330_v20 = vld [vmem:[%s4110_s5 + $0x1e8] sm:$0xff]  ;;  %v332_v22 = vld [vmem:[%s4110_s5 + $0x1f8] sm:$0xff] }
  0x8b   : > { %v3147_v24 = vpack.c.bf16 %v323_v18, %v319_v16  ;;  %v2637_v25 = vpack.c.bf16 %v330_v20, %v326_v19  ;;  %v325_v26 = vld [vmem:[%s4110_s5 + $0x1c0] sm:$0xff]  ;;  %v327_v28 = vld [vmem:[%s4110_s5 + $0x1d0] sm:$0xff]  ;;  %v3149_v29 = vpack.c.bf16 %v332_v22, %v328_v21  ;;  %v334_v31 = vld [vmem:[%s4110_s5 + $0x208] sm:$0xff] }
  0x8c   : > { %2628 = vmatpush1.bf16.msra.mxu0 %v2627_v63  ;;  %v329_v27 = vld [vmem:[%s4110_s5 + $0x1e0] sm:$0xff]  ;;  %v331_v30 = vld [vmem:[%s4110_s5 + $0x1f0] sm:$0xff]  ;;  %v338_v32 = vld [vmem:[%s4110_s5 + $0x228] sm:$0xff] }
  0x8d   : > { %3140 = vmatpush1.bf16.msra.mxu1 %v3139_v0  ;;  %2630 = vmatprep.subr.bf16.mxu0 %v2629_v1  ;;  %v336_v33 = vld [vmem:[%s4110_s5 + $0x218] sm:$0xff]  ;;  %v2639_v35 = vpack.c.bf16 %v329_v27, %v325_v26  ;;  %v3151_v36 = vpack.c.bf16 %v331_v30, %v327_v28  ;;  %v2641_v37 = vpack.c.bf16 %v338_v32, %v334_v31  ;;  %v333_v38 = vld [vmem:[%s4110_s5 + $0x200] sm:$0xff]  ;;  %v335_v40 = vld [vmem:[%s4110_s5 + $0x210] sm:$0xff] }
  0x8e   : > { %3142 = vmatprep.subr.bf16.mxu1 %v3141_v5  ;;  %v340_v34 = vld [vmem:[%s4110_s5 + $0x238] sm:$0xff]  ;;  %v337_v39 = vld [vmem:[%s4110_s5 + $0x220] sm:$0xff]  ;;  %v339_v42 = vld [vmem:[%s4110_s5 + $0x230] sm:$0xff] }
  0x8f   : > { %v3153_v41 = vpack.c.bf16 %v340_v34, %v336_v33  ;;  %v342_v43 = vld [vmem:[%s4110_s5 + $0x248] sm:$0xff]  ;;  %v344_v45 = vld [vmem:[%s4110_s5 + $0x258] sm:$0xff]  ;;  %v2643_v47 = vpack.c.bf16 %v337_v39, %v333_v38  ;;  %v3155_v48 = vpack.c.bf16 %v339_v42, %v335_v40  ;;  %v341_v50 = vld [vmem:[%s4110_s5 + $0x240] sm:$0xff] }
  0x90   : > { %2632 = vmatpush1.bf16.msra.mxu0 %v2631_v11  ;;  %v346_v44 = vld [vmem:[%s4110_s5 + $0x268] sm:$0xff]  ;;  %v348_v46 = vld [vmem:[%s4110_s5 + $0x278] sm:$0xff]  ;;  %v345_v51 = vld [vmem:[%s4110_s5 + $0x260] sm:$0xff] }
  0x91   : > { %3144 = vmatpush1.bf16.msra.mxu1 %v3143_v12  ;;  %2634 = vmatprep.subr.bf16.mxu0 %v2633_v13  ;;  %v2645_v49 = vpack.c.bf16 %v346_v44, %v342_v43  ;;  %v343_v52 = vld [vmem:[%s4110_s5 + $0x250] sm:$0xff]  ;;  %v3157_v53 = vpack.c.bf16 %v348_v46, %v344_v45  ;;  %v350_v55 = vld [vmem:[%s4110_s5 + $0x288] sm:$0xff]  ;;  %v352_v57 = vld [vmem:[%s4110_s5 + $0x298] sm:$0xff]  ;;  %v2647_v59 = vpack.c.bf16 %v345_v51, %v341_v50 }
  0x92   : > { %3146 = vmatprep.subr.bf16.mxu1 %v3145_v17  ;;  %v347_v54 = vld [vmem:[%s4110_s5 + $0x270] sm:$0xff]  ;;  %v354_v56 = vld [vmem:[%s4110_s5 + $0x2a8] sm:$0xff]  ;;  %v356_v58 = vld [vmem:[%s4110_s5 + $0x2b8] sm:$0xff] }
  0x93   : > { %v3159_v60 = vpack.c.bf16 %v347_v54, %v343_v52  ;;  %v2649_v61 = vpack.c.bf16 %v354_v56, %v350_v55  ;;  %v349_v62 = vld [vmem:[%s4110_s5 + $0x280] sm:$0xff]  ;;  %v351_v0 = vld [vmem:[%s4110_s5 + $0x290] sm:$0xff]  ;;  %v3161_v1 = vpack.c.bf16 %v356_v58, %v352_v57  ;;  %v358_v3 = vld [vmem:[%s4110_s5 + $0x2c8] sm:$0xff] }
  0x94   : > { %2636 = vmatpush1.bf16.msra.mxu0 %v2635_v23  ;;  %v353_v63 = vld [vmem:[%s4110_s5 + $0x2a0] sm:$0xff]  ;;  %v355_v2 = vld [vmem:[%s4110_s5 + $0x2b0] sm:$0xff]  ;;  %v362_v4 = vld [vmem:[%s4110_s5 + $0x2e8] sm:$0xff] }
  0x95   : > { %3148 = vmatpush1.bf16.msra.mxu1 %v3147_v24  ;;  %2638 = vmatprep.subr.bf16.mxu0 %v2637_v25  ;;  %v360_v5 = vld [vmem:[%s4110_s5 + $0x2d8] sm:$0xff]  ;;  %v2651_v7 = vpack.c.bf16 %v353_v63, %v349_v62  ;;  %v357_v8 = vld [vmem:[%s4110_s5 + $0x2c0] sm:$0xff]  ;;  %v3163_v9 = vpack.c.bf16 %v355_v2, %v351_v0  ;;  %v2653_v10 = vpack.c.bf16 %v362_v4, %v358_v3  ;;  %v359_v12 = vld [vmem:[%s4110_s5 + $0x2d0] sm:$0xff] }
  0x96   : > { %3150 = vmatprep.subr.bf16.mxu1 %v3149_v29  ;;  %v364_v6 = vld [vmem:[%s4110_s5 + $0x2f8] sm:$0xff]  ;;  %v361_v11 = vld [vmem:[%s4110_s5 + $0x2e0] sm:$0xff]  ;;  %v363_v13 = vld [vmem:[%s4110_s5 + $0x2f0] sm:$0xff] }
  0x97   : > { %v3165_v14 = vpack.c.bf16 %v364_v6, %v360_v5  ;;  %v366_v15 = vld [vmem:[%s4110_s5 + $0x308] sm:$0xff]  ;;  %v368_v18 = vld [vmem:[%s4110_s5 + $0x318] sm:$0xff]  ;;  %v2655_v20 = vpack.c.bf16 %v361_v11, %v357_v8  ;;  %v3167_v21 = vpack.c.bf16 %v363_v13, %v359_v12  ;;  %v365_v23 = vld [vmem:[%s4110_s5 + $0x300] sm:$0xff] }
  0x98   : > { %2640 = vmatpush1.bf16.msra.mxu0 %v2639_v35  ;;  %v370_v16 = vld [vmem:[%s4110_s5 + $0x328] sm:$0xff]  ;;  %v372_v19 = vld [vmem:[%s4110_s5 + $0x338] sm:$0xff]  ;;  %v369_v24 = vld [vmem:[%s4110_s5 + $0x320] sm:$0xff] }
  0x99   : > { %3152 = vmatpush1.bf16.msra.mxu1 %v3151_v36  ;;  %2642 = vmatprep.subr.bf16.mxu0 %v2641_v37  ;;  %v250_v17 = vld [vmem:[%s4223_s12 + $0x8] sm:$0xff]  ;;  %v2657_v22 = vpack.c.bf16 %v370_v16, %v366_v15  ;;  %v367_v25 = vld [vmem:[%s4110_s5 + $0x310] sm:$0xff]  ;;  %v3169_v26 = vpack.c.bf16 %v372_v19, %v368_v18  ;;  %v376_v30 = vld [vmem:[%s4110_s5 + $0x358] sm:$0xff]  ;;  %v2659_v32 = vpack.c.bf16 %v369_v24, %v365_v23 }
  0x9a   : > { %3154 = vmatprep.subr.bf16.mxu1 %v3153_v41  ;;  %1357 = vmatprep.mubr.f32.mxu0 %v250_v17  ;;  %v371_v27 = vld [vmem:[%s4110_s5 + $0x330] sm:$0xff]  ;;  %v374_v28 = vld [vmem:[%s4110_s5 + $0x348] sm:$0xff]  ;;  %v380_v31 = vld [vmem:[%s4110_s5 + $0x378] sm:$0xff] }
  0x9b   : > { %1925 = vmatprep.mubr.f32.mxu1 %v250_v17  ;;  %v378_v29 = vld [vmem:[%s4110_s5 + $0x368] sm:$0xff]  ;;  %v3171_v33 = vpack.c.bf16 %v371_v27, %v367_v25  ;;  %v373_v35 = vld [vmem:[%s4110_s5 + $0x340] sm:$0xff]  ;;  %v375_v37 = vld [vmem:[%s4110_s5 + $0x350] sm:$0xff]  ;;  %v3173_v38 = vpack.c.bf16 %v380_v31, %v376_v30 }
  0x9c   : > { %2644 = vmatpush1.bf16.msra.mxu0 %v2643_v47  ;;  %v2661_v34 = vpack.c.bf16 %v378_v29, %v374_v28  ;;  %v377_v36 = vld [vmem:[%s4110_s5 + $0x360] sm:$0xff]  ;;  %v379_v39 = vld [vmem:[%s4110_s5 + $0x370] sm:$0xff]  ;;  %v382_v40 = vld [vmem:[%s4110_s5 + $0x388] sm:$0xff] }
  0x9d   : > { %3156 = vmatpush1.bf16.msra.mxu1 %v3155_v48  ;;  %2646 = vmatprep.subr.bf16.mxu0 %v2645_v49  ;;  %v386_v41 = vld [vmem:[%s4110_s5 + $0x3a8] sm:$0xff]  ;;  %v384_v42 = vld [vmem:[%s4110_s5 + $0x398] sm:$0xff]  ;;  %v2663_v44 = vpack.c.bf16 %v377_v36, %v373_v35  ;;  %v3175_v45 = vpack.c.bf16 %v379_v39, %v375_v37  ;;  %v381_v47 = vld [vmem:[%s4110_s5 + $0x380] sm:$0xff] }
  0x9e   : > { %3158 = vmatprep.subr.bf16.mxu1 %v3157_v53  ;;  %v388_v43 = vld [vmem:[%s4110_s5 + $0x3b8] sm:$0xff]  ;;  %v2665_v46 = vpack.c.bf16 %v386_v41, %v382_v40  ;;  %v385_v48 = vld [vmem:[%s4110_s5 + $0x3a0] sm:$0xff]  ;;  %v383_v49 = vld [vmem:[%s4110_s5 + $0x390] sm:$0xff] }
  0x9f   : > { %v3177_v50 = vpack.c.bf16 %v388_v43, %v384_v42  ;;  %v387_v51 = vld [vmem:[%s4110_s5 + $0x3b0] sm:$0xff]  ;;  %v390_v52 = vld [vmem:[%s4110_s5 + $0x3c8] sm:$0xff]  ;;  %v392_v54 = vld [vmem:[%s4110_s5 + $0x3d8] sm:$0xff]  ;;  %v2667_v56 = vpack.c.bf16 %v385_v48, %v381_v47 }
  0xa0   : > { %2648 = vmatpush1.bf16.msra.mxu0 %v2647_v59  ;;  %v394_v53 = vld [vmem:[%s4110_s5 + $0x3e8] sm:$0xff]  ;;  %v396_v55 = vld [vmem:[%s4110_s5 + $0x3f8] sm:$0xff]  ;;  %v3179_v57 = vpack.c.bf16 %v387_v51, %v383_v49  ;;  %v389_v59 = vld [vmem:[%s4110_s5 + $0x3c0] sm:$0xff] }
  0xa1   : > { %3160 = vmatpush1.bf16.msra.mxu1 %v3159_v60  ;;  %2650 = vmatprep.subr.bf16.mxu0 %v2649_v61  ;;  %v2669_v58 = vpack.c.bf16 %v394_v53, %v390_v52  ;;  %v393_v60 = vld [vmem:[%s4110_s5 + $0x3e0] sm:$0xff]  ;;  %v391_v61 = vld [vmem:[%s4110_s5 + $0x3d0] sm:$0xff]  ;;  %v3181_v62 = vpack.c.bf16 %v396_v55, %v392_v54  ;;  %v398_v0 = vld [vmem:[%s4110_s5 + $0x408] sm:$0xff] }
  0xa2   : > { %3162 = vmatprep.subr.bf16.mxu1 %v3161_v1  ;;  %v395_v63 = vld [vmem:[%s4110_s5 + $0x3f0] sm:$0xff]  ;;  %v402_v1 = vld [vmem:[%s4110_s5 + $0x428] sm:$0xff]  ;;  %v400_v2 = vld [vmem:[%s4110_s5 + $0x418] sm:$0xff]  ;;  %v2671_v4 = vpack.c.bf16 %v393_v60, %v389_v59 }
  0xa3   : > { %v404_v3 = vld [vmem:[%s4110_s5 + $0x438] sm:$0xff]  ;;  %v3183_v5 = vpack.c.bf16 %v395_v63, %v391_v61  ;;  %v2673_v6 = vpack.c.bf16 %v402_v1, %v398_v0  ;;  %v401_v8 = vld [vmem:[%s4110_s5 + $0x420] sm:$0xff]  ;;  %v403_v11 = vld [vmem:[%s4110_s5 + $0x430] sm:$0xff] }
  0xa4   : > { %2652 = vmatpush1.bf16.msra.mxu0 %v2651_v7  ;;  %v397_v7 = vld [vmem:[%s4110_s5 + $0x400] sm:$0xff]  ;;  %v406_v12 = vld [vmem:[%s4110_s5 + $0x448] sm:$0xff]  ;;  %v412_v15 = vld [vmem:[%s4110_s5 + $0x478] sm:$0xff] }
  0xa5   : > { %3164 = vmatpush1.bf16.msra.mxu1 %v3163_v9  ;;  %2654 = vmatprep.subr.bf16.mxu0 %v2653_v10  ;;  %v399_v9 = vld [vmem:[%s4110_s5 + $0x410] sm:$0xff]  ;;  %v3185_v10 = vpack.c.bf16 %v404_v3, %v400_v2  ;;  %v410_v13 = vld [vmem:[%s4110_s5 + $0x468] sm:$0xff]  ;;  %v249_v16 = vld [vmem:[%s4223_s12] sm:$0xff]  ;;  %v2675_v17 = vpack.c.bf16 %v401_v8, %v397_v7 }
  0xa6   : > { %3166 = vmatprep.subr.bf16.mxu1 %v3165_v14  ;;  %v408_v14 = vld [vmem:[%s4110_s5 + $0x458] sm:$0xff]  ;;  %v3187_v18 = vpack.c.bf16 %v403_v11, %v399_v9  ;;  %v2677_v19 = vpack.c.bf16 %v410_v13, %v406_v12  ;;  %v411_v24 = vld [vmem:[%s4110_s5 + $0x470] sm:$0xff]  ;;  %v414_v25 = vld [vmem:[%s4110_s5 + $0x488] sm:$0xff] }
  0xa7   : > { %v3189_v23 = vpack.c.bf16 %v412_v15, %v408_v14  ;;  %v416_v27 = vld [vmem:[%s4110_s5 + $0x498] sm:$0xff]  ;;  %v419_v36 = vld [vmem:[%s4110_s5 + $0x4b0] sm:$0xff]  ;;  %v422_v37 = vld [vmem:[%s4110_s5 + $0x4c8] sm:$0xff] }
  0xa8   : > { %2656 = vmatpush1.bf16.msra.mxu0 %v2655_v20  ;;  %v405_v20 = vld [vmem:[%s4110_s5 + $0x440] sm:$0xff]  ;;  %v420_v28 = vld [vmem:[%s4110_s5 + $0x4b8] sm:$0xff]  ;;  %v427_v48 = vld [vmem:[%s4110_s5 + $0x4f0] sm:$0xff] }
  0xa9   : > { %3168 = vmatpush1.bf16.msra.mxu1 %v3167_v21  ;;  %2658 = vmatprep.subr.bf16.mxu0 %v2657_v22  ;;  %v409_v21 = vld [vmem:[%s4110_s5 + $0x460] sm:$0xff]  ;;  %v407_v22 = vld [vmem:[%s4110_s5 + $0x450] sm:$0xff]  ;;  %v3193_v35 = vpack.c.bf16 %v420_v28, %v416_v27  ;;  %v424_v39 = vld [vmem:[%s4110_s5 + $0x4d8] sm:$0xff] }
  0xaa   : > { %3170 = vmatprep.subr.bf16.mxu1 %v3169_v26  ;;  %v418_v26 = vld [vmem:[%s4110_s5 + $0x4a8] sm:$0xff]  ;;  %v2679_v29 = vpack.c.bf16 %v409_v21, %v405_v20  ;;  %v3191_v30 = vpack.c.bf16 %v411_v24, %v407_v22  ;;  %v428_v40 = vld [vmem:[%s4110_s5 + $0x4f8] sm:$0xff]  ;;  %v435_v60 = vld [vmem:[%s4110_s5 + $0x530] sm:$0xff] }
  0xab   : > { %v2681_v31 = vpack.c.bf16 %v418_v26, %v414_v25  ;;  %v3197_v47 = vpack.c.bf16 %v428_v40, %v424_v39  ;;  %v430_v49 = vld [vmem:[%s4110_s5 + $0x508] sm:$0xff]  ;;  %v432_v51 = vld [vmem:[%s4110_s5 + $0x518] sm:$0xff]  ;;  %v443_v8 = vld [vmem:[%s4110_s5 + $0x570] sm:$0xff] }
  0xac   : > { %2660 = vmatpush1.bf16.msra.mxu0 %v2659_v32  ;;  %v413_v32 = vld [vmem:[%s4110_s5 + $0x480] sm:$0xff]  ;;  %v436_v52 = vld [vmem:[%s4110_s5 + $0x538] sm:$0xff]  ;;  %v438_v61 = vld [vmem:[%s4110_s5 + $0x548] sm:$0xff] }
  0xad   : > { %3172 = vmatpush1.bf16.msra.mxu1 %v3171_v33  ;;  %2662 = vmatprep.subr.bf16.mxu0 %v2661_v34  ;;  %v417_v33 = vld [vmem:[%s4110_s5 + $0x4a0] sm:$0xff]  ;;  %v415_v34 = vld [vmem:[%s4110_s5 + $0x490] sm:$0xff]  ;;  %v3201_v59 = vpack.c.bf16 %v436_v52, %v432_v51  ;;  %v440_v63 = vld [vmem:[%s4110_s5 + $0x558] sm:$0xff] }
  0xae   : > { %3174 = vmatprep.subr.bf16.mxu1 %v3173_v38  ;;  %v426_v38 = vld [vmem:[%s4110_s5 + $0x4e8] sm:$0xff]  ;;  %v2683_v41 = vpack.c.bf16 %v417_v33, %v413_v32  ;;  %v3195_v42 = vpack.c.bf16 %v419_v36, %v415_v34  ;;  %v444_v0 = vld [vmem:[%s4110_s5 + $0x578] sm:$0xff]  ;;  %v445_v14 = vld [vmem:[%s4110_s5 + $0x580] sm:$0xff] }
  0xaf   : > { %v2685_v43 = vpack.c.bf16 %v426_v38, %v422_v37  ;;  %v3205_v7 = vpack.c.bf16 %v444_v0, %v440_v63  ;;  %v446_v9 = vld [vmem:[%s4110_s5 + $0x588] sm:$0xff]  ;;  %v448_v11 = vld [vmem:[%s4110_s5 + $0x598] sm:$0xff]  ;;  %v459_v33 = vld [vmem:[%s4110_s5 + $0x5f0] sm:$0xff] }
  0xb0   : > { %2664 = vmatpush1.bf16.msra.mxu0 %v2663_v44  ;;  %v421_v44 = vld [vmem:[%s4110_s5 + $0x4c0] sm:$0xff]  ;;  %v452_v12 = vld [vmem:[%s4110_s5 + $0x5b8] sm:$0xff]  ;;  %v454_v21 = vld [vmem:[%s4110_s5 + $0x5c8] sm:$0xff] }
  0xb1   : > { %3176 = vmatpush1.bf16.msra.mxu1 %v3175_v45  ;;  %2666 = vmatprep.subr.bf16.mxu0 %v2665_v46  ;;  %v425_v45 = vld [vmem:[%s4110_s5 + $0x4e0] sm:$0xff]  ;;  %v423_v46 = vld [vmem:[%s4110_s5 + $0x4d0] sm:$0xff]  ;;  %v3209_v20 = vpack.c.bf16 %v452_v12, %v448_v11  ;;  %v458_v22 = vld [vmem:[%s4110_s5 + $0x5e8] sm:$0xff] }
  0xb2   : > { %3178 = vmatprep.subr.bf16.mxu1 %v3177_v50  ;;  %v434_v50 = vld [vmem:[%s4110_s5 + $0x528] sm:$0xff]  ;;  %v2687_v53 = vpack.c.bf16 %v425_v45, %v421_v44  ;;  %v3199_v54 = vpack.c.bf16 %v427_v48, %v423_v46  ;;  %v456_v24 = vld [vmem:[%s4110_s5 + $0x5d8] sm:$0xff]  ;;  %v2701_v28 = vpack.c.bf16 %v458_v22, %v454_v21  ;;  %v467_v45 = vld [vmem:[%s4110_s5 + $0x630] sm:$0xff] }
  0xb3   : > { %v2689_v55 = vpack.c.bf16 %v434_v50, %v430_v49  ;;  %v460_v25 = vld [vmem:[%s4110_s5 + $0x5f8] sm:$0xff]  ;;  %v462_v34 = vld [vmem:[%s4110_s5 + $0x608] sm:$0xff] }
  0xb4   : > { %2668 = vmatpush1.bf16.msra.mxu0 %v2667_v56  ;;  %v429_v56 = vld [vmem:[%s4110_s5 + $0x500] sm:$0xff]  ;;  %v3213_v32 = vpack.c.bf16 %v460_v25, %v456_v24  ;;  %v464_v36 = vld [vmem:[%s4110_s5 + $0x618] sm:$0xff]  ;;  %v470_v46 = vld [vmem:[%s4110_s5 + $0x648] sm:$0xff] }
  0xb5   : > { %3180 = vmatpush1.bf16.msra.mxu1 %v3179_v57  ;;  %2670 = vmatprep.subr.bf16.mxu0 %v2669_v58  ;;  %v433_v57 = vld [vmem:[%s4110_s5 + $0x520] sm:$0xff]  ;;  %v431_v58 = vld [vmem:[%s4110_s5 + $0x510] sm:$0xff]  ;;  %v468_v37 = vld [vmem:[%s4110_s5 + $0x638] sm:$0xff] }
  0xb6   : > { %3182 = vmatprep.subr.bf16.mxu1 %v3181_v62  ;;  %v442_v62 = vld [vmem:[%s4110_s5 + $0x568] sm:$0xff]  ;;  %v2691_v1 = vpack.c.bf16 %v433_v57, %v429_v56  ;;  %v3203_v2 = vpack.c.bf16 %v435_v60, %v431_v58  ;;  %v3217_v44 = vpack.c.bf16 %v468_v37, %v464_v36  ;;  %v472_v48 = vld [vmem:[%s4110_s5 + $0x658] sm:$0xff]  ;;  %v475_v57 = vld [vmem:[%s4110_s5 + $0x670] sm:$0xff] }
  0xb7   : > { %v2693_v3 = vpack.c.bf16 %v442_v62, %v438_v61  ;;  %v476_v49 = vld [vmem:[%s4110_s5 + $0x678] sm:$0xff]  ;;  %v478_v58 = vld [vmem:[%s4110_s5 + $0x688] sm:$0xff]  ;;  %v493_v25 = vld [vmem:[%s4110_s5 + $0x700] sm:$0xff] }
  0xb8   : > { %2672 = vmatpush1.bf16.msra.mxu0 %v2671_v4  ;;  %v437_v4 = vld [vmem:[%s4110_s5 + $0x540] sm:$0xff]  ;;  %v3221_v56 = vpack.c.bf16 %v476_v49, %v472_v48  ;;  %v480_v60 = vld [vmem:[%s4110_s5 + $0x698] sm:$0xff] }
  0xb9   : > { %3184 = vmatpush1.bf16.msra.mxu1 %v3183_v5  ;;  %2674 = vmatprep.subr.bf16.mxu0 %v2673_v6  ;;  %v441_v5 = vld [vmem:[%s4110_s5 + $0x560] sm:$0xff]  ;;  %v439_v6 = vld [vmem:[%s4110_s5 + $0x550] sm:$0xff]  ;;  %v484_v61 = vld [vmem:[%s4110_s5 + $0x6b8] sm:$0xff] }
  0xba   : > { %3186 = vmatprep.subr.bf16.mxu1 %v3185_v10  ;;  %v450_v10 = vld [vmem:[%s4110_s5 + $0x5a8] sm:$0xff]  ;;  %v2695_v13 = vpack.c.bf16 %v441_v5, %v437_v4  ;;  %v3207_v15 = vpack.c.bf16 %v443_v8, %v439_v6  ;;  %v3225_v4 = vpack.c.bf16 %v484_v61, %v480_v60  ;;  %v483_v5 = vld [vmem:[%s4110_s5 + $0x6b0] sm:$0xff]  ;;  %v488_v8 = vld [vmem:[%s4110_s5 + $0x6d8] sm:$0xff] }
  0xbb   : > { %1358 = vmatmul.mubr.f32.vlgmr.msra.gmra.mrb[0].mxu0 %v249_v16  ;;  %v486_v6 = vld [vmem:[%s4110_s5 + $0x6c8] sm:$0xff]  ;;  %v500_v21 = vld [vmem:[%s4110_s5 + $0x738] sm:$0xff]  ;;  %v501_v37 = vld [vmem:[%s4110_s5 + $0x740] sm:$0xff] }
  0xbc   : > { %2676 = vmatpush1.bf16.msra.mxu0 %v2675_v17  ;;  %1926 = vmatmul.mubr.f32.vlgmr.msra.gmra.mrb[0].mxu1 %v249_v16  ;;  %v2697_v16 = vpack.c.bf16 %v450_v10, %v446_v9  ;;  %v449_v17 = vld [vmem:[%s4110_s5 + $0x5a0] sm:$0xff]  ;;  %v492_v9 = vld [vmem:[%s4110_s5 + $0x6f8] sm:$0xff] }
  0xbd   : > { %3188 = vmatpush1.bf16.msra.mxu1 %v3187_v18  ;;  %2678 = vmatprep.subr.bf16.mxu0 %v2677_v19  ;;  %v447_v18 = vld [vmem:[%s4110_s5 + $0x590] sm:$0xff]  ;;  %v2699_v26 = vpack.c.bf16 %v449_v17, %v445_v14  ;;  %v489_v14 = vld [vmem:[%s4110_s5 + $0x6e0] sm:$0xff] }
  0xbe   : > { %3190 = vmatprep.subr.bf16.mxu1 %v3189_v23  ;;  %v451_v19 = vld [vmem:[%s4110_s5 + $0x5b0] sm:$0xff]  ;;  %v252_v23 = vld [vmem:[%s4223_s12 + $0x18] sm:$0xff]  ;;  %v509_v49 = vld [vmem:[%s4110_s5 + $0x780] sm:$0xff] }
  0xbf   : > { %1428 = vmatprep.mubr.f32.mxu0 %v252_v23  ;;  %1996 = vmatprep.mubr.f32.mxu1 %v252_v23  ;;  %v3211_v27 = vpack.c.bf16 %v451_v19, %v447_v18  ;;  %v491_v17 = vld [vmem:[%s4110_s5 + $0x6f0] sm:$0xff]  ;;  %v494_v18 = vld [vmem:[%s4110_s5 + $0x708] sm:$0xff]  ;;  %v517_v61 = vld [vmem:[%s4110_s5 + $0x7c0] sm:$0xff] }
  0xc0   : > { %2680 = vmatpush1.bf16.msra.mxu0 %v2679_v29  ;;  %v453_v29 = vld [vmem:[%s4110_s5 + $0x5c0] sm:$0xff]  ;;  %v498_v19 = vld [vmem:[%s4110_s5 + $0x728] sm:$0xff] }
  0xc1   : > { %3192 = vmatpush1.bf16.msra.mxu1 %v3191_v30  ;;  %2682 = vmatprep.subr.bf16.mxu0 %v2681_v31  ;;  %v457_v30 = vld [vmem:[%s4110_s5 + $0x5e0] sm:$0xff]  ;;  %v455_v31 = vld [vmem:[%s4110_s5 + $0x5d0] sm:$0xff]  ;;  %v2721_v24 = vpack.c.bf16 %v498_v19, %v494_v18 }
  0xc2   : > { %3194 = vmatprep.subr.bf16.mxu1 %v3193_v35  ;;  %v466_v35 = vld [vmem:[%s4110_s5 + $0x628] sm:$0xff]  ;;  %v2703_v38 = vpack.c.bf16 %v457_v30, %v453_v29  ;;  %v3215_v39 = vpack.c.bf16 %v459_v33, %v455_v31  ;;  %v499_v29 = vld [vmem:[%s4110_s5 + $0x730] sm:$0xff]  ;;  %v508_v33 = vld [vmem:[%s4110_s5 + $0x778] sm:$0xff] }
  0xc3   : > { %v2705_v40 = vpack.c.bf16 %v466_v35, %v462_v34  ;;  %v502_v30 = vld [vmem:[%s4110_s5 + $0x748] sm:$0xff]  ;;  %v251_v18 = vld [vmem:[%s4223_s12 + $0x10] sm:$0xff] }
  0xc4   : > { %2684 = vmatpush1.bf16.msra.mxu0 %v2683_v41  ;;  %v461_v41 = vld [vmem:[%s4110_s5 + $0x600] sm:$0xff]  ;;  %v506_v31 = vld [vmem:[%s4110_s5 + $0x768] sm:$0xff] }
  0xc5   : > { %3196 = vmatpush1.bf16.msra.mxu1 %v3195_v42  ;;  %2686 = vmatprep.subr.bf16.mxu0 %v2685_v43  ;;  %v465_v42 = vld [vmem:[%s4110_s5 + $0x620] sm:$0xff]  ;;  %v463_v43 = vld [vmem:[%s4110_s5 + $0x610] sm:$0xff]  ;;  %v2725_v36 = vpack.c.bf16 %v506_v31, %v502_v30  ;;  %v548_v30 = vld [vmem:[%s4110_s5 + $0x8b8] sm:$0xff] }
  0xc6   : > { %3198 = vmatprep.subr.bf16.mxu1 %v3197_v47  ;;  %v474_v47 = vld [vmem:[%s4110_s5 + $0x668] sm:$0xff]  ;;  %v2707_v50 = vpack.c.bf16 %v465_v42, %v461_v41  ;;  %v3219_v51 = vpack.c.bf16 %v467_v45, %v463_v43  ;;  %v507_v41 = vld [vmem:[%s4110_s5 + $0x770] sm:$0xff]  ;;  %v516_v45 = vld [vmem:[%s4110_s5 + $0x7b8] sm:$0xff] }
  0xc7   : > { %v2709_v52 = vpack.c.bf16 %v474_v47, %v470_v46  ;;  %v510_v42 = vld [vmem:[%s4110_s5 + $0x788] sm:$0xff] }
  0xc8   : > { %2688 = vmatpush1.bf16.msra.mxu0 %v2687_v53  ;;  %v469_v53 = vld [vmem:[%s4110_s5 + $0x640] sm:$0xff]  ;;  %v514_v43 = vld [vmem:[%s4110_s5 + $0x7a8] sm:$0xff] }
  0xc9   : > { %3200 = vmatpush1.bf16.msra.mxu1 %v3199_v54  ;;  %2690 = vmatprep.subr.bf16.mxu0 %v2689_v55  ;;  %v473_v54 = vld [vmem:[%s4110_s5 + $0x660] sm:$0xff]  ;;  %v471_v55 = vld [vmem:[%s4110_s5 + $0x650] sm:$0xff]  ;;  %v2729_v48 = vpack.c.bf16 %v514_v43, %v510_v42  ;;  %v254_v31 = vld [vmem:[%s4223_s12 + $0x28] sm:$0xff] }
  0xca   : > { %3202 = vmatprep.subr.bf16.mxu1 %v3201_v59  ;;  %v482_v59 = vld [vmem:[%s4110_s5 + $0x6a8] sm:$0xff]  ;;  %v2711_v62 = vpack.c.bf16 %v473_v54, %v469_v53  ;;  %v3223_v63 = vpack.c.bf16 %v475_v57, %v471_v55  ;;  %v515_v53 = vld [vmem:[%s4110_s5 + $0x7b0] sm:$0xff]  ;;  %v524_v57 = vld [vmem:[%s4110_s5 + $0x7f8] sm:$0xff] }
  0xcb   : > { %v2713_v0 = vpack.c.bf16 %v482_v59, %v478_v58  ;;  %v518_v54 = vld [vmem:[%s4110_s5 + $0x7c8] sm:$0xff]  ;;  %v552_v42 = vld [vmem:[%s4110_s5 + $0x8d8] sm:$0xff] }
  0xcc   : > { %2692 = vmatpush1.bf16.msra.mxu0 %v2691_v1  ;;  %v477_v1 = vld [vmem:[%s4110_s5 + $0x680] sm:$0xff]  ;;  %v522_v55 = vld [vmem:[%s4110_s5 + $0x7e8] sm:$0xff]  ;;  %v556_v43 = vld [vmem:[%s4110_s5 + $0x8f8] sm:$0xff] }
  0xcd   : > { %3204 = vmatpush1.bf16.msra.mxu1 %v3203_v2  ;;  %2694 = vmatprep.subr.bf16.mxu0 %v2693_v3  ;;  %v481_v2 = vld [vmem:[%s4110_s5 + $0x6a0] sm:$0xff]  ;;  %v479_v3 = vld [vmem:[%s4110_s5 + $0x690] sm:$0xff]  ;;  %v2733_v60 = vpack.c.bf16 %v522_v55, %v518_v54  ;;  %v560_v54 = vld [vmem:[%s4110_s5 + $0x918] sm:$0xff] }
  0xce   : > { %3206 = vmatprep.subr.bf16.mxu1 %v3205_v7  ;;  %v490_v7 = vld [vmem:[%s4110_s5 + $0x6e8] sm:$0xff]  ;;  %v2715_v10 = vpack.c.bf16 %v481_v2, %v477_v1  ;;  %v3227_v11 = vpack.c.bf16 %v483_v5, %v479_v3  ;;  %v523_v1 = vld [vmem:[%s4110_s5 + $0x7f0] sm:$0xff]  ;;  %v532_v5 = vld [vmem:[%s4110_s5 + $0x838] sm:$0xff] }
  0xcf   : > { %v2717_v12 = vpack.c.bf16 %v490_v7, %v486_v6  ;;  %v526_v2 = vld [vmem:[%s4110_s5 + $0x808] sm:$0xff]  ;;  %v564_v55 = vld [vmem:[%s4110_s5 + $0x938] sm:$0xff] }
  0xd0   : > { %2696 = vmatpush1.bf16.msra.mxu0 %v2695_v13  ;;  %v485_v13 = vld [vmem:[%s4110_s5 + $0x6c0] sm:$0xff]  ;;  %v530_v3 = vld [vmem:[%s4110_s5 + $0x828] sm:$0xff] }
  0xd1   : > { %3208 = vmatpush1.bf16.msra.mxu1 %v3207_v15  ;;  %2698 = vmatprep.subr.bf16.mxu0 %v2697_v16  ;;  %v487_v15 = vld [vmem:[%s4110_s5 + $0x6d0] sm:$0xff]  ;;  %v3229_v16 = vpack.c.bf16 %v492_v9, %v488_v8  ;;  %v2719_v22 = vpack.c.bf16 %v489_v14, %v485_v13  ;;  %v2737_v8 = vpack.c.bf16 %v530_v3, %v526_v2  ;;  %v525_v9 = vld [vmem:[%s4110_s5 + $0x800] sm:$0xff]  ;;  %v534_v14 = vld [vmem:[%s4110_s5 + $0x848] sm:$0xff] }
  0xd2   : > { %3210 = vmatprep.subr.bf16.mxu1 %v3209_v20  ;;  %v496_v20 = vld [vmem:[%s4110_s5 + $0x718] sm:$0xff]  ;;  %v3231_v23 = vpack.c.bf16 %v491_v17, %v487_v15  ;;  %v531_v13 = vld [vmem:[%s4110_s5 + $0x830] sm:$0xff]  ;;  %v538_v15 = vld [vmem:[%s4110_s5 + $0x868] sm:$0xff] }
  0xd3   : > { %v540_v17 = vld [vmem:[%s4110_s5 + $0x878] sm:$0xff] }
  0xd4   : > { %2700 = vmatpush1.bf16.msra.mxu0 %v2699_v26  ;;  %v497_v26 = vld [vmem:[%s4110_s5 + $0x720] sm:$0xff]  ;;  %v568_v2 = vld [vmem:[%s4110_s5 + $0x958] sm:$0xff] }
  0xd5   : > { %3212 = vmatpush1.bf16.msra.mxu1 %v3211_v27  ;;  %2702 = vmatprep.subr.bf16.mxu0 %v2701_v28  ;;  %v495_v27 = vld [vmem:[%s4110_s5 + $0x710] sm:$0xff]  ;;  %v3233_v28 = vpack.c.bf16 %v500_v21, %v496_v20  ;;  %v2723_v34 = vpack.c.bf16 %v497_v26, %v493_v25  ;;  %v2741_v21 = vpack.c.bf16 %v538_v15, %v534_v14  ;;  %v572_v3 = vld [vmem:[%s4110_s5 + $0x978] sm:$0xff] }
  0xd6   : > { %3214 = vmatprep.subr.bf16.mxu1 %v3213_v32  ;;  %v504_v32 = vld [vmem:[%s4110_s5 + $0x758] sm:$0xff]  ;;  %v3235_v35 = vpack.c.bf16 %v499_v29, %v495_v27  ;;  %v539_v26 = vld [vmem:[%s4110_s5 + $0x870] sm:$0xff]  ;;  %v542_v27 = vld [vmem:[%s4110_s5 + $0x888] sm:$0xff] }
  0xd7   : > { %v544_v29 = vld [vmem:[%s4110_s5 + $0x898] sm:$0xff] }
  0xd8   : > { %2704 = vmatpush1.bf16.msra.mxu0 %v2703_v38  ;;  %v505_v38 = vld [vmem:[%s4110_s5 + $0x760] sm:$0xff]  ;;  %v576_v14 = vld [vmem:[%s4110_s5 + $0x998] sm:$0xff] }
  0xd9   : > { %3216 = vmatpush1.bf16.msra.mxu1 %v3215_v39  ;;  %2706 = vmatprep.subr.bf16.mxu0 %v2705_v40  ;;  %v503_v39 = vld [vmem:[%s4110_s5 + $0x750] sm:$0xff]  ;;  %v3237_v40 = vpack.c.bf16 %v508_v33, %v504_v32  ;;  %v2727_v46 = vpack.c.bf16 %v505_v38, %v501_v37  ;;  %v3257_v38 = vpack.c.bf16 %v548_v30, %v544_v29  ;;  %v580_v15 = vld [vmem:[%s4110_s5 + $0x9b8] sm:$0xff] }
  0xda   : > { %3218 = vmatprep.subr.bf16.mxu1 %v3217_v44  ;;  %v512_v44 = vld [vmem:[%s4110_s5 + $0x798] sm:$0xff]  ;;  %v3239_v47 = vpack.c.bf16 %v507_v41, %v503_v39  ;;  %v543_v37 = vld [vmem:[%s4110_s5 + $0x890] sm:$0xff]  ;;  %v554_v41 = vld [vmem:[%s4110_s5 + $0x8e8] sm:$0xff] }
  0xdb   : > { %v547_v39 = vld [vmem:[%s4110_s5 + $0x8b0] sm:$0xff] }
  0xdc   : > { %2708 = vmatpush1.bf16.msra.mxu0 %v2707_v50  ;;  %v513_v50 = vld [vmem:[%s4110_s5 + $0x7a0] sm:$0xff] }
  0xdd   : > { %3220 = vmatpush1.bf16.msra.mxu1 %v3219_v51  ;;  %2710 = vmatprep.subr.bf16.mxu0 %v2709_v52  ;;  %v511_v51 = vld [vmem:[%s4110_s5 + $0x790] sm:$0xff]  ;;  %v3241_v52 = vpack.c.bf16 %v516_v45, %v512_v44  ;;  %v2731_v58 = vpack.c.bf16 %v513_v50, %v509_v49  ;;  %v3259_v45 = vpack.c.bf16 %v547_v39, %v543_v37  ;;  %v594_v37 = vld [vmem:[%s4110_s5 + $0xa28] sm:$0xff]  ;;  %v596_v39 = vld [vmem:[%s4110_s5 + $0xa38] sm:$0xff] }
  0xde   : > { %3222 = vmatprep.subr.bf16.mxu1 %v3221_v56  ;;  %v520_v56 = vld [vmem:[%s4110_s5 + $0x7d8] sm:$0xff]  ;;  %v3243_v59 = vpack.c.bf16 %v515_v53, %v511_v51  ;;  %v551_v49 = vld [vmem:[%s4110_s5 + $0x8d0] sm:$0xff]  ;;  %v3261_v50 = vpack.c.bf16 %v556_v43, %v552_v42  ;;  %v562_v53 = vld [vmem:[%s4110_s5 + $0x928] sm:$0xff] }
  0xdf   : > { %v555_v51 = vld [vmem:[%s4110_s5 + $0x8f0] sm:$0xff]  ;;  %v589_v43 = vld [vmem:[%s4110_s5 + $0xa00] sm:$0xff] }
  0xe0   : > { %2712 = vmatpush1.bf16.msra.mxu0 %v2711_v62  ;;  %v521_v62 = vld [vmem:[%s4110_s5 + $0x7e0] sm:$0xff] }
  0xe1   : > { %3224 = vmatpush1.bf16.msra.mxu1 %v3223_v63  ;;  %2714 = vmatprep.subr.bf16.mxu0 %v2713_v0  ;;  %v519_v63 = vld [vmem:[%s4110_s5 + $0x7d0] sm:$0xff]  ;;  %v3245_v0 = vpack.c.bf16 %v524_v57, %v520_v56  ;;  %v2735_v6 = vpack.c.bf16 %v521_v62, %v517_v61  ;;  %v3263_v57 = vpack.c.bf16 %v555_v51, %v551_v49  ;;  %v602_v49 = vld [vmem:[%s4110_s5 + $0xa68] sm:$0xff]  ;;  %v604_v51 = vld [vmem:[%s4110_s5 + $0xa78] sm:$0xff] }
  0xe2   : > { %3226 = vmatprep.subr.bf16.mxu1 %v3225_v4  ;;  %v528_v4 = vld [vmem:[%s4110_s5 + $0x818] sm:$0xff]  ;;  %v3247_v7 = vpack.c.bf16 %v523_v1, %v519_v63  ;;  %v559_v61 = vld [vmem:[%s4110_s5 + $0x910] sm:$0xff]  ;;  %v3265_v62 = vpack.c.bf16 %v564_v55, %v560_v54  ;;  %v570_v1 = vld [vmem:[%s4110_s5 + $0x968] sm:$0xff] }
  0xe3   : > { %v563_v63 = vld [vmem:[%s4110_s5 + $0x930] sm:$0xff]  ;;  %v597_v55 = vld [vmem:[%s4110_s5 + $0xa40] sm:$0xff] }
  0xe4   : > { %2716 = vmatpush1.bf16.msra.mxu0 %v2715_v10  ;;  %v529_v10 = vld [vmem:[%s4110_s5 + $0x820] sm:$0xff] }
  0xe5   : > { %3228 = vmatpush1.bf16.msra.mxu1 %v3227_v11  ;;  %2718 = vmatprep.subr.bf16.mxu0 %v2717_v12  ;;  %v527_v11 = vld [vmem:[%s4110_s5 + $0x810] sm:$0xff]  ;;  %v3249_v12 = vpack.c.bf16 %v532_v5, %v528_v4  ;;  %v2739_v19 = vpack.c.bf16 %v529_v10, %v525_v9  ;;  %v3267_v5 = vpack.c.bf16 %v563_v63, %v559_v61  ;;  %v610_v61 = vld [vmem:[%s4110_s5 + $0xaa8] sm:$0xff]  ;;  %v612_v63 = vld [vmem:[%s4110_s5 + $0xab8] sm:$0xff] }
  0xe6   : > { %3230 = vmatprep.subr.bf16.mxu1 %v3229_v16  ;;  %v536_v16 = vld [vmem:[%s4110_s5 + $0x858] sm:$0xff]  ;;  %v3251_v20 = vpack.c.bf16 %v531_v13, %v527_v11  ;;  %v567_v9 = vld [vmem:[%s4110_s5 + $0x950] sm:$0xff]  ;;  %v3269_v10 = vpack.c.bf16 %v572_v3, %v568_v2  ;;  %v578_v13 = vld [vmem:[%s4110_s5 + $0x9a8] sm:$0xff] }
  0xe7   : > { %v3253_v25 = vpack.c.bf16 %v540_v17, %v536_v16  ;;  %v571_v11 = vld [vmem:[%s4110_s5 + $0x970] sm:$0xff]  ;;  %v605_v3 = vld [vmem:[%s4110_s5 + $0xa80] sm:$0xff] }
  0xe8   : > { %2720 = vmatpush1.bf16.msra.mxu0 %v2719_v22  ;;  %v533_v22 = vld [vmem:[%s4110_s5 + $0x840] sm:$0xff]  ;;  %v3271_v17 = vpack.c.bf16 %v571_v11, %v567_v9  ;;  %v618_v9 = vld [vmem:[%s4110_s5 + $0xae8] sm:$0xff]  ;;  %v620_v11 = vld [vmem:[%s4110_s5 + $0xaf8] sm:$0xff] }
  0xe9   : > { %3232 = vmatpush1.bf16.msra.mxu1 %v3231_v23  ;;  %2722 = vmatprep.subr.bf16.mxu0 %v2721_v24  ;;  %v537_v23 = vld [vmem:[%s4110_s5 + $0x860] sm:$0xff]  ;;  %v535_v24 = vld [vmem:[%s4110_s5 + $0x850] sm:$0xff] }
  0xea   : > { %3234 = vmatprep.subr.bf16.mxu1 %v3233_v28  ;;  %v546_v28 = vld [vmem:[%s4110_s5 + $0x8a8] sm:$0xff]  ;;  %v2743_v32 = vpack.c.bf16 %v537_v23, %v533_v22  ;;  %v3255_v33 = vpack.c.bf16 %v539_v26, %v535_v24  ;;  %v3273_v22 = vpack.c.bf16 %v580_v15, %v576_v14  ;;  %v579_v23 = vld [vmem:[%s4110_s5 + $0x9b0] sm:$0xff]  ;;  %v584_v26 = vld [vmem:[%s4110_s5 + $0x9d8] sm:$0xff] }
  0xeb   : > { %v582_v24 = vld [vmem:[%s4110_s5 + $0x9c8] sm:$0xff]  ;;  %v613_v15 = vld [vmem:[%s4110_s5 + $0xac0] sm:$0xff] }
  0xec   : > { %2724 = vmatpush1.bf16.msra.mxu0 %v2723_v34  ;;  %v2745_v34 = vpack.c.bf16 %v546_v28, %v542_v27  ;;  %v588_v27 = vld [vmem:[%s4110_s5 + $0x9f8] sm:$0xff] }
  0xed   : > { %3236 = vmatpush1.bf16.msra.mxu1 %v3235_v35  ;;  %2726 = vmatprep.subr.bf16.mxu0 %v2725_v36  ;;  %v541_v35 = vld [vmem:[%s4110_s5 + $0x880] sm:$0xff] }
  0xee   : > { %3238 = vmatprep.subr.bf16.mxu1 %v3237_v40  ;;  %v545_v36 = vld [vmem:[%s4110_s5 + $0x8a0] sm:$0xff]  ;;  %v550_v40 = vld [vmem:[%s4110_s5 + $0x8c8] sm:$0xff] }
  0xef   : > { %v2747_v44 = vpack.c.bf16 %v545_v36, %v541_v35  ;;  %v587_v35 = vld [vmem:[%s4110_s5 + $0x9f0] sm:$0xff]  ;;  %v590_v36 = vld [vmem:[%s4110_s5 + $0xa08] sm:$0xff] }
  0xf0   : > { %2728 = vmatpush1.bf16.msra.mxu0 %v2727_v46  ;;  %v2749_v46 = vpack.c.bf16 %v554_v41, %v550_v40  ;;  %v2769_v42 = vpack.c.bf16 %v594_v37, %v590_v36 }
  0xf1   : > { %3240 = vmatpush1.bf16.msra.mxu1 %v3239_v47  ;;  %2730 = vmatprep.subr.bf16.mxu0 %v2729_v48  ;;  %v549_v47 = vld [vmem:[%s4110_s5 + $0x8c0] sm:$0xff] }
  0xf2   : > { %3242 = vmatprep.subr.bf16.mxu1 %v3241_v52  ;;  %v553_v48 = vld [vmem:[%s4110_s5 + $0x8e0] sm:$0xff]  ;;  %v558_v52 = vld [vmem:[%s4110_s5 + $0x908] sm:$0xff] }
  0xf3   : > { %v2751_v56 = vpack.c.bf16 %v553_v48, %v549_v47  ;;  %v595_v47 = vld [vmem:[%s4110_s5 + $0xa30] sm:$0xff]  ;;  %v598_v48 = vld [vmem:[%s4110_s5 + $0xa48] sm:$0xff] }
  0xf4   : > { %2732 = vmatpush1.bf16.msra.mxu0 %v2731_v58  ;;  %v2753_v58 = vpack.c.bf16 %v562_v53, %v558_v52  ;;  %v2773_v54 = vpack.c.bf16 %v602_v49, %v598_v48 }
  0xf5   : > { %3244 = vmatpush1.bf16.msra.mxu1 %v3243_v59  ;;  %2734 = vmatprep.subr.bf16.mxu0 %v2733_v60  ;;  %v557_v59 = vld [vmem:[%s4110_s5 + $0x900] sm:$0xff] }
  0xf6   : > { %3246 = vmatprep.subr.bf16.mxu1 %v3245_v0  ;;  %v561_v60 = vld [vmem:[%s4110_s5 + $0x920] sm:$0xff]  ;;  %v566_v0 = vld [vmem:[%s4110_s5 + $0x948] sm:$0xff] }
  0xf7   : > { %v2755_v4 = vpack.c.bf16 %v561_v60, %v557_v59  ;;  %v603_v59 = vld [vmem:[%s4110_s5 + $0xa70] sm:$0xff]  ;;  %v606_v60 = vld [vmem:[%s4110_s5 + $0xa88] sm:$0xff] }
  0xf8   : > { %2736 = vmatpush1.bf16.msra.mxu0 %v2735_v6  ;;  %v2757_v6 = vpack.c.bf16 %v570_v1, %v566_v0  ;;  %v2777_v2 = vpack.c.bf16 %v610_v61, %v606_v60 }
  0xf9   : > { %3248 = vmatpush1.bf16.msra.mxu1 %v3247_v7  ;;  %2738 = vmatprep.subr.bf16.mxu0 %v2737_v8  ;;  %v565_v7 = vld [vmem:[%s4110_s5 + $0x940] sm:$0xff] }
  0xfa   : > { %3250 = vmatprep.subr.bf16.mxu1 %v3249_v12  ;;  %v569_v8 = vld [vmem:[%s4110_s5 + $0x960] sm:$0xff]  ;;  %v574_v12 = vld [vmem:[%s4110_s5 + $0x988] sm:$0xff] }
  0xfb   : > { %1429 = vmatmul.mubr.f32.vlgmr.msra.gmra.mrb[0].mxu0 %v251_v18  ;;  %v2759_v16 = vpack.c.bf16 %v569_v8, %v565_v7  ;;  %v611_v7 = vld [vmem:[%s4110_s5 + $0xab0] sm:$0xff]  ;;  %v614_v8 = vld [vmem:[%s4110_s5 + $0xac8] sm:$0xff] }
  0xfc   : > { %2740 = vmatpush1.bf16.msra.mxu0 %v2739_v19  ;;  %1997 = vmatmul.mubr.f32.vlgmr.msra.gmra.mrb[0].mxu1 %v251_v18  ;;  %v2761_v18 = vpack.c.bf16 %v578_v13, %v574_v12  ;;  %v573_v19 = vld [vmem:[%s4110_s5 + $0x980] sm:$0xff]  ;;  %v2781_v14 = vpack.c.bf16 %v618_v9, %v614_v8 }
  0xfd   : > { %3252 = vmatpush1.bf16.msra.mxu1 %v3251_v20  ;;  %2742 = vmatprep.subr.bf16.mxu0 %v2741_v21  ;;  %v577_v20 = vld [vmem:[%s4110_s5 + $0x9a0] sm:$0xff]  ;;  %v575_v21 = vld [vmem:[%s4110_s5 + $0x990] sm:$0xff] }
  0xfe   : > { %3254 = vmatprep.subr.bf16.mxu1 %v3253_v25  ;;  %1499 = vmatprep.mubr.f32.mxu0 %v254_v31  ;;  %v586_v25 = vld [vmem:[%s4110_s5 + $0x9e8] sm:$0xff]  ;;  %v2763_v28 = vpack.c.bf16 %v577_v20, %v573_v19  ;;  %v3275_v29 = vpack.c.bf16 %v579_v23, %v575_v21  ;;  %v619_v19 = vld [vmem:[%s4110_s5 + $0xaf0] sm:$0xff]  ;;  %v628_v23 = vld [vmem:[%s4110_s5 + $0xb38] sm:$0xff] }
  0xff   : > { %2067 = vmatprep.mubr.f32.mxu1 %v254_v31  ;;  %v2765_v30 = vpack.c.bf16 %v586_v25, %v582_v24  ;;  %v581_v31 = vld [vmem:[%s4110_s5 + $0x9c0] sm:$0xff]  ;;  %v622_v20 = vld [vmem:[%s4110_s5 + $0xb08] sm:$0xff] }
 0x100   : > { %2744 = vmatpush1.bf16.msra.mxu0 %v2743_v32  ;;  %v585_v32 = vld [vmem:[%s4110_s5 + $0x9e0] sm:$0xff]  ;;  %v626_v21 = vld [vmem:[%s4110_s5 + $0xb28] sm:$0xff] }
 0x101   : > { %3256 = vmatpush1.bf16.msra.mxu1 %v3255_v33  ;;  %2746 = vmatprep.subr.bf16.mxu0 %v2745_v34  ;;  %v583_v33 = vld [vmem:[%s4110_s5 + $0x9d0] sm:$0xff]  ;;  %v3277_v34 = vpack.c.bf16 %v588_v27, %v584_v26  ;;  %v2767_v40 = vpack.c.bf16 %v585_v32, %v581_v31  ;;  %v2785_v26 = vpack.c.bf16 %v626_v21, %v622_v20  ;;  %v621_v27 = vld [vmem:[%s4110_s5 + $0xb00] sm:$0xff]  ;;  %v630_v32 = vld [vmem:[%s4110_s5 + $0xb48] sm:$0xff] }
 0x102   : > { %3258 = vmatprep.subr.bf16.mxu1 %v3257_v38  ;;  %v592_v38 = vld [vmem:[%s4110_s5 + $0xa18] sm:$0xff]  ;;  %v3279_v41 = vpack.c.bf16 %v587_v35, %v583_v33  ;;  %v627_v31 = vld [vmem:[%s4110_s5 + $0xb30] sm:$0xff]  ;;  %v634_v33 = vld [vmem:[%s4110_s5 + $0xb68] sm:$0xff] }
 0x103   : > { %v636_v35 = vld [vmem:[%s4110_s5 + $0xb78] sm:$0xff]  ;;  %v253_v20 = vld [vmem:[%s4223_s12 + $0x20] sm:$0xff] }
 0x104   : > { %2748 = vmatpush1.bf16.msra.mxu0 %v2747_v44  ;;  %v593_v44 = vld [vmem:[%s4110_s5 + $0xa20] sm:$0xff] }
 0x105   : > { %3260 = vmatpush1.bf16.msra.mxu1 %v3259_v45  ;;  %2750 = vmatprep.subr.bf16.mxu0 %v2749_v46  ;;  %v591_v45 = vld [vmem:[%s4110_s5 + $0xa10] sm:$0xff]  ;;  %v3281_v46 = vpack.c.bf16 %v596_v39, %v592_v38  ;;  %v2771_v52 = vpack.c.bf16 %v593_v44, %v589_v43  ;;  %v2789_v38 = vpack.c.bf16 %v634_v33, %v630_v32  ;;  %v629_v39 = vld [vmem:[%s4110_s5 + $0xb40] sm:$0xff]  ;;  %v638_v44 = vld [vmem:[%s4110_s5 + $0xb88] sm:$0xff] }
 0x106   : > { %3262 = vmatprep.subr.bf16.mxu1 %v3261_v50  ;;  %v600_v50 = vld [vmem:[%s4110_s5 + $0xa58] sm:$0xff]  ;;  %v3283_v53 = vpack.c.bf16 %v595_v47, %v591_v45  ;;  %v635_v43 = vld [vmem:[%s4110_s5 + $0xb70] sm:$0xff]  ;;  %v642_v45 = vld [vmem:[%s4110_s5 + $0xba8] sm:$0xff] }
 0x107   : > { %v644_v47 = vld [vmem:[%s4110_s5 + $0xbb8] sm:$0xff] }
 0x108   : > { %2752 = vmatpush1.bf16.msra.mxu0 %v2751_v56  ;;  %v601_v56 = vld [vmem:[%s4110_s5 + $0xa60] sm:$0xff]  ;;  %v676_v32 = vld [vmem:[%s4110_s5 + $0xcb8] sm:$0xff] }
 0x109   : > { %3264 = vmatpush1.bf16.msra.mxu1 %v3263_v57  ;;  %2754 = vmatprep.subr.bf16.mxu0 %v2753_v58  ;;  %v599_v57 = vld [vmem:[%s4110_s5 + $0xa50] sm:$0xff]  ;;  %v3285_v58 = vpack.c.bf16 %v604_v51, %v600_v50  ;;  %v2775_v0 = vpack.c.bf16 %v601_v56, %v597_v55  ;;  %v2793_v50 = vpack.c.bf16 %v642_v45, %v638_v44  ;;  %v637_v51 = vld [vmem:[%s4110_s5 + $0xb80] sm:$0xff]  ;;  %v646_v56 = vld [vmem:[%s4110_s5 + $0xbc8] sm:$0xff] }
 0x10a   : > { %3266 = vmatprep.subr.bf16.mxu1 %v3265_v62  ;;  %v608_v62 = vld [vmem:[%s4110_s5 + $0xa98] sm:$0xff]  ;;  %v3287_v1 = vpack.c.bf16 %v603_v59, %v599_v57  ;;  %v643_v55 = vld [vmem:[%s4110_s5 + $0xbb0] sm:$0xff]  ;;  %v650_v57 = vld [vmem:[%s4110_s5 + $0xbe8] sm:$0xff] }
 0x10b   : > { %v652_v59 = vld [vmem:[%s4110_s5 + $0xbf8] sm:$0xff] }
 0x10c   : > { %2756 = vmatpush1.bf16.msra.mxu0 %v2755_v4  ;;  %v609_v4 = vld [vmem:[%s4110_s5 + $0xaa0] sm:$0xff]  ;;  %v256_v33 = vld [vmem:[%s4223_s12 + $0x38] sm:$0xff] }
 0x10d   : > { %3268 = vmatpush1.bf16.msra.mxu1 %v3267_v5  ;;  %2758 = vmatprep.subr.bf16.mxu0 %v2757_v6  ;;  %v607_v5 = vld [vmem:[%s4110_s5 + $0xa90] sm:$0xff]  ;;  %v3289_v6 = vpack.c.bf16 %v612_v63, %v608_v62  ;;  %v2779_v12 = vpack.c.bf16 %v609_v4, %v605_v3  ;;  %v2797_v62 = vpack.c.bf16 %v650_v57, %v646_v56  ;;  %v645_v63 = vld [vmem:[%s4110_s5 + $0xbc0] sm:$0xff]  ;;  %v654_v4 = vld [vmem:[%s4110_s5 + $0xc08] sm:$0xff] }
 0x10e   : > { %3270 = vmatprep.subr.bf16.mxu1 %v3269_v10  ;;  %v616_v10 = vld [vmem:[%s4110_s5 + $0xad8] sm:$0xff]  ;;  %v3291_v13 = vpack.c.bf16 %v611_v7, %v607_v5  ;;  %v651_v3 = vld [vmem:[%s4110_s5 + $0xbf0] sm:$0xff]  ;;  %v658_v5 = vld [vmem:[%s4110_s5 + $0xc28] sm:$0xff] }
 0x10f   : > { %v660_v7 = vld [vmem:[%s4110_s5 + $0xc38] sm:$0xff] }
 0x110   : > { %2760 = vmatpush1.bf16.msra.mxu0 %v2759_v16  ;;  %v617_v16 = vld [vmem:[%s4110_s5 + $0xae0] sm:$0xff]  ;;  %v680_v44 = vld [vmem:[%s4110_s5 + $0xcd8] sm:$0xff] }
 0x111   : > { %3272 = vmatpush1.bf16.msra.mxu1 %v3271_v17  ;;  %2762 = vmatprep.subr.bf16.mxu0 %v2761_v18  ;;  %v615_v17 = vld [vmem:[%s4110_s5 + $0xad0] sm:$0xff]  ;;  %v3293_v18 = vpack.c.bf16 %v620_v11, %v616_v10  ;;  %v2783_v24 = vpack.c.bf16 %v617_v16, %v613_v15  ;;  %v2801_v10 = vpack.c.bf16 %v658_v5, %v654_v4  ;;  %v653_v11 = vld [vmem:[%s4110_s5 + $0xc00] sm:$0xff]  ;;  %v662_v16 = vld [vmem:[%s4110_s5 + $0xc48] sm:$0xff] }
 0x112   : > { %3274 = vmatprep.subr.bf16.mxu1 %v3273_v22  ;;  %v624_v22 = vld [vmem:[%s4110_s5 + $0xb18] sm:$0xff]  ;;  %v3295_v25 = vpack.c.bf16 %v619_v19, %v615_v17  ;;  %v659_v15 = vld [vmem:[%s4110_s5 + $0xc30] sm:$0xff]  ;;  %v666_v17 = vld [vmem:[%s4110_s5 + $0xc68] sm:$0xff] }
 0x113   : > { %v668_v19 = vld [vmem:[%s4110_s5 + $0xc78] sm:$0xff] }
 0x114   : > { %2764 = vmatpush1.bf16.msra.mxu0 %v2763_v28  ;;  %v625_v28 = vld [vmem:[%s4110_s5 + $0xb20] sm:$0xff]  ;;  %v684_v45 = vld [vmem:[%s4110_s5 + $0xcf8] sm:$0xff] }
 0x115   : > { %3276 = vmatpush1.bf16.msra.mxu1 %v3275_v29  ;;  %2766 = vmatprep.subr.bf16.mxu0 %v2765_v30  ;;  %v623_v29 = vld [vmem:[%s4110_s5 + $0xb10] sm:$0xff]  ;;  %v3297_v30 = vpack.c.bf16 %v628_v23, %v624_v22  ;;  %v2787_v36 = vpack.c.bf16 %v625_v28, %v621_v27  ;;  %v2805_v23 = vpack.c.bf16 %v666_v17, %v662_v16  ;;  %v688_v56 = vld [vmem:[%s4110_s5 + $0xd18] sm:$0xff] }
 0x116   : > { %3278 = vmatprep.subr.bf16.mxu1 %v3277_v34  ;;  %v632_v34 = vld [vmem:[%s4110_s5 + $0xb58] sm:$0xff]  ;;  %v3299_v37 = vpack.c.bf16 %v627_v31, %v623_v29  ;;  %v667_v28 = vld [vmem:[%s4110_s5 + $0xc70] sm:$0xff]  ;;  %v670_v29 = vld [vmem:[%s4110_s5 + $0xc88] sm:$0xff] }
 0x117   : > { %v672_v31 = vld [vmem:[%s4110_s5 + $0xc98] sm:$0xff] }
 0x118   : > { %2768 = vmatpush1.bf16.msra.mxu0 %v2767_v40  ;;  %v633_v40 = vld [vmem:[%s4110_s5 + $0xb60] sm:$0xff]  ;;  %v692_v57 = vld [vmem:[%s4110_s5 + $0xd38] sm:$0xff] }
 0x119   : > { %3280 = vmatpush1.bf16.msra.mxu1 %v3279_v41  ;;  %2770 = vmatprep.subr.bf16.mxu0 %v2769_v42  ;;  %v631_v41 = vld [vmem:[%s4110_s5 + $0xb50] sm:$0xff]  ;;  %v3301_v42 = vpack.c.bf16 %v636_v35, %v632_v34  ;;  %v2791_v48 = vpack.c.bf16 %v633_v40, %v629_v39  ;;  %v3321_v40 = vpack.c.bf16 %v676_v32, %v672_v31  ;;  %v696_v4 = vld [vmem:[%s4110_s5 + $0xd58] sm:$0xff] }
 0x11a   : > { %3282 = vmatprep.subr.bf16.mxu1 %v3281_v46  ;;  %v640_v46 = vld [vmem:[%s4110_s5 + $0xb98] sm:$0xff]  ;;  %v3303_v49 = vpack.c.bf16 %v635_v43, %v631_v41  ;;  %v671_v39 = vld [vmem:[%s4110_s5 + $0xc90] sm:$0xff]  ;;  %v682_v43 = vld [vmem:[%s4110_s5 + $0xce8] sm:$0xff] }
 0x11b   : > { %v675_v41 = vld [vmem:[%s4110_s5 + $0xcb0] sm:$0xff]  ;;  %v700_v5 = vld [vmem:[%s4110_s5 + $0xd78] sm:$0xff] }
 0x11c   : > { %2772 = vmatpush1.bf16.msra.mxu0 %v2771_v52  ;;  %v641_v52 = vld [vmem:[%s4110_s5 + $0xba0] sm:$0xff]  ;;  %v704_v16 = vld [vmem:[%s4110_s5 + $0xd98] sm:$0xff] }
 0x11d   : > { %3284 = vmatpush1.bf16.msra.mxu1 %v3283_v53  ;;  %2774 = vmatprep.subr.bf16.mxu0 %v2773_v54  ;;  %v639_v53 = vld [vmem:[%s4110_s5 + $0xb90] sm:$0xff]  ;;  %v3305_v54 = vpack.c.bf16 %v644_v47, %v640_v46  ;;  %v2795_v60 = vpack.c.bf16 %v641_v52, %v637_v51  ;;  %v3323_v47 = vpack.c.bf16 %v675_v41, %v671_v39  ;;  %v708_v17 = vld [vmem:[%s4110_s5 + $0xdb8] sm:$0xff]  ;;  %v722_v39 = vld [vmem:[%s4110_s5 + $0xe28] sm:$0xff] }
 0x11e   : > { %3286 = vmatprep.subr.bf16.mxu1 %v3285_v58  ;;  %v648_v58 = vld [vmem:[%s4110_s5 + $0xbd8] sm:$0xff]  ;;  %v3307_v61 = vpack.c.bf16 %v643_v55, %v639_v53  ;;  %v679_v51 = vld [vmem:[%s4110_s5 + $0xcd0] sm:$0xff]  ;;  %v3325_v52 = vpack.c.bf16 %v684_v45, %v680_v44  ;;  %v690_v55 = vld [vmem:[%s4110_s5 + $0xd28] sm:$0xff] }
 0x11f   : > { %v683_v53 = vld [vmem:[%s4110_s5 + $0xcf0] sm:$0xff]  ;;  %v724_v41 = vld [vmem:[%s4110_s5 + $0xe38] sm:$0xff]  ;;  %v717_v45 = vld [vmem:[%s4110_s5 + $0xe00] sm:$0xff] }
 0x120   : > { %2776 = vmatpush1.bf16.msra.mxu0 %v2775_v0  ;;  %v649_v0 = vld [vmem:[%s4110_s5 + $0xbe0] sm:$0xff] }
 0x121   : > { %3288 = vmatpush1.bf16.msra.mxu1 %v3287_v1  ;;  %2778 = vmatprep.subr.bf16.mxu0 %v2777_v2  ;;  %v647_v1 = vld [vmem:[%s4110_s5 + $0xbd0] sm:$0xff]  ;;  %v3309_v2 = vpack.c.bf16 %v652_v59, %v648_v58  ;;  %v2799_v8 = vpack.c.bf16 %v649_v0, %v645_v63  ;;  %v3327_v59 = vpack.c.bf16 %v683_v53, %v679_v51  ;;  %v730_v51 = vld [vmem:[%s4110_s5 + $0xe68] sm:$0xff]  ;;  %v732_v53 = vld [vmem:[%s4110_s5 + $0xe78] sm:$0xff] }
 0x122   : > { %3290 = vmatprep.subr.bf16.mxu1 %v3289_v6  ;;  %v656_v6 = vld [vmem:[%s4110_s5 + $0xc18] sm:$0xff]  ;;  %v3311_v9 = vpack.c.bf16 %v651_v3, %v647_v1  ;;  %v687_v63 = vld [vmem:[%s4110_s5 + $0xd10] sm:$0xff]  ;;  %v3329_v0 = vpack.c.bf16 %v692_v57, %v688_v56  ;;  %v698_v3 = vld [vmem:[%s4110_s5 + $0xd68] sm:$0xff] }
 0x123   : > { %v691_v1 = vld [vmem:[%s4110_s5 + $0xd30] sm:$0xff]  ;;  %v725_v57 = vld [vmem:[%s4110_s5 + $0xe40] sm:$0xff] }
 0x124   : > { %2780 = vmatpush1.bf16.msra.mxu0 %v2779_v12  ;;  %v657_v12 = vld [vmem:[%s4110_s5 + $0xc20] sm:$0xff] }
 0x125   : > { %3292 = vmatpush1.bf16.msra.mxu1 %v3291_v13  ;;  %2782 = vmatprep.subr.bf16.mxu0 %v2781_v14  ;;  %v655_v13 = vld [vmem:[%s4110_s5 + $0xc10] sm:$0xff]  ;;  %v3313_v14 = vpack.c.bf16 %v660_v7, %v656_v6  ;;  %v2803_v21 = vpack.c.bf16 %v657_v12, %v653_v11  ;;  %v3331_v7 = vpack.c.bf16 %v691_v1, %v687_v63  ;;  %v738_v63 = vld [vmem:[%s4110_s5 + $0xea8] sm:$0xff]  ;;  %v740_v1 = vld [vmem:[%s4110_s5 + $0xeb8] sm:$0xff] }
 0x126   : > { %3294 = vmatprep.subr.bf16.mxu1 %v3293_v18  ;;  %v664_v18 = vld [vmem:[%s4110_s5 + $0xc58] sm:$0xff]  ;;  %v3315_v22 = vpack.c.bf16 %v659_v15, %v655_v13  ;;  %v695_v11 = vld [vmem:[%s4110_s5 + $0xd50] sm:$0xff]  ;;  %v3333_v12 = vpack.c.bf16 %v700_v5, %v696_v4  ;;  %v706_v15 = vld [vmem:[%s4110_s5 + $0xda8] sm:$0xff] }
 0x127   : > { %v3317_v27 = vpack.c.bf16 %v668_v19, %v664_v18  ;;  %v699_v13 = vld [vmem:[%s4110_s5 + $0xd70] sm:$0xff]  ;;  %v733_v5 = vld [vmem:[%s4110_s5 + $0xe80] sm:$0xff] }
 0x128   : > { %2784 = vmatpush1.bf16.msra.mxu0 %v2783_v24  ;;  %v661_v24 = vld [vmem:[%s4110_s5 + $0xc40] sm:$0xff]  ;;  %v3335_v19 = vpack.c.bf16 %v699_v13, %v695_v11  ;;  %v746_v11 = vld [vmem:[%s4110_s5 + $0xee8] sm:$0xff]  ;;  %v748_v13 = vld [vmem:[%s4110_s5 + $0xef8] sm:$0xff] }
 0x129   : > { %3296 = vmatpush1.bf16.msra.mxu1 %v3295_v25  ;;  %2786 = vmatprep.subr.bf16.mxu0 %v2785_v26  ;;  %v665_v25 = vld [vmem:[%s4110_s5 + $0xc60] sm:$0xff]  ;;  %v663_v26 = vld [vmem:[%s4110_s5 + $0xc50] sm:$0xff] }
 0x12a   : > { %3298 = vmatprep.subr.bf16.mxu1 %v3297_v30  ;;  %v674_v30 = vld [vmem:[%s4110_s5 + $0xca8] sm:$0xff]  ;;  %v2807_v34 = vpack.c.bf16 %v665_v25, %v661_v24  ;;  %v3319_v35 = vpack.c.bf16 %v667_v28, %v663_v26  ;;  %v3337_v24 = vpack.c.bf16 %v708_v17, %v704_v16  ;;  %v707_v25 = vld [vmem:[%s4110_s5 + $0xdb0] sm:$0xff]  ;;  %v712_v28 = vld [vmem:[%s4110_s5 + $0xdd8] sm:$0xff] }
 0x12b   : > { %v710_v26 = vld [vmem:[%s4110_s5 + $0xdc8] sm:$0xff]  ;;  %v741_v17 = vld [vmem:[%s4110_s5 + $0xec0] sm:$0xff] }
 0x12c   : > { %2788 = vmatpush1.bf16.msra.mxu0 %v2787_v36  ;;  %v2809_v36 = vpack.c.bf16 %v674_v30, %v670_v29  ;;  %v716_v29 = vld [vmem:[%s4110_s5 + $0xdf8] sm:$0xff] }
 0x12d   : > { %3300 = vmatpush1.bf16.msra.mxu1 %v3299_v37  ;;  %2790 = vmatprep.subr.bf16.mxu0 %v2789_v38  ;;  %v669_v37 = vld [vmem:[%s4110_s5 + $0xc80] sm:$0xff] }
 0x12e   : > { %3302 = vmatprep.subr.bf16.mxu1 %v3301_v42  ;;  %v673_v38 = vld [vmem:[%s4110_s5 + $0xca0] sm:$0xff]  ;;  %v678_v42 = vld [vmem:[%s4110_s5 + $0xcc8] sm:$0xff] }
 0x12f   : > { %v2811_v46 = vpack.c.bf16 %v673_v38, %v669_v37  ;;  %v715_v37 = vld [vmem:[%s4110_s5 + $0xdf0] sm:$0xff]  ;;  %v718_v38 = vld [vmem:[%s4110_s5 + $0xe08] sm:$0xff] }
 0x130   : > { %2792 = vmatpush1.bf16.msra.mxu0 %v2791_v48  ;;  %v2813_v48 = vpack.c.bf16 %v682_v43, %v678_v42  ;;  %v2833_v44 = vpack.c.bf16 %v722_v39, %v718_v38 }
 0x131   : > { %3304 = vmatpush1.bf16.msra.mxu1 %v3303_v49  ;;  %2794 = vmatprep.subr.bf16.mxu0 %v2793_v50  ;;  %v677_v49 = vld [vmem:[%s4110_s5 + $0xcc0] sm:$0xff] }
 0x132   : > { %3306 = vmatprep.subr.bf16.mxu1 %v3305_v54  ;;  %v681_v50 = vld [vmem:[%s4110_s5 + $0xce0] sm:$0xff]  ;;  %v686_v54 = vld [vmem:[%s4110_s5 + $0xd08] sm:$0xff] }
 0x133   : > { %v2815_v58 = vpack.c.bf16 %v681_v50, %v677_v49  ;;  %v723_v49 = vld [vmem:[%s4110_s5 + $0xe30] sm:$0xff]  ;;  %v726_v50 = vld [vmem:[%s4110_s5 + $0xe48] sm:$0xff] }
 0x134   : > { %2796 = vmatpush1.bf16.msra.mxu0 %v2795_v60  ;;  %v2817_v60 = vpack.c.bf16 %v690_v55, %v686_v54  ;;  %v2837_v56 = vpack.c.bf16 %v730_v51, %v726_v50 }
 0x135   : > { %3308 = vmatpush1.bf16.msra.mxu1 %v3307_v61  ;;  %2798 = vmatprep.subr.bf16.mxu0 %v2797_v62  ;;  %v685_v61 = vld [vmem:[%s4110_s5 + $0xd00] sm:$0xff] }
 0x136   : > { %3310 = vmatprep.subr.bf16.mxu1 %v3309_v2  ;;  %v689_v62 = vld [vmem:[%s4110_s5 + $0xd20] sm:$0xff]  ;;  %v694_v2 = vld [vmem:[%s4110_s5 + $0xd48] sm:$0xff] }
 0x137   : > { %v2819_v6 = vpack.c.bf16 %v689_v62, %v685_v61  ;;  %v731_v61 = vld [vmem:[%s4110_s5 + $0xe70] sm:$0xff]  ;;  %v734_v62 = vld [vmem:[%s4110_s5 + $0xe88] sm:$0xff] }
 0x138   : > { %2800 = vmatpush1.bf16.msra.mxu0 %v2799_v8  ;;  %v2821_v8 = vpack.c.bf16 %v698_v3, %v694_v2  ;;  %v2841_v4 = vpack.c.bf16 %v738_v63, %v734_v62 }
 0x139   : > { %3312 = vmatpush1.bf16.msra.mxu1 %v3311_v9  ;;  %2802 = vmatprep.subr.bf16.mxu0 %v2801_v10  ;;  %v693_v9 = vld [vmem:[%s4110_s5 + $0xd40] sm:$0xff] }
 0x13a   : > { %3314 = vmatprep.subr.bf16.mxu1 %v3313_v14  ;;  %v697_v10 = vld [vmem:[%s4110_s5 + $0xd60] sm:$0xff]  ;;  %v702_v14 = vld [vmem:[%s4110_s5 + $0xd88] sm:$0xff] }
 0x13b   : > { %1500 = vmatmul.mubr.f32.vlgmr.msra.gmra.mrb[0].mxu0 %v253_v20  ;;  %v2823_v18 = vpack.c.bf16 %v697_v10, %v693_v9  ;;  %v739_v9 = vld [vmem:[%s4110_s5 + $0xeb0] sm:$0xff]  ;;  %v742_v10 = vld [vmem:[%s4110_s5 + $0xec8] sm:$0xff] }
 0x13c   : > { %2804 = vmatpush1.bf16.msra.mxu0 %v2803_v21  ;;  %2068 = vmatmul.mubr.f32.vlgmr.msra.gmra.mrb[0].mxu1 %v253_v20  ;;  %v2825_v20 = vpack.c.bf16 %v706_v15, %v702_v14  ;;  %v701_v21 = vld [vmem:[%s4110_s5 + $0xd80] sm:$0xff]  ;;  %v2845_v16 = vpack.c.bf16 %v746_v11, %v742_v10 }
 0x13d   : > { %3316 = vmatpush1.bf16.msra.mxu1 %v3315_v22  ;;  %2806 = vmatprep.subr.bf16.mxu0 %v2805_v23  ;;  %v705_v22 = vld [vmem:[%s4110_s5 + $0xda0] sm:$0xff]  ;;  %v703_v23 = vld [vmem:[%s4110_s5 + $0xd90] sm:$0xff] }
 0x13e   : > { %3318 = vmatprep.subr.bf16.mxu1 %v3317_v27  ;;  %1570 = vmatprep.mubr.f32.mxu0 %v256_v33  ;;  %v714_v27 = vld [vmem:[%s4110_s5 + $0xde8] sm:$0xff]  ;;  %v2827_v30 = vpack.c.bf16 %v705_v22, %v701_v21  ;;  %v3339_v31 = vpack.c.bf16 %v707_v25, %v703_v23  ;;  %v747_v21 = vld [vmem:[%s4110_s5 + $0xef0] sm:$0xff]  ;;  %v756_v25 = vld [vmem:[%s4110_s5 + $0xf38] sm:$0xff] }
 0x13f   : > { %2138 = vmatprep.mubr.f32.mxu1 %v256_v33  ;;  %v2829_v32 = vpack.c.bf16 %v714_v27, %v710_v26  ;;  %v709_v33 = vld [vmem:[%s4110_s5 + $0xdc0] sm:$0xff]  ;;  %v750_v22 = vld [vmem:[%s4110_s5 + $0xf08] sm:$0xff] }
 0x140   : > { %2808 = vmatpush1.bf16.msra.mxu0 %v2807_v34  ;;  %v713_v34 = vld [vmem:[%s4110_s5 + $0xde0] sm:$0xff]  ;;  %v754_v23 = vld [vmem:[%s4110_s5 + $0xf28] sm:$0xff] }
 0x141   : > { %3320 = vmatpush1.bf16.msra.mxu1 %v3319_v35  ;;  %2810 = vmatprep.subr.bf16.mxu0 %v2809_v36  ;;  %v711_v35 = vld [vmem:[%s4110_s5 + $0xdd0] sm:$0xff]  ;;  %v3341_v36 = vpack.c.bf16 %v716_v29, %v712_v28  ;;  %v2831_v42 = vpack.c.bf16 %v713_v34, %v709_v33  ;;  %v2849_v28 = vpack.c.bf16 %v754_v23, %v750_v22  ;;  %v749_v29 = vld [vmem:[%s4110_s5 + $0xf00] sm:$0xff]  ;;  %v758_v34 = vld [vmem:[%s4110_s5 + $0xf48] sm:$0xff] }
 0x142   : > { %3322 = vmatprep.subr.bf16.mxu1 %v3321_v40  ;;  %v720_v40 = vld [vmem:[%s4110_s5 + $0xe18] sm:$0xff]  ;;  %v3343_v43 = vpack.c.bf16 %v715_v37, %v711_v35  ;;  %v755_v33 = vld [vmem:[%s4110_s5 + $0xf30] sm:$0xff]  ;;  %v762_v35 = vld [vmem:[%s4110_s5 + $0xf68] sm:$0xff] }
 0x143   : > { %v764_v37 = vld [vmem:[%s4110_s5 + $0xf78] sm:$0xff]  ;;  %v255_v22 = vld [vmem:[%s4223_s12 + $0x30] sm:$0xff] }
 0x144   : > { %2812 = vmatpush1.bf16.msra.mxu0 %v2811_v46  ;;  %v721_v46 = vld [vmem:[%s4110_s5 + $0xe20] sm:$0xff] }
 0x145   : > { %3324 = vmatpush1.bf16.msra.mxu1 %v3323_v47  ;;  %2814 = vmatprep.subr.bf16.mxu0 %v2813_v48  ;;  %v719_v47 = vld [vmem:[%s4110_s5 + $0xe10] sm:$0xff]  ;;  %v3345_v48 = vpack.c.bf16 %v724_v41, %v720_v40  ;;  %v2835_v54 = vpack.c.bf16 %v721_v46, %v717_v45  ;;  %v2853_v40 = vpack.c.bf16 %v762_v35, %v758_v34  ;;  %v757_v41 = vld [vmem:[%s4110_s5 + $0xf40] sm:$0xff]  ;;  %v766_v46 = vld [vmem:[%s4110_s5 + $0xf88] sm:$0xff] }
 0x146   : > { %3326 = vmatprep.subr.bf16.mxu1 %v3325_v52  ;;  %v728_v52 = vld [vmem:[%s4110_s5 + $0xe58] sm:$0xff]  ;;  %v3347_v55 = vpack.c.bf16 %v723_v49, %v719_v47  ;;  %v763_v45 = vld [vmem:[%s4110_s5 + $0xf70] sm:$0xff]  ;;  %v770_v47 = vld [vmem:[%s4110_s5 + $0xfa8] sm:$0xff] }
 0x147   : > { %v772_v49 = vld [vmem:[%s4110_s5 + $0xfb8] sm:$0xff]  ;;  %v258_v35 = vld [vmem:[%s4223_s12 + $0x48] sm:$0xff] }
 0x148   : > { %2816 = vmatpush1.bf16.msra.mxu0 %v2815_v58  ;;  %v729_v58 = vld [vmem:[%s4110_s5 + $0xe60] sm:$0xff]  ;;  %v804_v34 = vld [vmem:[%s4110_s5 + $0x10b8] sm:$0xff] }
 0x149   : > { %3328 = vmatpush1.bf16.msra.mxu1 %v3327_v59  ;;  %2818 = vmatprep.subr.bf16.mxu0 %v2817_v60  ;;  %v727_v59 = vld [vmem:[%s4110_s5 + $0xe50] sm:$0xff]  ;;  %v3349_v60 = vpack.c.bf16 %v732_v53, %v728_v52  ;;  %v2839_v2 = vpack.c.bf16 %v729_v58, %v725_v57  ;;  %v2857_v52 = vpack.c.bf16 %v770_v47, %v766_v46  ;;  %v765_v53 = vld [vmem:[%s4110_s5 + $0xf80] sm:$0xff]  ;;  %v774_v58 = vld [vmem:[%s4110_s5 + $0xfc8] sm:$0xff] }
 0x14a   : > { %3330 = vmatprep.subr.bf16.mxu1 %v3329_v0  ;;  %v736_v0 = vld [vmem:[%s4110_s5 + $0xe98] sm:$0xff]  ;;  %v3351_v3 = vpack.c.bf16 %v731_v61, %v727_v59  ;;  %v771_v57 = vld [vmem:[%s4110_s5 + $0xfb0] sm:$0xff]  ;;  %v778_v59 = vld [vmem:[%s4110_s5 + $0xfe8] sm:$0xff] }
 0x14b   : > { %v780_v61 = vld [vmem:[%s4110_s5 + $0xff8] sm:$0xff] }
 0x14c   : > { %2820 = vmatpush1.bf16.msra.mxu0 %v2819_v6  ;;  %v737_v6 = vld [vmem:[%s4110_s5 + $0xea0] sm:$0xff]  ;;  %v808_v46 = vld [vmem:[%s4110_s5 + $0x10d8] sm:$0xff] }
 0x14d   : > { %3332 = vmatpush1.bf16.msra.mxu1 %v3331_v7  ;;  %2822 = vmatprep.subr.bf16.mxu0 %v2821_v8  ;;  %v735_v7 = vld [vmem:[%s4110_s5 + $0xe90] sm:$0xff]  ;;  %v3353_v8 = vpack.c.bf16 %v740_v1, %v736_v0  ;;  %v2843_v14 = vpack.c.bf16 %v737_v6, %v733_v5  ;;  %v2861_v0 = vpack.c.bf16 %v778_v59, %v774_v58  ;;  %v773_v1 = vld [vmem:[%s4110_s5 + $0xfc0] sm:$0xff]  ;;  %v782_v6 = vld [vmem:[%s4110_s5 + $0x1008] sm:$0xff] }
 0x14e   : > { %3334 = vmatprep.subr.bf16.mxu1 %v3333_v12  ;;  %v744_v12 = vld [vmem:[%s4110_s5 + $0xed8] sm:$0xff]  ;;  %v3355_v15 = vpack.c.bf16 %v739_v9, %v735_v7  ;;  %v779_v5 = vld [vmem:[%s4110_s5 + $0xff0] sm:$0xff]  ;;  %v786_v7 = vld [vmem:[%s4110_s5 + $0x1028] sm:$0xff] }
 0x14f   : > { %v788_v9 = vld [vmem:[%s4110_s5 + $0x1038] sm:$0xff] }
 0x150   : > { %2824 = vmatpush1.bf16.msra.mxu0 %v2823_v18  ;;  %v745_v18 = vld [vmem:[%s4110_s5 + $0xee0] sm:$0xff]  ;;  %v812_v47 = vld [vmem:[%s4110_s5 + $0x10f8] sm:$0xff] }
 0x151   : > { %3336 = vmatpush1.bf16.msra.mxu1 %v3335_v19  ;;  %2826 = vmatprep.subr.bf16.mxu0 %v2825_v20  ;;  %v743_v19 = vld [vmem:[%s4110_s5 + $0xed0] sm:$0xff]  ;;  %v3357_v20 = vpack.c.bf16 %v748_v13, %v744_v12  ;;  %v2847_v26 = vpack.c.bf16 %v745_v18, %v741_v17  ;;  %v2865_v12 = vpack.c.bf16 %v786_v7, %v782_v6  ;;  %v781_v13 = vld [vmem:[%s4110_s5 + $0x1000] sm:$0xff]  ;;  %v790_v18 = vld [vmem:[%s4110_s5 + $0x1048] sm:$0xff] }
 0x152   : > { %3338 = vmatprep.subr.bf16.mxu1 %v3337_v24  ;;  %v752_v24 = vld [vmem:[%s4110_s5 + $0xf18] sm:$0xff]  ;;  %v3359_v27 = vpack.c.bf16 %v747_v21, %v743_v19  ;;  %v787_v17 = vld [vmem:[%s4110_s5 + $0x1030] sm:$0xff]  ;;  %v794_v19 = vld [vmem:[%s4110_s5 + $0x1068] sm:$0xff] }
 0x153   : > { %v796_v21 = vld [vmem:[%s4110_s5 + $0x1078] sm:$0xff] }
 0x154   : > { %2828 = vmatpush1.bf16.msra.mxu0 %v2827_v30  ;;  %v753_v30 = vld [vmem:[%s4110_s5 + $0xf20] sm:$0xff]  ;;  %v816_v58 = vld [vmem:[%s4110_s5 + $0x1118] sm:$0xff] }
 0x155   : > { %3340 = vmatpush1.bf16.msra.mxu1 %v3339_v31  ;;  %2830 = vmatprep.subr.bf16.mxu0 %v2829_v32  ;;  %v751_v31 = vld [vmem:[%s4110_s5 + $0xf10] sm:$0xff]  ;;  %v3361_v32 = vpack.c.bf16 %v756_v25, %v752_v24  ;;  %v2851_v38 = vpack.c.bf16 %v753_v30, %v749_v29  ;;  %v2869_v25 = vpack.c.bf16 %v794_v19, %v790_v18  ;;  %v820_v59 = vld [vmem:[%s4110_s5 + $0x1138] sm:$0xff] }
 0x156   : > { %3342 = vmatprep.subr.bf16.mxu1 %v3341_v36  ;;  %v760_v36 = vld [vmem:[%s4110_s5 + $0xf58] sm:$0xff]  ;;  %v3363_v39 = vpack.c.bf16 %v755_v33, %v751_v31  ;;  %v795_v30 = vld [vmem:[%s4110_s5 + $0x1070] sm:$0xff]  ;;  %v798_v31 = vld [vmem:[%s4110_s5 + $0x1088] sm:$0xff] }
 0x157   : > { %v800_v33 = vld [vmem:[%s4110_s5 + $0x1098] sm:$0xff] }
 0x158   : > { %2832 = vmatpush1.bf16.msra.mxu0 %v2831_v42  ;;  %v761_v42 = vld [vmem:[%s4110_s5 + $0xf60] sm:$0xff]  ;;  %v824_v6 = vld [vmem:[%s4110_s5 + $0x1158] sm:$0xff] }
 0x159   : > { %3344 = vmatpush1.bf16.msra.mxu1 %v3343_v43  ;;  %2834 = vmatprep.subr.bf16.mxu0 %v2833_v44  ;;  %v759_v43 = vld [vmem:[%s4110_s5 + $0xf50] sm:$0xff]  ;;  %v3365_v44 = vpack.c.bf16 %v764_v37, %v760_v36  ;;  %v2855_v50 = vpack.c.bf16 %v761_v42, %v757_v41  ;;  %v3385_v42 = vpack.c.bf16 %v804_v34, %v800_v33  ;;  %v828_v7 = vld [vmem:[%s4110_s5 + $0x1178] sm:$0xff] }
 0x15a   : > { %3346 = vmatprep.subr.bf16.mxu1 %v3345_v48  ;;  %v768_v48 = vld [vmem:[%s4110_s5 + $0xf98] sm:$0xff]  ;;  %v3367_v51 = vpack.c.bf16 %v763_v45, %v759_v43  ;;  %v799_v41 = vld [vmem:[%s4110_s5 + $0x1090] sm:$0xff]  ;;  %v810_v45 = vld [vmem:[%s4110_s5 + $0x10e8] sm:$0xff] }
 0x15b   : > { %v803_v43 = vld [vmem:[%s4110_s5 + $0x10b0] sm:$0xff]  ;;  %v832_v18 = vld [vmem:[%s4110_s5 + $0x1198] sm:$0xff] }
 0x15c   : > { %2836 = vmatpush1.bf16.msra.mxu0 %v2835_v54  ;;  %v769_v54 = vld [vmem:[%s4110_s5 + $0xfa0] sm:$0xff]  ;;  %v836_v19 = vld [vmem:[%s4110_s5 + $0x11b8] sm:$0xff] }
 0x15d   : > { %3348 = vmatpush1.bf16.msra.mxu1 %v3347_v55  ;;  %2838 = vmatprep.subr.bf16.mxu0 %v2837_v56  ;;  %v767_v55 = vld [vmem:[%s4110_s5 + $0xf90] sm:$0xff]  ;;  %v3369_v56 = vpack.c.bf16 %v772_v49, %v768_v48  ;;  %v2859_v62 = vpack.c.bf16 %v769_v54, %v765_v53  ;;  %v3387_v49 = vpack.c.bf16 %v803_v43, %v799_v41  ;;  %v850_v41 = vld [vmem:[%s4110_s5 + $0x1228] sm:$0xff]  ;;  %v852_v43 = vld [vmem:[%s4110_s5 + $0x1238] sm:$0xff] }
 0x15e   : > { %3350 = vmatprep.subr.bf16.mxu1 %v3349_v60  ;;  %v776_v60 = vld [vmem:[%s4110_s5 + $0xfd8] sm:$0xff]  ;;  %v3371_v63 = vpack.c.bf16 %v771_v57, %v767_v55  ;;  %v807_v53 = vld [vmem:[%s4110_s5 + $0x10d0] sm:$0xff]  ;;  %v3389_v54 = vpack.c.bf16 %v812_v47, %v808_v46  ;;  %v818_v57 = vld [vmem:[%s4110_s5 + $0x1128] sm:$0xff] }
 0x15f   : > { %v811_v55 = vld [vmem:[%s4110_s5 + $0x10f0] sm:$0xff]  ;;  %v845_v47 = vld [vmem:[%s4110_s5 + $0x1200] sm:$0xff] }
 0x160   : > { %2840 = vmatpush1.bf16.msra.mxu0 %v2839_v2  ;;  %v777_v2 = vld [vmem:[%s4110_s5 + $0xfe0] sm:$0xff] }
 0x161   : > { %3352 = vmatpush1.bf16.msra.mxu1 %v3351_v3  ;;  %2842 = vmatprep.subr.bf16.mxu0 %v2841_v4  ;;  %v775_v3 = vld [vmem:[%s4110_s5 + $0xfd0] sm:$0xff]  ;;  %v3373_v4 = vpack.c.bf16 %v780_v61, %v776_v60  ;;  %v2863_v10 = vpack.c.bf16 %v777_v2, %v773_v1  ;;  %v3391_v61 = vpack.c.bf16 %v811_v55, %v807_v53  ;;  %v858_v53 = vld [vmem:[%s4110_s5 + $0x1268] sm:$0xff]  ;;  %v860_v55 = vld [vmem:[%s4110_s5 + $0x1278] sm:$0xff] }
 0x162   : > { %3354 = vmatprep.subr.bf16.mxu1 %v3353_v8  ;;  %v784_v8 = vld [vmem:[%s4110_s5 + $0x1018] sm:$0xff]  ;;  %v3375_v11 = vpack.c.bf16 %v779_v5, %v775_v3  ;;  %v815_v1 = vld [vmem:[%s4110_s5 + $0x1110] sm:$0xff]  ;;  %v3393_v2 = vpack.c.bf16 %v820_v59, %v816_v58  ;;  %v826_v5 = vld [vmem:[%s4110_s5 + $0x1168] sm:$0xff] }
 0x163   : > { %v819_v3 = vld [vmem:[%s4110_s5 + $0x1130] sm:$0xff]  ;;  %v853_v59 = vld [vmem:[%s4110_s5 + $0x1240] sm:$0xff] }
 0x164   : > { %2844 = vmatpush1.bf16.msra.mxu0 %v2843_v14  ;;  %v785_v14 = vld [vmem:[%s4110_s5 + $0x1020] sm:$0xff] }
 0x165   : > { %3356 = vmatpush1.bf16.msra.mxu1 %v3355_v15  ;;  %2846 = vmatprep.subr.bf16.mxu0 %v2845_v16  ;;  %v783_v15 = vld [vmem:[%s4110_s5 + $0x1010] sm:$0xff]  ;;  %v3377_v16 = vpack.c.bf16 %v788_v9, %v784_v8  ;;  %v2867_v23 = vpack.c.bf16 %v785_v14, %v781_v13  ;;  %v3395_v9 = vpack.c.bf16 %v819_v3, %v815_v1  ;;  %v866_v1 = vld [vmem:[%s4110_s5 + $0x12a8] sm:$0xff]  ;;  %v868_v3 = vld [vmem:[%s4110_s5 + $0x12b8] sm:$0xff] }
 0x166   : > { %3358 = vmatprep.subr.bf16.mxu1 %v3357_v20  ;;  %v792_v20 = vld [vmem:[%s4110_s5 + $0x1058] sm:$0xff]  ;;  %v3379_v24 = vpack.c.bf16 %v787_v17, %v783_v15  ;;  %v823_v13 = vld [vmem:[%s4110_s5 + $0x1150] sm:$0xff]  ;;  %v3397_v14 = vpack.c.bf16 %v828_v7, %v824_v6  ;;  %v834_v17 = vld [vmem:[%s4110_s5 + $0x11a8] sm:$0xff] }
 0x167   : > { %v3381_v29 = vpack.c.bf16 %v796_v21, %v792_v20  ;;  %v827_v15 = vld [vmem:[%s4110_s5 + $0x1170] sm:$0xff]  ;;  %v861_v7 = vld [vmem:[%s4110_s5 + $0x1280] sm:$0xff] }
 0x168   : > { %2848 = vmatpush1.bf16.msra.mxu0 %v2847_v26  ;;  %v789_v26 = vld [vmem:[%s4110_s5 + $0x1040] sm:$0xff]  ;;  %v3399_v21 = vpack.c.bf16 %v827_v15, %v823_v13  ;;  %v874_v13 = vld [vmem:[%s4110_s5 + $0x12e8] sm:$0xff]  ;;  %v876_v15 = vld [vmem:[%s4110_s5 + $0x12f8] sm:$0xff] }
 0x169   : > { %3360 = vmatpush1.bf16.msra.mxu1 %v3359_v27  ;;  %2850 = vmatprep.subr.bf16.mxu0 %v2849_v28  ;;  %v793_v27 = vld [vmem:[%s4110_s5 + $0x1060] sm:$0xff]  ;;  %v791_v28 = vld [vmem:[%s4110_s5 + $0x1050] sm:$0xff] }
 0x16a   : > { %3362 = vmatprep.subr.bf16.mxu1 %v3361_v32  ;;  %v802_v32 = vld [vmem:[%s4110_s5 + $0x10a8] sm:$0xff]  ;;  %v2871_v36 = vpack.c.bf16 %v793_v27, %v789_v26  ;;  %v3383_v37 = vpack.c.bf16 %v795_v30, %v791_v28  ;;  %v3401_v26 = vpack.c.bf16 %v836_v19, %v832_v18  ;;  %v835_v27 = vld [vmem:[%s4110_s5 + $0x11b0] sm:$0xff]  ;;  %v840_v30 = vld [vmem:[%s4110_s5 + $0x11d8] sm:$0xff] }
 0x16b   : > { %v838_v28 = vld [vmem:[%s4110_s5 + $0x11c8] sm:$0xff]  ;;  %v869_v19 = vld [vmem:[%s4110_s5 + $0x12c0] sm:$0xff] }
 0x16c   : > { %2852 = vmatpush1.bf16.msra.mxu0 %v2851_v38  ;;  %v2873_v38 = vpack.c.bf16 %v802_v32, %v798_v31  ;;  %v844_v31 = vld [vmem:[%s4110_s5 + $0x11f8] sm:$0xff] }
 0x16d   : > { %3364 = vmatpush1.bf16.msra.mxu1 %v3363_v39  ;;  %2854 = vmatprep.subr.bf16.mxu0 %v2853_v40  ;;  %v797_v39 = vld [vmem:[%s4110_s5 + $0x1080] sm:$0xff] }
 0x16e   : > { %3366 = vmatprep.subr.bf16.mxu1 %v3365_v44  ;;  %v801_v40 = vld [vmem:[%s4110_s5 + $0x10a0] sm:$0xff]  ;;  %v806_v44 = vld [vmem:[%s4110_s5 + $0x10c8] sm:$0xff] }
 0x16f   : > { %v2875_v48 = vpack.c.bf16 %v801_v40, %v797_v39  ;;  %v843_v39 = vld [vmem:[%s4110_s5 + $0x11f0] sm:$0xff]  ;;  %v846_v40 = vld [vmem:[%s4110_s5 + $0x1208] sm:$0xff] }
 0x170   : > { %2856 = vmatpush1.bf16.msra.mxu0 %v2855_v50  ;;  %v2877_v50 = vpack.c.bf16 %v810_v45, %v806_v44  ;;  %v2897_v46 = vpack.c.bf16 %v850_v41, %v846_v40 }
 0x171   : > { %3368 = vmatpush1.bf16.msra.mxu1 %v3367_v51  ;;  %2858 = vmatprep.subr.bf16.mxu0 %v2857_v52  ;;  %v805_v51 = vld [vmem:[%s4110_s5 + $0x10c0] sm:$0xff] }
 0x172   : > { %3370 = vmatprep.subr.bf16.mxu1 %v3369_v56  ;;  %v809_v52 = vld [vmem:[%s4110_s5 + $0x10e0] sm:$0xff]  ;;  %v814_v56 = vld [vmem:[%s4110_s5 + $0x1108] sm:$0xff] }
 0x173   : > { %v2879_v60 = vpack.c.bf16 %v809_v52, %v805_v51  ;;  %v851_v51 = vld [vmem:[%s4110_s5 + $0x1230] sm:$0xff]  ;;  %v854_v52 = vld [vmem:[%s4110_s5 + $0x1248] sm:$0xff] }
 0x174   : > { %2860 = vmatpush1.bf16.msra.mxu0 %v2859_v62  ;;  %v2881_v62 = vpack.c.bf16 %v818_v57, %v814_v56  ;;  %v2901_v58 = vpack.c.bf16 %v858_v53, %v854_v52 }
 0x175   : > { %3372 = vmatpush1.bf16.msra.mxu1 %v3371_v63  ;;  %2862 = vmatprep.subr.bf16.mxu0 %v2861_v0  ;;  %v813_v63 = vld [vmem:[%s4110_s5 + $0x1100] sm:$0xff] }
 0x176   : > { %3374 = vmatprep.subr.bf16.mxu1 %v3373_v4  ;;  %v817_v0 = vld [vmem:[%s4110_s5 + $0x1120] sm:$0xff]  ;;  %v822_v4 = vld [vmem:[%s4110_s5 + $0x1148] sm:$0xff] }
 0x177   : > { %v2883_v8 = vpack.c.bf16 %v817_v0, %v813_v63  ;;  %v859_v63 = vld [vmem:[%s4110_s5 + $0x1270] sm:$0xff]  ;;  %v862_v0 = vld [vmem:[%s4110_s5 + $0x1288] sm:$0xff] }
 0x178   : > { %2864 = vmatpush1.bf16.msra.mxu0 %v2863_v10  ;;  %v2885_v10 = vpack.c.bf16 %v826_v5, %v822_v4  ;;  %v2905_v6 = vpack.c.bf16 %v866_v1, %v862_v0 }
 0x179   : > { %3376 = vmatpush1.bf16.msra.mxu1 %v3375_v11  ;;  %2866 = vmatprep.subr.bf16.mxu0 %v2865_v12  ;;  %v821_v11 = vld [vmem:[%s4110_s5 + $0x1140] sm:$0xff] }
 0x17a   : > { %3378 = vmatprep.subr.bf16.mxu1 %v3377_v16  ;;  %v825_v12 = vld [vmem:[%s4110_s5 + $0x1160] sm:$0xff]  ;;  %v830_v16 = vld [vmem:[%s4110_s5 + $0x1188] sm:$0xff] }
 0x17b   : > { %1571 = vmatmul.mubr.f32.vlgmr.msra.gmra.mrb[0].mxu0 %v255_v22  ;;  %v2887_v20 = vpack.c.bf16 %v825_v12, %v821_v11  ;;  %v867_v11 = vld [vmem:[%s4110_s5 + $0x12b0] sm:$0xff]  ;;  %v870_v12 = vld [vmem:[%s4110_s5 + $0x12c8] sm:$0xff] }
 0x17c   : > { %2868 = vmatpush1.bf16.msra.mxu0 %v2867_v23  ;;  %2139 = vmatmul.mubr.f32.vlgmr.msra.gmra.mrb[0].mxu1 %v255_v22  ;;  %v2889_v22 = vpack.c.bf16 %v834_v17, %v830_v16  ;;  %v829_v23 = vld [vmem:[%s4110_s5 + $0x1180] sm:$0xff]  ;;  %v2909_v18 = vpack.c.bf16 %v874_v13, %v870_v12 }
 0x17d   : > { %3380 = vmatpush1.bf16.msra.mxu1 %v3379_v24  ;;  %2870 = vmatprep.subr.bf16.mxu0 %v2869_v25  ;;  %v833_v24 = vld [vmem:[%s4110_s5 + $0x11a0] sm:$0xff]  ;;  %v831_v25 = vld [vmem:[%s4110_s5 + $0x1190] sm:$0xff] }
 0x17e   : > { %3382 = vmatprep.subr.bf16.mxu1 %v3381_v29  ;;  %1641 = vmatprep.mubr.f32.mxu0 %v258_v35  ;;  %v842_v29 = vld [vmem:[%s4110_s5 + $0x11e8] sm:$0xff]  ;;  %v2891_v32 = vpack.c.bf16 %v833_v24, %v829_v23  ;;  %v3403_v33 = vpack.c.bf16 %v835_v27, %v831_v25  ;;  %v875_v23 = vld [vmem:[%s4110_s5 + $0x12f0] sm:$0xff]  ;;  %v884_v27 = vld [vmem:[%s4110_s5 + $0x1338] sm:$0xff] }
 0x17f   : > { %2209 = vmatprep.mubr.f32.mxu1 %v258_v35  ;;  %v2893_v34 = vpack.c.bf16 %v842_v29, %v838_v28  ;;  %v837_v35 = vld [vmem:[%s4110_s5 + $0x11c0] sm:$0xff]  ;;  %v878_v24 = vld [vmem:[%s4110_s5 + $0x1308] sm:$0xff] }
 0x180   : > { %2872 = vmatpush1.bf16.msra.mxu0 %v2871_v36  ;;  %v841_v36 = vld [vmem:[%s4110_s5 + $0x11e0] sm:$0xff]  ;;  %v882_v25 = vld [vmem:[%s4110_s5 + $0x1328] sm:$0xff] }
 0x181   : > { %3384 = vmatpush1.bf16.msra.mxu1 %v3383_v37  ;;  %2874 = vmatprep.subr.bf16.mxu0 %v2873_v38  ;;  %v839_v37 = vld [vmem:[%s4110_s5 + $0x11d0] sm:$0xff]  ;;  %v3405_v38 = vpack.c.bf16 %v844_v31, %v840_v30  ;;  %v2895_v44 = vpack.c.bf16 %v841_v36, %v837_v35  ;;  %v2913_v30 = vpack.c.bf16 %v882_v25, %v878_v24  ;;  %v877_v31 = vld [vmem:[%s4110_s5 + $0x1300] sm:$0xff]  ;;  %v886_v36 = vld [vmem:[%s4110_s5 + $0x1348] sm:$0xff] }
 0x182   : > { %3386 = vmatprep.subr.bf16.mxu1 %v3385_v42  ;;  %v848_v42 = vld [vmem:[%s4110_s5 + $0x1218] sm:$0xff]  ;;  %v3407_v45 = vpack.c.bf16 %v843_v39, %v839_v37  ;;  %v883_v35 = vld [vmem:[%s4110_s5 + $0x1330] sm:$0xff]  ;;  %v890_v37 = vld [vmem:[%s4110_s5 + $0x1368] sm:$0xff] }
 0x183   : > { %v892_v39 = vld [vmem:[%s4110_s5 + $0x1378] sm:$0xff]  ;;  %v257_v24 = vld [vmem:[%s4223_s12 + $0x40] sm:$0xff] }
 0x184   : > { %2876 = vmatpush1.bf16.msra.mxu0 %v2875_v48  ;;  %v849_v48 = vld [vmem:[%s4110_s5 + $0x1220] sm:$0xff] }
 0x185   : > { %3388 = vmatpush1.bf16.msra.mxu1 %v3387_v49  ;;  %2878 = vmatprep.subr.bf16.mxu0 %v2877_v50  ;;  %v847_v49 = vld [vmem:[%s4110_s5 + $0x1210] sm:$0xff]  ;;  %v3409_v50 = vpack.c.bf16 %v852_v43, %v848_v42  ;;  %v2899_v56 = vpack.c.bf16 %v849_v48, %v845_v47  ;;  %v2917_v42 = vpack.c.bf16 %v890_v37, %v886_v36  ;;  %v885_v43 = vld [vmem:[%s4110_s5 + $0x1340] sm:$0xff]  ;;  %v894_v48 = vld [vmem:[%s4110_s5 + $0x1388] sm:$0xff] }
 0x186   : > { %3390 = vmatprep.subr.bf16.mxu1 %v3389_v54  ;;  %v856_v54 = vld [vmem:[%s4110_s5 + $0x1258] sm:$0xff]  ;;  %v3411_v57 = vpack.c.bf16 %v851_v51, %v847_v49  ;;  %v891_v47 = vld [vmem:[%s4110_s5 + $0x1370] sm:$0xff]  ;;  %v898_v49 = vld [vmem:[%s4110_s5 + $0x13a8] sm:$0xff] }
 0x187   : > { %v900_v51 = vld [vmem:[%s4110_s5 + $0x13b8] sm:$0xff] }
 0x188   : > { %2880 = vmatpush1.bf16.msra.mxu0 %v2879_v60  ;;  %v857_v60 = vld [vmem:[%s4110_s5 + $0x1260] sm:$0xff]  ;;  %v932_v36 = vld [vmem:[%s4110_s5 + $0x14b8] sm:$0xff] }
 0x189   : > { %3392 = vmatpush1.bf16.msra.mxu1 %v3391_v61  ;;  %2882 = vmatprep.subr.bf16.mxu0 %v2881_v62  ;;  %v855_v61 = vld [vmem:[%s4110_s5 + $0x1250] sm:$0xff]  ;;  %v3413_v62 = vpack.c.bf16 %v860_v55, %v856_v54  ;;  %v2903_v4 = vpack.c.bf16 %v857_v60, %v853_v59  ;;  %v2921_v54 = vpack.c.bf16 %v898_v49, %v894_v48  ;;  %v893_v55 = vld [vmem:[%s4110_s5 + $0x1380] sm:$0xff]  ;;  %v902_v60 = vld [vmem:[%s4110_s5 + $0x13c8] sm:$0xff] }
 0x18a   : > { %3394 = vmatprep.subr.bf16.mxu1 %v3393_v2  ;;  %v864_v2 = vld [vmem:[%s4110_s5 + $0x1298] sm:$0xff]  ;;  %v3415_v5 = vpack.c.bf16 %v859_v63, %v855_v61  ;;  %v899_v59 = vld [vmem:[%s4110_s5 + $0x13b0] sm:$0xff]  ;;  %v906_v61 = vld [vmem:[%s4110_s5 + $0x13e8] sm:$0xff] }
 0x18b   : > { %v908_v63 = vld [vmem:[%s4110_s5 + $0x13f8] sm:$0xff] }
 0x18c   : > { %2884 = vmatpush1.bf16.msra.mxu0 %v2883_v8  ;;  %v865_v8 = vld [vmem:[%s4110_s5 + $0x12a0] sm:$0xff]  ;;  %v260_v37 = vld [vmem:[%s4223_s12 + $0x58] sm:$0xff] }
 0x18d   : > { %3396 = vmatpush1.bf16.msra.mxu1 %v3395_v9  ;;  %2886 = vmatprep.subr.bf16.mxu0 %v2885_v10  ;;  %v863_v9 = vld [vmem:[%s4110_s5 + $0x1290] sm:$0xff]  ;;  %v3417_v10 = vpack.c.bf16 %v868_v3, %v864_v2  ;;  %v2907_v16 = vpack.c.bf16 %v865_v8, %v861_v7  ;;  %v2925_v2 = vpack.c.bf16 %v906_v61, %v902_v60  ;;  %v901_v3 = vld [vmem:[%s4110_s5 + $0x13c0] sm:$0xff]  ;;  %v910_v8 = vld [vmem:[%s4110_s5 + $0x1408] sm:$0xff] }
 0x18e   : > { %3398 = vmatprep.subr.bf16.mxu1 %v3397_v14  ;;  %v872_v14 = vld [vmem:[%s4110_s5 + $0x12d8] sm:$0xff]  ;;  %v3419_v17 = vpack.c.bf16 %v867_v11, %v863_v9  ;;  %v907_v7 = vld [vmem:[%s4110_s5 + $0x13f0] sm:$0xff]  ;;  %v914_v9 = vld [vmem:[%s4110_s5 + $0x1428] sm:$0xff] }
 0x18f   : > { %v916_v11 = vld [vmem:[%s4110_s5 + $0x1438] sm:$0xff] }
 0x190   : > { %2888 = vmatpush1.bf16.msra.mxu0 %v2887_v20  ;;  %v873_v20 = vld [vmem:[%s4110_s5 + $0x12e0] sm:$0xff]  ;;  %v936_v48 = vld [vmem:[%s4110_s5 + $0x14d8] sm:$0xff] }
 0x191   : > { %3400 = vmatpush1.bf16.msra.mxu1 %v3399_v21  ;;  %2890 = vmatprep.subr.bf16.mxu0 %v2889_v22  ;;  %v871_v21 = vld [vmem:[%s4110_s5 + $0x12d0] sm:$0xff]  ;;  %v3421_v22 = vpack.c.bf16 %v876_v15, %v872_v14  ;;  %v2911_v28 = vpack.c.bf16 %v873_v20, %v869_v19  ;;  %v2929_v14 = vpack.c.bf16 %v914_v9, %v910_v8  ;;  %v909_v15 = vld [vmem:[%s4110_s5 + $0x1400] sm:$0xff]  ;;  %v918_v20 = vld [vmem:[%s4110_s5 + $0x1448] sm:$0xff] }
 0x192   : > { %3402 = vmatprep.subr.bf16.mxu1 %v3401_v26  ;;  %v880_v26 = vld [vmem:[%s4110_s5 + $0x1318] sm:$0xff]  ;;  %v3423_v29 = vpack.c.bf16 %v875_v23, %v871_v21  ;;  %v915_v19 = vld [vmem:[%s4110_s5 + $0x1430] sm:$0xff]  ;;  %v922_v21 = vld [vmem:[%s4110_s5 + $0x1468] sm:$0xff] }
 0x193   : > { %v924_v23 = vld [vmem:[%s4110_s5 + $0x1478] sm:$0xff] }
 0x194   : > { %2892 = vmatpush1.bf16.msra.mxu0 %v2891_v32  ;;  %v881_v32 = vld [vmem:[%s4110_s5 + $0x1320] sm:$0xff]  ;;  %v940_v49 = vld [vmem:[%s4110_s5 + $0x14f8] sm:$0xff] }
 0x195   : > { %3404 = vmatpush1.bf16.msra.mxu1 %v3403_v33  ;;  %2894 = vmatprep.subr.bf16.mxu0 %v2893_v34  ;;  %v879_v33 = vld [vmem:[%s4110_s5 + $0x1310] sm:$0xff]  ;;  %v3425_v34 = vpack.c.bf16 %v884_v27, %v880_v26  ;;  %v2915_v40 = vpack.c.bf16 %v881_v32, %v877_v31  ;;  %v2933_v27 = vpack.c.bf16 %v922_v21, %v918_v20  ;;  %v944_v60 = vld [vmem:[%s4110_s5 + $0x1518] sm:$0xff] }
 0x196   : > { %3406 = vmatprep.subr.bf16.mxu1 %v3405_v38  ;;  %v888_v38 = vld [vmem:[%s4110_s5 + $0x1358] sm:$0xff]  ;;  %v3427_v41 = vpack.c.bf16 %v883_v35, %v879_v33  ;;  %v923_v32 = vld [vmem:[%s4110_s5 + $0x1470] sm:$0xff]  ;;  %v926_v33 = vld [vmem:[%s4110_s5 + $0x1488] sm:$0xff] }
 0x197   : > { %v928_v35 = vld [vmem:[%s4110_s5 + $0x1498] sm:$0xff] }
 0x198   : > { %2896 = vmatpush1.bf16.msra.mxu0 %v2895_v44  ;;  %v889_v44 = vld [vmem:[%s4110_s5 + $0x1360] sm:$0xff]  ;;  %v948_v61 = vld [vmem:[%s4110_s5 + $0x1538] sm:$0xff] }
 0x199   : > { %3408 = vmatpush1.bf16.msra.mxu1 %v3407_v45  ;;  %2898 = vmatprep.subr.bf16.mxu0 %v2897_v46  ;;  %v887_v45 = vld [vmem:[%s4110_s5 + $0x1350] sm:$0xff]  ;;  %v3429_v46 = vpack.c.bf16 %v892_v39, %v888_v38  ;;  %v2919_v52 = vpack.c.bf16 %v889_v44, %v885_v43  ;;  %v3449_v44 = vpack.c.bf16 %v932_v36, %v928_v35  ;;  %v952_v8 = vld [vmem:[%s4110_s5 + $0x1558] sm:$0xff] }
 0x19a   : > { %3410 = vmatprep.subr.bf16.mxu1 %v3409_v50  ;;  %v896_v50 = vld [vmem:[%s4110_s5 + $0x1398] sm:$0xff]  ;;  %v3431_v53 = vpack.c.bf16 %v891_v47, %v887_v45  ;;  %v927_v43 = vld [vmem:[%s4110_s5 + $0x1490] sm:$0xff]  ;;  %v938_v47 = vld [vmem:[%s4110_s5 + $0x14e8] sm:$0xff] }
 0x19b   : > { %v931_v45 = vld [vmem:[%s4110_s5 + $0x14b0] sm:$0xff]  ;;  %v956_v9 = vld [vmem:[%s4110_s5 + $0x1578] sm:$0xff] }
 0x19c   : > { %2900 = vmatpush1.bf16.msra.mxu0 %v2899_v56  ;;  %v897_v56 = vld [vmem:[%s4110_s5 + $0x13a0] sm:$0xff]  ;;  %v960_v20 = vld [vmem:[%s4110_s5 + $0x1598] sm:$0xff] }
 0x19d   : > { %3412 = vmatpush1.bf16.msra.mxu1 %v3411_v57  ;;  %2902 = vmatprep.subr.bf16.mxu0 %v2901_v58  ;;  %v895_v57 = vld [vmem:[%s4110_s5 + $0x1390] sm:$0xff]  ;;  %v3433_v58 = vpack.c.bf16 %v900_v51, %v896_v50  ;;  %v2923_v0 = vpack.c.bf16 %v897_v56, %v893_v55  ;;  %v3451_v51 = vpack.c.bf16 %v931_v45, %v927_v43  ;;  %v964_v21 = vld [vmem:[%s4110_s5 + $0x15b8] sm:$0xff]  ;;  %v978_v43 = vld [vmem:[%s4110_s5 + $0x1628] sm:$0xff] }
 0x19e   : > { %3414 = vmatprep.subr.bf16.mxu1 %v3413_v62  ;;  %v904_v62 = vld [vmem:[%s4110_s5 + $0x13d8] sm:$0xff]  ;;  %v3435_v1 = vpack.c.bf16 %v899_v59, %v895_v57  ;;  %v935_v55 = vld [vmem:[%s4110_s5 + $0x14d0] sm:$0xff]  ;;  %v3453_v56 = vpack.c.bf16 %v940_v49, %v936_v48  ;;  %v946_v59 = vld [vmem:[%s4110_s5 + $0x1528] sm:$0xff] }
 0x19f   : > { %v939_v57 = vld [vmem:[%s4110_s5 + $0x14f0] sm:$0xff]  ;;  %v980_v45 = vld [vmem:[%s4110_s5 + $0x1638] sm:$0xff]  ;;  %v973_v49 = vld [vmem:[%s4110_s5 + $0x1600] sm:$0xff] }
 0x1a0   : > { %2904 = vmatpush1.bf16.msra.mxu0 %v2903_v4  ;;  %v905_v4 = vld [vmem:[%s4110_s5 + $0x13e0] sm:$0xff] }
 0x1a1   : > { %3416 = vmatpush1.bf16.msra.mxu1 %v3415_v5  ;;  %2906 = vmatprep.subr.bf16.mxu0 %v2905_v6  ;;  %v903_v5 = vld [vmem:[%s4110_s5 + $0x13d0] sm:$0xff]  ;;  %v3437_v6 = vpack.c.bf16 %v908_v63, %v904_v62  ;;  %v2927_v12 = vpack.c.bf16 %v905_v4, %v901_v3  ;;  %v3455_v63 = vpack.c.bf16 %v939_v57, %v935_v55  ;;  %v986_v55 = vld [vmem:[%s4110_s5 + $0x1668] sm:$0xff]  ;;  %v988_v57 = vld [vmem:[%s4110_s5 + $0x1678] sm:$0xff] }
 0x1a2   : > { %3418 = vmatprep.subr.bf16.mxu1 %v3417_v10  ;;  %v912_v10 = vld [vmem:[%s4110_s5 + $0x1418] sm:$0xff]  ;;  %v3439_v13 = vpack.c.bf16 %v907_v7, %v903_v5  ;;  %v943_v3 = vld [vmem:[%s4110_s5 + $0x1510] sm:$0xff]  ;;  %v3457_v4 = vpack.c.bf16 %v948_v61, %v944_v60  ;;  %v954_v7 = vld [vmem:[%s4110_s5 + $0x1568] sm:$0xff] }
 0x1a3   : > { %v947_v5 = vld [vmem:[%s4110_s5 + $0x1530] sm:$0xff]  ;;  %v981_v61 = vld [vmem:[%s4110_s5 + $0x1640] sm:$0xff] }
 0x1a4   : > { %2908 = vmatpush1.bf16.msra.mxu0 %v2907_v16  ;;  %v913_v16 = vld [vmem:[%s4110_s5 + $0x1420] sm:$0xff] }
 0x1a5   : > { %3420 = vmatpush1.bf16.msra.mxu1 %v3419_v17  ;;  %2910 = vmatprep.subr.bf16.mxu0 %v2909_v18  ;;  %v911_v17 = vld [vmem:[%s4110_s5 + $0x1410] sm:$0xff]  ;;  %v3441_v18 = vpack.c.bf16 %v916_v11, %v912_v10  ;;  %v2931_v25 = vpack.c.bf16 %v913_v16, %v909_v15  ;;  %v3459_v11 = vpack.c.bf16 %v947_v5, %v943_v3  ;;  %v994_v3 = vld [vmem:[%s4110_s5 + $0x16a8] sm:$0xff]  ;;  %v996_v5 = vld [vmem:[%s4110_s5 + $0x16b8] sm:$0xff] }
 0x1a6   : > { %3422 = vmatprep.subr.bf16.mxu1 %v3421_v22  ;;  %v920_v22 = vld [vmem:[%s4110_s5 + $0x1458] sm:$0xff]  ;;  %v3443_v26 = vpack.c.bf16 %v915_v19, %v911_v17  ;;  %v951_v15 = vld [vmem:[%s4110_s5 + $0x1550] sm:$0xff]  ;;  %v3461_v16 = vpack.c.bf16 %v956_v9, %v952_v8  ;;  %v962_v19 = vld [vmem:[%s4110_s5 + $0x15a8] sm:$0xff] }
 0x1a7   : > { %v3445_v31 = vpack.c.bf16 %v924_v23, %v920_v22  ;;  %v955_v17 = vld [vmem:[%s4110_s5 + $0x1570] sm:$0xff]  ;;  %v989_v9 = vld [vmem:[%s4110_s5 + $0x1680] sm:$0xff] }
 0x1a8   : > { %2912 = vmatpush1.bf16.msra.mxu0 %v2911_v28  ;;  %v917_v28 = vld [vmem:[%s4110_s5 + $0x1440] sm:$0xff]  ;;  %v3463_v23 = vpack.c.bf16 %v955_v17, %v951_v15  ;;  %v1002_v15 = vld [vmem:[%s4110_s5 + $0x16e8] sm:$0xff]  ;;  %v1004_v17 = vld [vmem:[%s4110_s5 + $0x16f8] sm:$0xff] }
 0x1a9   : > { %3424 = vmatpush1.bf16.msra.mxu1 %v3423_v29  ;;  %2914 = vmatprep.subr.bf16.mxu0 %v2913_v30  ;;  %v921_v29 = vld [vmem:[%s4110_s5 + $0x1460] sm:$0xff]  ;;  %v919_v30 = vld [vmem:[%s4110_s5 + $0x1450] sm:$0xff] }
 0x1aa   : > { %3426 = vmatprep.subr.bf16.mxu1 %v3425_v34  ;;  %v930_v34 = vld [vmem:[%s4110_s5 + $0x14a8] sm:$0xff]  ;;  %v2935_v38 = vpack.c.bf16 %v921_v29, %v917_v28  ;;  %v3447_v39 = vpack.c.bf16 %v923_v32, %v919_v30  ;;  %v3465_v28 = vpack.c.bf16 %v964_v21, %v960_v20  ;;  %v963_v29 = vld [vmem:[%s4110_s5 + $0x15b0] sm:$0xff]  ;;  %v968_v32 = vld [vmem:[%s4110_s5 + $0x15d8] sm:$0xff] }
 0x1ab   : > { %v966_v30 = vld [vmem:[%s4110_s5 + $0x15c8] sm:$0xff]  ;;  %v997_v21 = vld [vmem:[%s4110_s5 + $0x16c0] sm:$0xff] }
 0x1ac   : > { %2916 = vmatpush1.bf16.msra.mxu0 %v2915_v40  ;;  %v2937_v40 = vpack.c.bf16 %v930_v34, %v926_v33  ;;  %v972_v33 = vld [vmem:[%s4110_s5 + $0x15f8] sm:$0xff] }
 0x1ad   : > { %3428 = vmatpush1.bf16.msra.mxu1 %v3427_v41  ;;  %2918 = vmatprep.subr.bf16.mxu0 %v2917_v42  ;;  %v925_v41 = vld [vmem:[%s4110_s5 + $0x1480] sm:$0xff] }
 0x1ae   : > { %3430 = vmatprep.subr.bf16.mxu1 %v3429_v46  ;;  %v929_v42 = vld [vmem:[%s4110_s5 + $0x14a0] sm:$0xff]  ;;  %v934_v46 = vld [vmem:[%s4110_s5 + $0x14c8] sm:$0xff] }
 0x1af   : > { %v2939_v50 = vpack.c.bf16 %v929_v42, %v925_v41  ;;  %v971_v41 = vld [vmem:[%s4110_s5 + $0x15f0] sm:$0xff]  ;;  %v974_v42 = vld [vmem:[%s4110_s5 + $0x1608] sm:$0xff] }
 0x1b0   : > { %2920 = vmatpush1.bf16.msra.mxu0 %v2919_v52  ;;  %v2941_v52 = vpack.c.bf16 %v938_v47, %v934_v46  ;;  %v2961_v48 = vpack.c.bf16 %v978_v43, %v974_v42 }
 0x1b1   : > { %3432 = vmatpush1.bf16.msra.mxu1 %v3431_v53  ;;  %2922 = vmatprep.subr.bf16.mxu0 %v2921_v54  ;;  %v933_v53 = vld [vmem:[%s4110_s5 + $0x14c0] sm:$0xff] }
 0x1b2   : > { %3434 = vmatprep.subr.bf16.mxu1 %v3433_v58  ;;  %v937_v54 = vld [vmem:[%s4110_s5 + $0x14e0] sm:$0xff]  ;;  %v942_v58 = vld [vmem:[%s4110_s5 + $0x1508] sm:$0xff] }
 0x1b3   : > { %v2943_v62 = vpack.c.bf16 %v937_v54, %v933_v53  ;;  %v979_v53 = vld [vmem:[%s4110_s5 + $0x1630] sm:$0xff]  ;;  %v982_v54 = vld [vmem:[%s4110_s5 + $0x1648] sm:$0xff] }
 0x1b4   : > { %2924 = vmatpush1.bf16.msra.mxu0 %v2923_v0  ;;  %v2945_v0 = vpack.c.bf16 %v946_v59, %v942_v58  ;;  %v2965_v60 = vpack.c.bf16 %v986_v55, %v982_v54 }
 0x1b5   : > { %3436 = vmatpush1.bf16.msra.mxu1 %v3435_v1  ;;  %2926 = vmatprep.subr.bf16.mxu0 %v2925_v2  ;;  %v941_v1 = vld [vmem:[%s4110_s5 + $0x1500] sm:$0xff] }
 0x1b6   : > { %3438 = vmatprep.subr.bf16.mxu1 %v3437_v6  ;;  %v945_v2 = vld [vmem:[%s4110_s5 + $0x1520] sm:$0xff]  ;;  %v950_v6 = vld [vmem:[%s4110_s5 + $0x1548] sm:$0xff] }
 0x1b7   : > { %v2947_v10 = vpack.c.bf16 %v945_v2, %v941_v1  ;;  %v987_v1 = vld [vmem:[%s4110_s5 + $0x1670] sm:$0xff]  ;;  %v990_v2 = vld [vmem:[%s4110_s5 + $0x1688] sm:$0xff] }
 0x1b8   : > { %2928 = vmatpush1.bf16.msra.mxu0 %v2927_v12  ;;  %v2949_v12 = vpack.c.bf16 %v954_v7, %v950_v6  ;;  %v2969_v8 = vpack.c.bf16 %v994_v3, %v990_v2 }
 0x1b9   : > { %3440 = vmatpush1.bf16.msra.mxu1 %v3439_v13  ;;  %2930 = vmatprep.subr.bf16.mxu0 %v2929_v14  ;;  %v949_v13 = vld [vmem:[%s4110_s5 + $0x1540] sm:$0xff] }
 0x1ba   : > { %3442 = vmatprep.subr.bf16.mxu1 %v3441_v18  ;;  %v953_v14 = vld [vmem:[%s4110_s5 + $0x1560] sm:$0xff]  ;;  %v958_v18 = vld [vmem:[%s4110_s5 + $0x1588] sm:$0xff] }
 0x1bb   : > { %1642 = vmatmul.mubr.f32.vlgmr.msra.gmra.mrb[0].mxu0 %v257_v24  ;;  %v2951_v22 = vpack.c.bf16 %v953_v14, %v949_v13  ;;  %v995_v13 = vld [vmem:[%s4110_s5 + $0x16b0] sm:$0xff]  ;;  %v998_v14 = vld [vmem:[%s4110_s5 + $0x16c8] sm:$0xff] }
 0x1bc   : > { %2932 = vmatpush1.bf16.msra.mxu0 %v2931_v25  ;;  %2210 = vmatmul.mubr.f32.vlgmr.msra.gmra.mrb[0].mxu1 %v257_v24  ;;  %v2953_v24 = vpack.c.bf16 %v962_v19, %v958_v18  ;;  %v957_v25 = vld [vmem:[%s4110_s5 + $0x1580] sm:$0xff]  ;;  %v2973_v20 = vpack.c.bf16 %v1002_v15, %v998_v14 }
 0x1bd   : > { %3444 = vmatpush1.bf16.msra.mxu1 %v3443_v26  ;;  %2934 = vmatprep.subr.bf16.mxu0 %v2933_v27  ;;  %v961_v26 = vld [vmem:[%s4110_s5 + $0x15a0] sm:$0xff]  ;;  %v959_v27 = vld [vmem:[%s4110_s5 + $0x1590] sm:$0xff] }
 0x1be   : > { %3446 = vmatprep.subr.bf16.mxu1 %v3445_v31  ;;  %1712 = vmatprep.mubr.f32.mxu0 %v260_v37  ;;  %v970_v31 = vld [vmem:[%s4110_s5 + $0x15e8] sm:$0xff]  ;;  %v2955_v34 = vpack.c.bf16 %v961_v26, %v957_v25  ;;  %v3467_v35 = vpack.c.bf16 %v963_v29, %v959_v27  ;;  %v1003_v25 = vld [vmem:[%s4110_s5 + $0x16f0] sm:$0xff]  ;;  %v1012_v29 = vld [vmem:[%s4110_s5 + $0x1738] sm:$0xff] }
 0x1bf   : > { %2280 = vmatprep.mubr.f32.mxu1 %v260_v37  ;;  %v2957_v36 = vpack.c.bf16 %v970_v31, %v966_v30  ;;  %v965_v37 = vld [vmem:[%s4110_s5 + $0x15c0] sm:$0xff]  ;;  %v1006_v26 = vld [vmem:[%s4110_s5 + $0x1708] sm:$0xff] }
 0x1c0   : > { %2936 = vmatpush1.bf16.msra.mxu0 %v2935_v38  ;;  %v969_v38 = vld [vmem:[%s4110_s5 + $0x15e0] sm:$0xff]  ;;  %v1010_v27 = vld [vmem:[%s4110_s5 + $0x1728] sm:$0xff] }
 0x1c1   : > { %3448 = vmatpush1.bf16.msra.mxu1 %v3447_v39  ;;  %2938 = vmatprep.subr.bf16.mxu0 %v2937_v40  ;;  %v967_v39 = vld [vmem:[%s4110_s5 + $0x15d0] sm:$0xff]  ;;  %v3469_v40 = vpack.c.bf16 %v972_v33, %v968_v32  ;;  %v2959_v46 = vpack.c.bf16 %v969_v38, %v965_v37  ;;  %v2977_v32 = vpack.c.bf16 %v1010_v27, %v1006_v26  ;;  %v1005_v33 = vld [vmem:[%s4110_s5 + $0x1700] sm:$0xff]  ;;  %v1014_v38 = vld [vmem:[%s4110_s5 + $0x1748] sm:$0xff] }
 0x1c2   : > { %3450 = vmatprep.subr.bf16.mxu1 %v3449_v44  ;;  %v976_v44 = vld [vmem:[%s4110_s5 + $0x1618] sm:$0xff]  ;;  %v3471_v47 = vpack.c.bf16 %v971_v41, %v967_v39  ;;  %v1011_v37 = vld [vmem:[%s4110_s5 + $0x1730] sm:$0xff]  ;;  %v1018_v39 = vld [vmem:[%s4110_s5 + $0x1768] sm:$0xff] }
 0x1c3   : > { %v1020_v41 = vld [vmem:[%s4110_s5 + $0x1778] sm:$0xff]  ;;  %v259_v26 = vld [vmem:[%s4223_s12 + $0x50] sm:$0xff] }
 0x1c4   : > { %2940 = vmatpush1.bf16.msra.mxu0 %v2939_v50  ;;  %v977_v50 = vld [vmem:[%s4110_s5 + $0x1620] sm:$0xff] }
 0x1c5   : > { %3452 = vmatpush1.bf16.msra.mxu1 %v3451_v51  ;;  %2942 = vmatprep.subr.bf16.mxu0 %v2941_v52  ;;  %v975_v51 = vld [vmem:[%s4110_s5 + $0x1610] sm:$0xff]  ;;  %v3473_v52 = vpack.c.bf16 %v980_v45, %v976_v44  ;;  %v2963_v58 = vpack.c.bf16 %v977_v50, %v973_v49  ;;  %v2981_v44 = vpack.c.bf16 %v1018_v39, %v1014_v38  ;;  %v1013_v45 = vld [vmem:[%s4110_s5 + $0x1740] sm:$0xff]  ;;  %v1022_v50 = vld [vmem:[%s4110_s5 + $0x1788] sm:$0xff] }
 0x1c6   : > { %3454 = vmatprep.subr.bf16.mxu1 %v3453_v56  ;;  %v984_v56 = vld [vmem:[%s4110_s5 + $0x1658] sm:$0xff]  ;;  %v3475_v59 = vpack.c.bf16 %v979_v53, %v975_v51  ;;  %v1019_v49 = vld [vmem:[%s4110_s5 + $0x1770] sm:$0xff]  ;;  %v1026_v51 = vld [vmem:[%s4110_s5 + $0x17a8] sm:$0xff] }
 0x1c7   : > { %v1028_v53 = vld [vmem:[%s4110_s5 + $0x17b8] sm:$0xff]  ;;  %v262_v39 = vld [vmem:[%s4223_s12 + $0x68] sm:$0xff] }
 0x1c8   : > { %2944 = vmatpush1.bf16.msra.mxu0 %v2943_v62  ;;  %v985_v62 = vld [vmem:[%s4110_s5 + $0x1660] sm:$0xff]  ;;  %v1060_v38 = vld [vmem:[%s4110_s5 + $0x18b8] sm:$0xff] }
 0x1c9   : > { %3456 = vmatpush1.bf16.msra.mxu1 %v3455_v63  ;;  %2946 = vmatprep.subr.bf16.mxu0 %v2945_v0  ;;  %v983_v63 = vld [vmem:[%s4110_s5 + $0x1650] sm:$0xff]  ;;  %v3477_v0 = vpack.c.bf16 %v988_v57, %v984_v56  ;;  %v2967_v6 = vpack.c.bf16 %v985_v62, %v981_v61  ;;  %v2985_v56 = vpack.c.bf16 %v1026_v51, %v1022_v50  ;;  %v1021_v57 = vld [vmem:[%s4110_s5 + $0x1780] sm:$0xff]  ;;  %v1030_v62 = vld [vmem:[%s4110_s5 + $0x17c8] sm:$0xff] }
 0x1ca   : > { %3458 = vmatprep.subr.bf16.mxu1 %v3457_v4  ;;  %v992_v4 = vld [vmem:[%s4110_s5 + $0x1698] sm:$0xff]  ;;  %v3479_v7 = vpack.c.bf16 %v987_v1, %v983_v63  ;;  %v1027_v61 = vld [vmem:[%s4110_s5 + $0x17b0] sm:$0xff]  ;;  %v1034_v63 = vld [vmem:[%s4110_s5 + $0x17e8] sm:$0xff] }
 0x1cb   : > { %v1036_v1 = vld [vmem:[%s4110_s5 + $0x17f8] sm:$0xff] }
 0x1cc   : > { %2948 = vmatpush1.bf16.msra.mxu0 %v2947_v10  ;;  %v993_v10 = vld [vmem:[%s4110_s5 + $0x16a0] sm:$0xff]  ;;  %v1064_v50 = vld [vmem:[%s4110_s5 + $0x18d8] sm:$0xff] }
 0x1cd   : > { %3460 = vmatpush1.bf16.msra.mxu1 %v3459_v11  ;;  %2950 = vmatprep.subr.bf16.mxu0 %v2949_v12  ;;  %v991_v11 = vld [vmem:[%s4110_s5 + $0x1690] sm:$0xff]  ;;  %v3481_v12 = vpack.c.bf16 %v996_v5, %v992_v4  ;;  %v2971_v18 = vpack.c.bf16 %v993_v10, %v989_v9  ;;  %v2989_v4 = vpack.c.bf16 %v1034_v63, %v1030_v62  ;;  %v1029_v5 = vld [vmem:[%s4110_s5 + $0x17c0] sm:$0xff]  ;;  %v1038_v10 = vld [vmem:[%s4110_s5 + $0x1808] sm:$0xff] }
 0x1ce   : > { %3462 = vmatprep.subr.bf16.mxu1 %v3461_v16  ;;  %v1000_v16 = vld [vmem:[%s4110_s5 + $0x16d8] sm:$0xff]  ;;  %v3483_v19 = vpack.c.bf16 %v995_v13, %v991_v11  ;;  %v1035_v9 = vld [vmem:[%s4110_s5 + $0x17f0] sm:$0xff]  ;;  %v1042_v11 = vld [vmem:[%s4110_s5 + $0x1828] sm:$0xff] }
 0x1cf   : > { %v1044_v13 = vld [vmem:[%s4110_s5 + $0x1838] sm:$0xff] }
 0x1d0   : > { %2952 = vmatpush1.bf16.msra.mxu0 %v2951_v22  ;;  %v1001_v22 = vld [vmem:[%s4110_s5 + $0x16e0] sm:$0xff]  ;;  %v1068_v51 = vld [vmem:[%s4110_s5 + $0x18f8] sm:$0xff] }
 0x1d1   : > { %3464 = vmatpush1.bf16.msra.mxu1 %v3463_v23  ;;  %2954 = vmatprep.subr.bf16.mxu0 %v2953_v24  ;;  %v999_v23 = vld [vmem:[%s4110_s5 + $0x16d0] sm:$0xff]  ;;  %v3485_v24 = vpack.c.bf16 %v1004_v17, %v1000_v16  ;;  %v2975_v30 = vpack.c.bf16 %v1001_v22, %v997_v21  ;;  %v2993_v16 = vpack.c.bf16 %v1042_v11, %v1038_v10  ;;  %v1037_v17 = vld [vmem:[%s4110_s5 + $0x1800] sm:$0xff]  ;;  %v1046_v22 = vld [vmem:[%s4110_s5 + $0x1848] sm:$0xff] }
 0x1d2   : > { %3466 = vmatprep.subr.bf16.mxu1 %v3465_v28  ;;  %v1008_v28 = vld [vmem:[%s4110_s5 + $0x1718] sm:$0xff]  ;;  %v3487_v31 = vpack.c.bf16 %v1003_v25, %v999_v23  ;;  %v1043_v21 = vld [vmem:[%s4110_s5 + $0x1830] sm:$0xff]  ;;  %v1050_v23 = vld [vmem:[%s4110_s5 + $0x1868] sm:$0xff] }
 0x1d3   : > { %v1052_v25 = vld [vmem:[%s4110_s5 + $0x1878] sm:$0xff] }
 0x1d4   : > { %2956 = vmatpush1.bf16.msra.mxu0 %v2955_v34  ;;  %v1009_v34 = vld [vmem:[%s4110_s5 + $0x1720] sm:$0xff]  ;;  %v1072_v62 = vld [vmem:[%s4110_s5 + $0x1918] sm:$0xff] }
 0x1d5   : > { %3468 = vmatpush1.bf16.msra.mxu1 %v3467_v35  ;;  %2958 = vmatprep.subr.bf16.mxu0 %v2957_v36  ;;  %v1007_v35 = vld [vmem:[%s4110_s5 + $0x1710] sm:$0xff]  ;;  %v3489_v36 = vpack.c.bf16 %v1012_v29, %v1008_v28  ;;  %v2979_v42 = vpack.c.bf16 %v1009_v34, %v1005_v33  ;;  %v2997_v29 = vpack.c.bf16 %v1050_v23, %v1046_v22  ;;  %v1076_v63 = vld [vmem:[%s4110_s5 + $0x1938] sm:$0xff] }
 0x1d6   : > { %3470 = vmatprep.subr.bf16.mxu1 %v3469_v40  ;;  %v1016_v40 = vld [vmem:[%s4110_s5 + $0x1758] sm:$0xff]  ;;  %v3491_v43 = vpack.c.bf16 %v1011_v37, %v1007_v35  ;;  %v1051_v34 = vld [vmem:[%s4110_s5 + $0x1870] sm:$0xff]  ;;  %v1054_v35 = vld [vmem:[%s4110_s5 + $0x1888] sm:$0xff] }
 0x1d7   : > { %v1056_v37 = vld [vmem:[%s4110_s5 + $0x1898] sm:$0xff] }
 0x1d8   : > { %2960 = vmatpush1.bf16.msra.mxu0 %v2959_v46  ;;  %v1017_v46 = vld [vmem:[%s4110_s5 + $0x1760] sm:$0xff]  ;;  %v1080_v10 = vld [vmem:[%s4110_s5 + $0x1958] sm:$0xff] }
 0x1d9   : > { %3472 = vmatpush1.bf16.msra.mxu1 %v3471_v47  ;;  %2962 = vmatprep.subr.bf16.mxu0 %v2961_v48  ;;  %v1015_v47 = vld [vmem:[%s4110_s5 + $0x1750] sm:$0xff]  ;;  %v3493_v48 = vpack.c.bf16 %v1020_v41, %v1016_v40  ;;  %v2983_v54 = vpack.c.bf16 %v1017_v46, %v1013_v45  ;;  %v3513_v46 = vpack.c.bf16 %v1060_v38, %v1056_v37  ;;  %v1084_v11 = vld [vmem:[%s4110_s5 + $0x1978] sm:$0xff] }
 0x1da   : > { %3474 = vmatprep.subr.bf16.mxu1 %v3473_v52  ;;  %v1024_v52 = vld [vmem:[%s4110_s5 + $0x1798] sm:$0xff]  ;;  %v3495_v55 = vpack.c.bf16 %v1019_v49, %v1015_v47  ;;  %v1055_v45 = vld [vmem:[%s4110_s5 + $0x1890] sm:$0xff]  ;;  %v1066_v49 = vld [vmem:[%s4110_s5 + $0x18e8] sm:$0xff] }
 0x1db   : > { %v1059_v47 = vld [vmem:[%s4110_s5 + $0x18b0] sm:$0xff]  ;;  %v1088_v22 = vld [vmem:[%s4110_s5 + $0x1998] sm:$0xff] }
 0x1dc   : > { %2964 = vmatpush1.bf16.msra.mxu0 %v2963_v58  ;;  %v1025_v58 = vld [vmem:[%s4110_s5 + $0x17a0] sm:$0xff]  ;;  %v1092_v23 = vld [vmem:[%s4110_s5 + $0x19b8] sm:$0xff] }
 0x1dd   : > { %3476 = vmatpush1.bf16.msra.mxu1 %v3475_v59  ;;  %2966 = vmatprep.subr.bf16.mxu0 %v2965_v60  ;;  %v1023_v59 = vld [vmem:[%s4110_s5 + $0x1790] sm:$0xff]  ;;  %v3497_v60 = vpack.c.bf16 %v1028_v53, %v1024_v52  ;;  %v2987_v2 = vpack.c.bf16 %v1025_v58, %v1021_v57  ;;  %v3515_v53 = vpack.c.bf16 %v1059_v47, %v1055_v45  ;;  %v1106_v45 = vld [vmem:[%s4110_s5 + $0x1a28] sm:$0xff]  ;;  %v1108_v47 = vld [vmem:[%s4110_s5 + $0x1a38] sm:$0xff] }
 0x1de   : > { %3478 = vmatprep.subr.bf16.mxu1 %v3477_v0  ;;  %v1032_v0 = vld [vmem:[%s4110_s5 + $0x17d8] sm:$0xff]  ;;  %v3499_v3 = vpack.c.bf16 %v1027_v61, %v1023_v59  ;;  %v1063_v57 = vld [vmem:[%s4110_s5 + $0x18d0] sm:$0xff]  ;;  %v3517_v58 = vpack.c.bf16 %v1068_v51, %v1064_v50  ;;  %v1074_v61 = vld [vmem:[%s4110_s5 + $0x1928] sm:$0xff] }
 0x1df   : > { %v1067_v59 = vld [vmem:[%s4110_s5 + $0x18f0] sm:$0xff]  ;;  %v1101_v51 = vld [vmem:[%s4110_s5 + $0x1a00] sm:$0xff] }
 0x1e0   : > { %2968 = vmatpush1.bf16.msra.mxu0 %v2967_v6  ;;  %v1033_v6 = vld [vmem:[%s4110_s5 + $0x17e0] sm:$0xff] }
 0x1e1   : > { %3480 = vmatpush1.bf16.msra.mxu1 %v3479_v7  ;;  %2970 = vmatprep.subr.bf16.mxu0 %v2969_v8  ;;  %v1031_v7 = vld [vmem:[%s4110_s5 + $0x17d0] sm:$0xff]  ;;  %v3501_v8 = vpack.c.bf16 %v1036_v1, %v1032_v0  ;;  %v2991_v14 = vpack.c.bf16 %v1033_v6, %v1029_v5  ;;  %v3519_v1 = vpack.c.bf16 %v1067_v59, %v1063_v57  ;;  %v1114_v57 = vld [vmem:[%s4110_s5 + $0x1a68] sm:$0xff]  ;;  %v1116_v59 = vld [vmem:[%s4110_s5 + $0x1a78] sm:$0xff] }
 0x1e2   : > { %3482 = vmatprep.subr.bf16.mxu1 %v3481_v12  ;;  %v1040_v12 = vld [vmem:[%s4110_s5 + $0x1818] sm:$0xff]  ;;  %v3503_v15 = vpack.c.bf16 %v1035_v9, %v1031_v7  ;;  %v1071_v5 = vld [vmem:[%s4110_s5 + $0x1910] sm:$0xff]  ;;  %v3521_v6 = vpack.c.bf16 %v1076_v63, %v1072_v62  ;;  %v1082_v9 = vld [vmem:[%s4110_s5 + $0x1968] sm:$0xff] }
 0x1e3   : > { %v1075_v7 = vld [vmem:[%s4110_s5 + $0x1930] sm:$0xff]  ;;  %v1109_v63 = vld [vmem:[%s4110_s5 + $0x1a40] sm:$0xff] }
 0x1e4   : > { %2972 = vmatpush1.bf16.msra.mxu0 %v2971_v18  ;;  %v1041_v18 = vld [vmem:[%s4110_s5 + $0x1820] sm:$0xff] }
 0x1e5   : > { %3484 = vmatpush1.bf16.msra.mxu1 %v3483_v19  ;;  %2974 = vmatprep.subr.bf16.mxu0 %v2973_v20  ;;  %v1039_v19 = vld [vmem:[%s4110_s5 + $0x1810] sm:$0xff]  ;;  %v3505_v20 = vpack.c.bf16 %v1044_v13, %v1040_v12  ;;  %v2995_v27 = vpack.c.bf16 %v1041_v18, %v1037_v17  ;;  %v3523_v13 = vpack.c.bf16 %v1075_v7, %v1071_v5  ;;  %v1122_v5 = vld [vmem:[%s4110_s5 + $0x1aa8] sm:$0xff]  ;;  %v1124_v7 = vld [vmem:[%s4110_s5 + $0x1ab8] sm:$0xff] }
 0x1e6   : > { %3486 = vmatprep.subr.bf16.mxu1 %v3485_v24  ;;  %v1048_v24 = vld [vmem:[%s4110_s5 + $0x1858] sm:$0xff]  ;;  %v3507_v28 = vpack.c.bf16 %v1043_v21, %v1039_v19  ;;  %v1079_v17 = vld [vmem:[%s4110_s5 + $0x1950] sm:$0xff]  ;;  %v3525_v18 = vpack.c.bf16 %v1084_v11, %v1080_v10  ;;  %v1090_v21 = vld [vmem:[%s4110_s5 + $0x19a8] sm:$0xff] }
 0x1e7   : > { %v3509_v33 = vpack.c.bf16 %v1052_v25, %v1048_v24  ;;  %v1083_v19 = vld [vmem:[%s4110_s5 + $0x1970] sm:$0xff]  ;;  %v1117_v11 = vld [vmem:[%s4110_s5 + $0x1a80] sm:$0xff] }
 0x1e8   : > { %2976 = vmatpush1.bf16.msra.mxu0 %v2975_v30  ;;  %v1045_v30 = vld [vmem:[%s4110_s5 + $0x1840] sm:$0xff]  ;;  %v3527_v25 = vpack.c.bf16 %v1083_v19, %v1079_v17  ;;  %v1130_v17 = vld [vmem:[%s4110_s5 + $0x1ae8] sm:$0xff]  ;;  %v1132_v19 = vld [vmem:[%s4110_s5 + $0x1af8] sm:$0xff] }
 0x1e9   : > { %3488 = vmatpush1.bf16.msra.mxu1 %v3487_v31  ;;  %2978 = vmatprep.subr.bf16.mxu0 %v2977_v32  ;;  %v1049_v31 = vld [vmem:[%s4110_s5 + $0x1860] sm:$0xff]  ;;  %v1047_v32 = vld [vmem:[%s4110_s5 + $0x1850] sm:$0xff] }
 0x1ea   : > { %3490 = vmatprep.subr.bf16.mxu1 %v3489_v36  ;;  %v1058_v36 = vld [vmem:[%s4110_s5 + $0x18a8] sm:$0xff]  ;;  %v2999_v40 = vpack.c.bf16 %v1049_v31, %v1045_v30  ;;  %v3511_v41 = vpack.c.bf16 %v1051_v34, %v1047_v32  ;;  %v3529_v30 = vpack.c.bf16 %v1092_v23, %v1088_v22  ;;  %v1091_v31 = vld [vmem:[%s4110_s5 + $0x19b0] sm:$0xff]  ;;  %v1096_v34 = vld [vmem:[%s4110_s5 + $0x19d8] sm:$0xff] }
 0x1eb   : > { %v1094_v32 = vld [vmem:[%s4110_s5 + $0x19c8] sm:$0xff]  ;;  %v1125_v23 = vld [vmem:[%s4110_s5 + $0x1ac0] sm:$0xff] }
 0x1ec   : > { %2980 = vmatpush1.bf16.msra.mxu0 %v2979_v42  ;;  %v3001_v42 = vpack.c.bf16 %v1058_v36, %v1054_v35  ;;  %v1100_v35 = vld [vmem:[%s4110_s5 + $0x19f8] sm:$0xff] }
 0x1ed   : > { %3492 = vmatpush1.bf16.msra.mxu1 %v3491_v43  ;;  %2982 = vmatprep.subr.bf16.mxu0 %v2981_v44  ;;  %v1053_v43 = vld [vmem:[%s4110_s5 + $0x1880] sm:$0xff] }
 0x1ee   : > { %3494 = vmatprep.subr.bf16.mxu1 %v3493_v48  ;;  %v1057_v44 = vld [vmem:[%s4110_s5 + $0x18a0] sm:$0xff]  ;;  %v1062_v48 = vld [vmem:[%s4110_s5 + $0x18c8] sm:$0xff] }
 0x1ef   : > { %v3003_v52 = vpack.c.bf16 %v1057_v44, %v1053_v43  ;;  %v1099_v43 = vld [vmem:[%s4110_s5 + $0x19f0] sm:$0xff]  ;;  %v1102_v44 = vld [vmem:[%s4110_s5 + $0x1a08] sm:$0xff] }
 0x1f0   : > { %2984 = vmatpush1.bf16.msra.mxu0 %v2983_v54  ;;  %v3005_v54 = vpack.c.bf16 %v1066_v49, %v1062_v48  ;;  %v3025_v50 = vpack.c.bf16 %v1106_v45, %v1102_v44 }
 0x1f1   : > { %3496 = vmatpush1.bf16.msra.mxu1 %v3495_v55  ;;  %2986 = vmatprep.subr.bf16.mxu0 %v2985_v56  ;;  %v1061_v55 = vld [vmem:[%s4110_s5 + $0x18c0] sm:$0xff] }
 0x1f2   : > { %3498 = vmatprep.subr.bf16.mxu1 %v3497_v60  ;;  %v1065_v56 = vld [vmem:[%s4110_s5 + $0x18e0] sm:$0xff]  ;;  %v1070_v60 = vld [vmem:[%s4110_s5 + $0x1908] sm:$0xff] }
 0x1f3   : > { %v3007_v0 = vpack.c.bf16 %v1065_v56, %v1061_v55  ;;  %v1107_v55 = vld [vmem:[%s4110_s5 + $0x1a30] sm:$0xff]  ;;  %v1110_v56 = vld [vmem:[%s4110_s5 + $0x1a48] sm:$0xff] }
 0x1f4   : > { %2988 = vmatpush1.bf16.msra.mxu0 %v2987_v2  ;;  %v3009_v2 = vpack.c.bf16 %v1074_v61, %v1070_v60  ;;  %v3029_v62 = vpack.c.bf16 %v1114_v57, %v1110_v56 }
 0x1f5   : > { %3500 = vmatpush1.bf16.msra.mxu1 %v3499_v3  ;;  %2990 = vmatprep.subr.bf16.mxu0 %v2989_v4  ;;  %v1069_v3 = vld [vmem:[%s4110_s5 + $0x1900] sm:$0xff] }
 0x1f6   : > { %3502 = vmatprep.subr.bf16.mxu1 %v3501_v8  ;;  %v1073_v4 = vld [vmem:[%s4110_s5 + $0x1920] sm:$0xff]  ;;  %v1078_v8 = vld [vmem:[%s4110_s5 + $0x1948] sm:$0xff] }
 0x1f7   : > { %v3011_v12 = vpack.c.bf16 %v1073_v4, %v1069_v3  ;;  %v1115_v3 = vld [vmem:[%s4110_s5 + $0x1a70] sm:$0xff]  ;;  %v1118_v4 = vld [vmem:[%s4110_s5 + $0x1a88] sm:$0xff] }
 0x1f8   : > { %2992 = vmatpush1.bf16.msra.mxu0 %v2991_v14  ;;  %v3013_v14 = vpack.c.bf16 %v1082_v9, %v1078_v8  ;;  %v3033_v10 = vpack.c.bf16 %v1122_v5, %v1118_v4 }
 0x1f9   : > { %3504 = vmatpush1.bf16.msra.mxu1 %v3503_v15  ;;  %2994 = vmatprep.subr.bf16.mxu0 %v2993_v16  ;;  %v1077_v15 = vld [vmem:[%s4110_s5 + $0x1940] sm:$0xff] }
 0x1fa   : > { %3506 = vmatprep.subr.bf16.mxu1 %v3505_v20  ;;  %v1081_v16 = vld [vmem:[%s4110_s5 + $0x1960] sm:$0xff]  ;;  %v1086_v20 = vld [vmem:[%s4110_s5 + $0x1988] sm:$0xff] }
 0x1fb   : > { %1713 = vmatmul.mubr.f32.vlgmr.msra.gmra.mrb[0].mxu0 %v259_v26  ;;  %v3015_v24 = vpack.c.bf16 %v1081_v16, %v1077_v15  ;;  %v1123_v15 = vld [vmem:[%s4110_s5 + $0x1ab0] sm:$0xff]  ;;  %v1126_v16 = vld [vmem:[%s4110_s5 + $0x1ac8] sm:$0xff] }
 0x1fc   : > { %2996 = vmatpush1.bf16.msra.mxu0 %v2995_v27  ;;  %2281 = vmatmul.mubr.f32.vlgmr.msra.gmra.mrb[0].mxu1 %v259_v26  ;;  %v3017_v26 = vpack.c.bf16 %v1090_v21, %v1086_v20  ;;  %v1085_v27 = vld [vmem:[%s4110_s5 + $0x1980] sm:$0xff]  ;;  %v3037_v22 = vpack.c.bf16 %v1130_v17, %v1126_v16 }
 0x1fd   : > { %3508 = vmatpush1.bf16.msra.mxu1 %v3507_v28  ;;  %2998 = vmatprep.subr.bf16.mxu0 %v2997_v29  ;;  %v1089_v28 = vld [vmem:[%s4110_s5 + $0x19a0] sm:$0xff]  ;;  %v1087_v29 = vld [vmem:[%s4110_s5 + $0x1990] sm:$0xff] }
 0x1fe   : > { %3510 = vmatprep.subr.bf16.mxu1 %v3509_v33  ;;  %1783 = vmatprep.mubr.f32.mxu0 %v262_v39  ;;  %v1098_v33 = vld [vmem:[%s4110_s5 + $0x19e8] sm:$0xff]  ;;  %v3019_v36 = vpack.c.bf16 %v1089_v28, %v1085_v27  ;;  %v3531_v37 = vpack.c.bf16 %v1091_v31, %v1087_v29  ;;  %v1131_v27 = vld [vmem:[%s4110_s5 + $0x1af0] sm:$0xff]  ;;  %v1140_v31 = vld [vmem:[%s4110_s5 + $0x1b38] sm:$0xff] }
 0x1ff   : > { %2351 = vmatprep.mubr.f32.mxu1 %v262_v39  ;;  %v3021_v38 = vpack.c.bf16 %v1098_v33, %v1094_v32  ;;  %v1093_v39 = vld [vmem:[%s4110_s5 + $0x19c0] sm:$0xff]  ;;  %v1134_v28 = vld [vmem:[%s4110_s5 + $0x1b08] sm:$0xff] }
 0x200   : > { %3000 = vmatpush1.bf16.msra.mxu0 %v2999_v40  ;;  %v1097_v40 = vld [vmem:[%s4110_s5 + $0x19e0] sm:$0xff]  ;;  %v1138_v29 = vld [vmem:[%s4110_s5 + $0x1b28] sm:$0xff] }
 0x201   : > { %3512 = vmatpush1.bf16.msra.mxu1 %v3511_v41  ;;  %3002 = vmatprep.subr.bf16.mxu0 %v3001_v42  ;;  %v1095_v41 = vld [vmem:[%s4110_s5 + $0x19d0] sm:$0xff]  ;;  %v3533_v42 = vpack.c.bf16 %v1100_v35, %v1096_v34  ;;  %v3023_v48 = vpack.c.bf16 %v1097_v40, %v1093_v39  ;;  %v3041_v34 = vpack.c.bf16 %v1138_v29, %v1134_v28  ;;  %v1133_v35 = vld [vmem:[%s4110_s5 + $0x1b00] sm:$0xff]  ;;  %v1142_v40 = vld [vmem:[%s4110_s5 + $0x1b48] sm:$0xff] }
 0x202   : > { %3514 = vmatprep.subr.bf16.mxu1 %v3513_v46  ;;  %v1104_v46 = vld [vmem:[%s4110_s5 + $0x1a18] sm:$0xff]  ;;  %v3535_v49 = vpack.c.bf16 %v1099_v43, %v1095_v41  ;;  %v1139_v39 = vld [vmem:[%s4110_s5 + $0x1b30] sm:$0xff]  ;;  %v1146_v41 = vld [vmem:[%s4110_s5 + $0x1b68] sm:$0xff] }
 0x203   : > { %v1148_v43 = vld [vmem:[%s4110_s5 + $0x1b78] sm:$0xff]  ;;  %v261_v28 = vld [vmem:[%s4223_s12 + $0x60] sm:$0xff] }
 0x204   : > { %3004 = vmatpush1.bf16.msra.mxu0 %v3003_v52  ;;  %v1105_v52 = vld [vmem:[%s4110_s5 + $0x1a20] sm:$0xff] }
 0x205   : > { %3516 = vmatpush1.bf16.msra.mxu1 %v3515_v53  ;;  %3006 = vmatprep.subr.bf16.mxu0 %v3005_v54  ;;  %v1103_v53 = vld [vmem:[%s4110_s5 + $0x1a10] sm:$0xff]  ;;  %v3537_v54 = vpack.c.bf16 %v1108_v47, %v1104_v46  ;;  %v3027_v60 = vpack.c.bf16 %v1105_v52, %v1101_v51  ;;  %v3045_v46 = vpack.c.bf16 %v1146_v41, %v1142_v40  ;;  %v1141_v47 = vld [vmem:[%s4110_s5 + $0x1b40] sm:$0xff]  ;;  %v1150_v52 = vld [vmem:[%s4110_s5 + $0x1b88] sm:$0xff] }
 0x206   : > { %3518 = vmatprep.subr.bf16.mxu1 %v3517_v58  ;;  %v1112_v58 = vld [vmem:[%s4110_s5 + $0x1a58] sm:$0xff]  ;;  %v3539_v61 = vpack.c.bf16 %v1107_v55, %v1103_v53  ;;  %v1147_v51 = vld [vmem:[%s4110_s5 + $0x1b70] sm:$0xff]  ;;  %v1154_v53 = vld [vmem:[%s4110_s5 + $0x1ba8] sm:$0xff] }
 0x207   : > { %v1156_v55 = vld [vmem:[%s4110_s5 + $0x1bb8] sm:$0xff] }
 0x208   : > { %3008 = vmatpush1.bf16.msra.mxu0 %v3007_v0  ;;  %v1113_v0 = vld [vmem:[%s4110_s5 + $0x1a60] sm:$0xff]  ;;  %v1188_v40 = vld [vmem:[%s4110_s5 + $0x1cb8] sm:$0xff] }
 0x209   : > { %3520 = vmatpush1.bf16.msra.mxu1 %v3519_v1  ;;  %3010 = vmatprep.subr.bf16.mxu0 %v3009_v2  ;;  %v1111_v1 = vld [vmem:[%s4110_s5 + $0x1a50] sm:$0xff]  ;;  %v3541_v2 = vpack.c.bf16 %v1116_v59, %v1112_v58  ;;  %v3031_v8 = vpack.c.bf16 %v1113_v0, %v1109_v63  ;;  %v3049_v58 = vpack.c.bf16 %v1154_v53, %v1150_v52  ;;  %v1149_v59 = vld [vmem:[%s4110_s5 + $0x1b80] sm:$0xff]  ;;  %v1158_v0 = vld [vmem:[%s4110_s5 + $0x1bc8] sm:$0xff] }
 0x20a   : > { %3522 = vmatprep.subr.bf16.mxu1 %v3521_v6  ;;  %v1120_v6 = vld [vmem:[%s4110_s5 + $0x1a98] sm:$0xff]  ;;  %v3543_v9 = vpack.c.bf16 %v1115_v3, %v1111_v1  ;;  %v1155_v63 = vld [vmem:[%s4110_s5 + $0x1bb0] sm:$0xff]  ;;  %v1162_v1 = vld [vmem:[%s4110_s5 + $0x1be8] sm:$0xff] }
 0x20b   : > { %v1164_v3 = vld [vmem:[%s4110_s5 + $0x1bf8] sm:$0xff] }
 0x20c   : > { %3012 = vmatpush1.bf16.msra.mxu0 %v3011_v12  ;;  %v1121_v12 = vld [vmem:[%s4110_s5 + $0x1aa0] sm:$0xff]  ;;  %v264_v41 = vld [vmem:[%s4223_s12 + $0x78] sm:$0xff] }
 0x20d   : > { %3524 = vmatpush1.bf16.msra.mxu1 %v3523_v13  ;;  %3014 = vmatprep.subr.bf16.mxu0 %v3013_v14  ;;  %v1119_v13 = vld [vmem:[%s4110_s5 + $0x1a90] sm:$0xff]  ;;  %v3545_v14 = vpack.c.bf16 %v1124_v7, %v1120_v6  ;;  %v3035_v20 = vpack.c.bf16 %v1121_v12, %v1117_v11  ;;  %v3053_v6 = vpack.c.bf16 %v1162_v1, %v1158_v0  ;;  %v1157_v7 = vld [vmem:[%s4110_s5 + $0x1bc0] sm:$0xff]  ;;  %v1166_v12 = vld [vmem:[%s4110_s5 + $0x1c08] sm:$0xff] }
 0x20e   : > { %3526 = vmatprep.subr.bf16.mxu1 %v3525_v18  ;;  %v1128_v18 = vld [vmem:[%s4110_s5 + $0x1ad8] sm:$0xff]  ;;  %v3547_v21 = vpack.c.bf16 %v1123_v15, %v1119_v13  ;;  %v1163_v11 = vld [vmem:[%s4110_s5 + $0x1bf0] sm:$0xff]  ;;  %v1170_v13 = vld [vmem:[%s4110_s5 + $0x1c28] sm:$0xff] }
 0x20f   : > { %v1172_v15 = vld [vmem:[%s4110_s5 + $0x1c38] sm:$0xff] }
 0x210   : > { %3016 = vmatpush1.bf16.msra.mxu0 %v3015_v24  ;;  %v1129_v24 = vld [vmem:[%s4110_s5 + $0x1ae0] sm:$0xff]  ;;  %v1192_v52 = vld [vmem:[%s4110_s5 + $0x1cd8] sm:$0xff] }
 0x211   : > { %3528 = vmatpush1.bf16.msra.mxu1 %v3527_v25  ;;  %3018 = vmatprep.subr.bf16.mxu0 %v3017_v26  ;;  %v1127_v25 = vld [vmem:[%s4110_s5 + $0x1ad0] sm:$0xff]  ;;  %v3549_v26 = vpack.c.bf16 %v1132_v19, %v1128_v18  ;;  %v3039_v32 = vpack.c.bf16 %v1129_v24, %v1125_v23  ;;  %v3057_v18 = vpack.c.bf16 %v1170_v13, %v1166_v12  ;;  %v1165_v19 = vld [vmem:[%s4110_s5 + $0x1c00] sm:$0xff]  ;;  %v1174_v24 = vld [vmem:[%s4110_s5 + $0x1c48] sm:$0xff] }
 0x212   : > { %3530 = vmatprep.subr.bf16.mxu1 %v3529_v30  ;;  %v1136_v30 = vld [vmem:[%s4110_s5 + $0x1b18] sm:$0xff]  ;;  %v3551_v33 = vpack.c.bf16 %v1131_v27, %v1127_v25  ;;  %v1171_v23 = vld [vmem:[%s4110_s5 + $0x1c30] sm:$0xff]  ;;  %v1178_v25 = vld [vmem:[%s4110_s5 + $0x1c68] sm:$0xff] }
 0x213   : > { %v1180_v27 = vld [vmem:[%s4110_s5 + $0x1c78] sm:$0xff] }
 0x214   : > { %3020 = vmatpush1.bf16.msra.mxu0 %v3019_v36  ;;  %v1137_v36 = vld [vmem:[%s4110_s5 + $0x1b20] sm:$0xff]  ;;  %v1196_v53 = vld [vmem:[%s4110_s5 + $0x1cf8] sm:$0xff] }
 0x215   : > { %3532 = vmatpush1.bf16.msra.mxu1 %v3531_v37  ;;  %3022 = vmatprep.subr.bf16.mxu0 %v3021_v38  ;;  %v1135_v37 = vld [vmem:[%s4110_s5 + $0x1b10] sm:$0xff]  ;;  %v3553_v38 = vpack.c.bf16 %v1140_v31, %v1136_v30  ;;  %v3043_v44 = vpack.c.bf16 %v1137_v36, %v1133_v35  ;;  %v3061_v31 = vpack.c.bf16 %v1178_v25, %v1174_v24  ;;  %v1200_v0 = vld [vmem:[%s4110_s5 + $0x1d18] sm:$0xff] }
 0x216   : > { %3534 = vmatprep.subr.bf16.mxu1 %v3533_v42  ;;  %v1144_v42 = vld [vmem:[%s4110_s5 + $0x1b58] sm:$0xff]  ;;  %v3555_v45 = vpack.c.bf16 %v1139_v39, %v1135_v37  ;;  %v1179_v36 = vld [vmem:[%s4110_s5 + $0x1c70] sm:$0xff]  ;;  %v1182_v37 = vld [vmem:[%s4110_s5 + $0x1c88] sm:$0xff] }
 0x217   : > { %v1184_v39 = vld [vmem:[%s4110_s5 + $0x1c98] sm:$0xff] }
 0x218   : > { %3024 = vmatpush1.bf16.msra.mxu0 %v3023_v48  ;;  %v1145_v48 = vld [vmem:[%s4110_s5 + $0x1b60] sm:$0xff]  ;;  %v1204_v1 = vld [vmem:[%s4110_s5 + $0x1d38] sm:$0xff] }
 0x219   : > { %3536 = vmatpush1.bf16.msra.mxu1 %v3535_v49  ;;  %3026 = vmatprep.subr.bf16.mxu0 %v3025_v50  ;;  %v1143_v49 = vld [vmem:[%s4110_s5 + $0x1b50] sm:$0xff]  ;;  %v3557_v50 = vpack.c.bf16 %v1148_v43, %v1144_v42  ;;  %v3047_v56 = vpack.c.bf16 %v1145_v48, %v1141_v47  ;;  %v3577_v48 = vpack.c.bf16 %v1188_v40, %v1184_v39  ;;  %v1208_v12 = vld [vmem:[%s4110_s5 + $0x1d58] sm:$0xff] }
 0x21a   : > { %3538 = vmatprep.subr.bf16.mxu1 %v3537_v54  ;;  %v1152_v54 = vld [vmem:[%s4110_s5 + $0x1b98] sm:$0xff]  ;;  %v3559_v57 = vpack.c.bf16 %v1147_v51, %v1143_v49  ;;  %v1183_v47 = vld [vmem:[%s4110_s5 + $0x1c90] sm:$0xff]  ;;  %v1194_v51 = vld [vmem:[%s4110_s5 + $0x1ce8] sm:$0xff] }
 0x21b   : > { %v1187_v49 = vld [vmem:[%s4110_s5 + $0x1cb0] sm:$0xff]  ;;  %v1212_v13 = vld [vmem:[%s4110_s5 + $0x1d78] sm:$0xff] }
 0x21c   : > { %3028 = vmatpush1.bf16.msra.mxu0 %v3027_v60  ;;  %v1153_v60 = vld [vmem:[%s4110_s5 + $0x1ba0] sm:$0xff]  ;;  %v1216_v24 = vld [vmem:[%s4110_s5 + $0x1d98] sm:$0xff] }
 0x21d   : > { %3540 = vmatpush1.bf16.msra.mxu1 %v3539_v61  ;;  %3030 = vmatprep.subr.bf16.mxu0 %v3029_v62  ;;  %v1151_v61 = vld [vmem:[%s4110_s5 + $0x1b90] sm:$0xff]  ;;  %v3561_v62 = vpack.c.bf16 %v1156_v55, %v1152_v54  ;;  %v3051_v4 = vpack.c.bf16 %v1153_v60, %v1149_v59  ;;  %v3579_v55 = vpack.c.bf16 %v1187_v49, %v1183_v47  ;;  %v1220_v25 = vld [vmem:[%s4110_s5 + $0x1db8] sm:$0xff]  ;;  %v1234_v47 = vld [vmem:[%s4110_s5 + $0x1e28] sm:$0xff] }
 0x21e   : > { %3542 = vmatprep.subr.bf16.mxu1 %v3541_v2  ;;  %v1160_v2 = vld [vmem:[%s4110_s5 + $0x1bd8] sm:$0xff]  ;;  %v3563_v5 = vpack.c.bf16 %v1155_v63, %v1151_v61  ;;  %v1191_v59 = vld [vmem:[%s4110_s5 + $0x1cd0] sm:$0xff]  ;;  %v3581_v60 = vpack.c.bf16 %v1196_v53, %v1192_v52  ;;  %v1202_v63 = vld [vmem:[%s4110_s5 + $0x1d28] sm:$0xff] }
 0x21f   : > { %v1195_v61 = vld [vmem:[%s4110_s5 + $0x1cf0] sm:$0xff]  ;;  %v1236_v49 = vld [vmem:[%s4110_s5 + $0x1e38] sm:$0xff]  ;;  %v1229_v53 = vld [vmem:[%s4110_s5 + $0x1e00] sm:$0xff] }
 0x220   : > { %3032 = vmatpush1.bf16.msra.mxu0 %v3031_v8  ;;  %v1161_v8 = vld [vmem:[%s4110_s5 + $0x1be0] sm:$0xff] }
 0x221   : > { %3544 = vmatpush1.bf16.msra.mxu1 %v3543_v9  ;;  %3034 = vmatprep.subr.bf16.mxu0 %v3033_v10  ;;  %v1159_v9 = vld [vmem:[%s4110_s5 + $0x1bd0] sm:$0xff]  ;;  %v3565_v10 = vpack.c.bf16 %v1164_v3, %v1160_v2  ;;  %v3055_v16 = vpack.c.bf16 %v1161_v8, %v1157_v7  ;;  %v3583_v3 = vpack.c.bf16 %v1195_v61, %v1191_v59  ;;  %v1242_v59 = vld [vmem:[%s4110_s5 + $0x1e68] sm:$0xff]  ;;  %v1244_v61 = vld [vmem:[%s4110_s5 + $0x1e78] sm:$0xff] }
 0x222   : > { %3546 = vmatprep.subr.bf16.mxu1 %v3545_v14  ;;  %v1168_v14 = vld [vmem:[%s4110_s5 + $0x1c18] sm:$0xff]  ;;  %v3567_v17 = vpack.c.bf16 %v1163_v11, %v1159_v9  ;;  %v1199_v7 = vld [vmem:[%s4110_s5 + $0x1d10] sm:$0xff]  ;;  %v3585_v8 = vpack.c.bf16 %v1204_v1, %v1200_v0  ;;  %v1210_v11 = vld [vmem:[%s4110_s5 + $0x1d68] sm:$0xff] }
 0x223   : > { %v1203_v9 = vld [vmem:[%s4110_s5 + $0x1d30] sm:$0xff]  ;;  %v1237_v1 = vld [vmem:[%s4110_s5 + $0x1e40] sm:$0xff] }
 0x224   : > { %3036 = vmatpush1.bf16.msra.mxu0 %v3035_v20  ;;  %v1169_v20 = vld [vmem:[%s4110_s5 + $0x1c20] sm:$0xff] }
 0x225   : > { %3548 = vmatpush1.bf16.msra.mxu1 %v3547_v21  ;;  %3038 = vmatprep.subr.bf16.mxu0 %v3037_v22  ;;  %v1167_v21 = vld [vmem:[%s4110_s5 + $0x1c10] sm:$0xff]  ;;  %v3569_v22 = vpack.c.bf16 %v1172_v15, %v1168_v14  ;;  %v3059_v29 = vpack.c.bf16 %v1169_v20, %v1165_v19  ;;  %v3587_v15 = vpack.c.bf16 %v1203_v9, %v1199_v7  ;;  %v1250_v7 = vld [vmem:[%s4110_s5 + $0x1ea8] sm:$0xff]  ;;  %v1252_v9 = vld [vmem:[%s4110_s5 + $0x1eb8] sm:$0xff] }
 0x226   : > { %3550 = vmatprep.subr.bf16.mxu1 %v3549_v26  ;;  %v1176_v26 = vld [vmem:[%s4110_s5 + $0x1c58] sm:$0xff]  ;;  %v3571_v30 = vpack.c.bf16 %v1171_v23, %v1167_v21  ;;  %v1207_v19 = vld [vmem:[%s4110_s5 + $0x1d50] sm:$0xff]  ;;  %v3589_v20 = vpack.c.bf16 %v1212_v13, %v1208_v12  ;;  %v1218_v23 = vld [vmem:[%s4110_s5 + $0x1da8] sm:$0xff] }
 0x227   : > { %v3573_v35 = vpack.c.bf16 %v1180_v27, %v1176_v26  ;;  %v1211_v21 = vld [vmem:[%s4110_s5 + $0x1d70] sm:$0xff]  ;;  %v1245_v13 = vld [vmem:[%s4110_s5 + $0x1e80] sm:$0xff] }
 0x228   : > { %3040 = vmatpush1.bf16.msra.mxu0 %v3039_v32  ;;  %v1173_v32 = vld [vmem:[%s4110_s5 + $0x1c40] sm:$0xff]  ;;  %v3591_v27 = vpack.c.bf16 %v1211_v21, %v1207_v19  ;;  %v1258_v19 = vld [vmem:[%s4110_s5 + $0x1ee8] sm:$0xff]  ;;  %v1260_v21 = vld [vmem:[%s4110_s5 + $0x1ef8] sm:$0xff] }
 0x229   : > { %3552 = vmatpush1.bf16.msra.mxu1 %v3551_v33  ;;  %3042 = vmatprep.subr.bf16.mxu0 %v3041_v34  ;;  %v1177_v33 = vld [vmem:[%s4110_s5 + $0x1c60] sm:$0xff]  ;;  %v1175_v34 = vld [vmem:[%s4110_s5 + $0x1c50] sm:$0xff] }
 0x22a   : > { %3554 = vmatprep.subr.bf16.mxu1 %v3553_v38  ;;  %v1186_v38 = vld [vmem:[%s4110_s5 + $0x1ca8] sm:$0xff]  ;;  %v3063_v42 = vpack.c.bf16 %v1177_v33, %v1173_v32  ;;  %v3575_v43 = vpack.c.bf16 %v1179_v36, %v1175_v34  ;;  %v3593_v32 = vpack.c.bf16 %v1220_v25, %v1216_v24  ;;  %v1219_v33 = vld [vmem:[%s4110_s5 + $0x1db0] sm:$0xff]  ;;  %v1224_v36 = vld [vmem:[%s4110_s5 + $0x1dd8] sm:$0xff] }
 0x22b   : > { %v1222_v34 = vld [vmem:[%s4110_s5 + $0x1dc8] sm:$0xff]  ;;  %v1253_v25 = vld [vmem:[%s4110_s5 + $0x1ec0] sm:$0xff] }
 0x22c   : > { %3044 = vmatpush1.bf16.msra.mxu0 %v3043_v44  ;;  %v3065_v44 = vpack.c.bf16 %v1186_v38, %v1182_v37  ;;  %v1228_v37 = vld [vmem:[%s4110_s5 + $0x1df8] sm:$0xff] }
 0x22d   : > { %3556 = vmatpush1.bf16.msra.mxu1 %v3555_v45  ;;  %3046 = vmatprep.subr.bf16.mxu0 %v3045_v46  ;;  %v1181_v45 = vld [vmem:[%s4110_s5 + $0x1c80] sm:$0xff] }
 0x22e   : > { %3558 = vmatprep.subr.bf16.mxu1 %v3557_v50  ;;  %v1185_v46 = vld [vmem:[%s4110_s5 + $0x1ca0] sm:$0xff]  ;;  %v1190_v50 = vld [vmem:[%s4110_s5 + $0x1cc8] sm:$0xff] }
 0x22f   : > { %v3067_v54 = vpack.c.bf16 %v1185_v46, %v1181_v45  ;;  %v1227_v45 = vld [vmem:[%s4110_s5 + $0x1df0] sm:$0xff]  ;;  %v1230_v46 = vld [vmem:[%s4110_s5 + $0x1e08] sm:$0xff] }
 0x230   : > { %3048 = vmatpush1.bf16.msra.mxu0 %v3047_v56  ;;  %v3069_v56 = vpack.c.bf16 %v1194_v51, %v1190_v50  ;;  %v3089_v52 = vpack.c.bf16 %v1234_v47, %v1230_v46 }
 0x231   : > { %3560 = vmatpush1.bf16.msra.mxu1 %v3559_v57  ;;  %3050 = vmatprep.subr.bf16.mxu0 %v3049_v58  ;;  %v1189_v57 = vld [vmem:[%s4110_s5 + $0x1cc0] sm:$0xff] }
 0x232   : > { %3562 = vmatprep.subr.bf16.mxu1 %v3561_v62  ;;  %v1193_v58 = vld [vmem:[%s4110_s5 + $0x1ce0] sm:$0xff]  ;;  %v1198_v62 = vld [vmem:[%s4110_s5 + $0x1d08] sm:$0xff] }
 0x233   : > { %v3071_v2 = vpack.c.bf16 %v1193_v58, %v1189_v57  ;;  %v1235_v57 = vld [vmem:[%s4110_s5 + $0x1e30] sm:$0xff]  ;;  %v1238_v58 = vld [vmem:[%s4110_s5 + $0x1e48] sm:$0xff] }
 0x234   : > { %3052 = vmatpush1.bf16.msra.mxu0 %v3051_v4  ;;  %v3073_v4 = vpack.c.bf16 %v1202_v63, %v1198_v62  ;;  %v3093_v0 = vpack.c.bf16 %v1242_v59, %v1238_v58 }
 0x235   : > { %3564 = vmatpush1.bf16.msra.mxu1 %v3563_v5  ;;  %3054 = vmatprep.subr.bf16.mxu0 %v3053_v6  ;;  %v1197_v5 = vld [vmem:[%s4110_s5 + $0x1d00] sm:$0xff] }
 0x236   : > { %3566 = vmatprep.subr.bf16.mxu1 %v3565_v10  ;;  %v1201_v6 = vld [vmem:[%s4110_s5 + $0x1d20] sm:$0xff]  ;;  %v1206_v10 = vld [vmem:[%s4110_s5 + $0x1d48] sm:$0xff] }
 0x237   : > { %v3075_v14 = vpack.c.bf16 %v1201_v6, %v1197_v5  ;;  %v1243_v5 = vld [vmem:[%s4110_s5 + $0x1e70] sm:$0xff]  ;;  %v1246_v6 = vld [vmem:[%s4110_s5 + $0x1e88] sm:$0xff] }
 0x238   : > { %3056 = vmatpush1.bf16.msra.mxu0 %v3055_v16  ;;  %v3077_v16 = vpack.c.bf16 %v1210_v11, %v1206_v10  ;;  %v3097_v12 = vpack.c.bf16 %v1250_v7, %v1246_v6 }
 0x239   : > { %3568 = vmatpush1.bf16.msra.mxu1 %v3567_v17  ;;  %3058 = vmatprep.subr.bf16.mxu0 %v3057_v18  ;;  %v1205_v17 = vld [vmem:[%s4110_s5 + $0x1d40] sm:$0xff] }
 0x23a   : > { %3570 = vmatprep.subr.bf16.mxu1 %v3569_v22  ;;  %v1209_v18 = vld [vmem:[%s4110_s5 + $0x1d60] sm:$0xff]  ;;  %v1214_v22 = vld [vmem:[%s4110_s5 + $0x1d88] sm:$0xff] }
 0x23b   : > { %1784 = vmatmul.mubr.f32.vlgmr.msra.gmra.mrb[0].mxu0 %v261_v28  ;;  %v3079_v26 = vpack.c.bf16 %v1209_v18, %v1205_v17  ;;  %v1251_v17 = vld [vmem:[%s4110_s5 + $0x1eb0] sm:$0xff]  ;;  %v1254_v18 = vld [vmem:[%s4110_s5 + $0x1ec8] sm:$0xff] }
 0x23c   : > { %3060 = vmatpush1.bf16.msra.mxu0 %v3059_v29  ;;  %2352 = vmatmul.mubr.f32.vlgmr.msra.gmra.mrb[0].mxu1 %v261_v28  ;;  %v3081_v28 = vpack.c.bf16 %v1218_v23, %v1214_v22  ;;  %v1213_v29 = vld [vmem:[%s4110_s5 + $0x1d80] sm:$0xff]  ;;  %v3101_v24 = vpack.c.bf16 %v1258_v19, %v1254_v18  ;;  %v267_v18 = vld [vmem:[#allocation8 + $0x10] sm:$0xff]  ;;  %v266_v19 = vld [vmem:[#allocation8 + $0x8] sm:$0xff] }
 0x23d   : > { %3572 = vmatpush1.bf16.msra.mxu1 %v3571_v30  ;;  %3062 = vmatprep.subr.bf16.mxu0 %v3061_v31  ;;  %v1217_v30 = vld [vmem:[%s4110_s5 + $0x1da0] sm:$0xff]  ;;  %v1215_v31 = vld [vmem:[%s4110_s5 + $0x1d90] sm:$0xff] }
 0x23e   : > { %3574 = vmatprep.subr.bf16.mxu1 %v3573_v35  ;;  %1854 = vmatprep.mubr.f32.mxu0 %v264_v41  ;;  %v1226_v35 = vld [vmem:[%s4110_s5 + $0x1de8] sm:$0xff]  ;;  %v3083_v38 = vpack.c.bf16 %v1217_v30, %v1213_v29  ;;  %v3595_v39 = vpack.c.bf16 %v1219_v33, %v1215_v31  ;;  %v1259_v29 = vld [vmem:[%s4110_s5 + $0x1ef0] sm:$0xff]  ;;  %v1268_v33 = vld [vmem:[%s4110_s5 + $0x1f38] sm:$0xff] }
 0x23f   : > { %2422 = vmatprep.mubr.f32.mxu1 %v264_v41  ;;  %v3085_v40 = vpack.c.bf16 %v1226_v35, %v1222_v34  ;;  %v1221_v41 = vld [vmem:[%s4110_s5 + $0x1dc0] sm:$0xff]  ;;  %v1262_v30 = vld [vmem:[%s4110_s5 + $0x1f08] sm:$0xff] }
 0x240   : > { %3064 = vmatpush1.bf16.msra.mxu0 %v3063_v42  ;;  %v1225_v42 = vld [vmem:[%s4110_s5 + $0x1de0] sm:$0xff]  ;;  %v1266_v31 = vld [vmem:[%s4110_s5 + $0x1f28] sm:$0xff] }
 0x241   : > { %3576 = vmatpush1.bf16.msra.mxu1 %v3575_v43  ;;  %3066 = vmatprep.subr.bf16.mxu0 %v3065_v44  ;;  %v1223_v43 = vld [vmem:[%s4110_s5 + $0x1dd0] sm:$0xff]  ;;  %v3597_v44 = vpack.c.bf16 %v1228_v37, %v1224_v36  ;;  %v3087_v50 = vpack.c.bf16 %v1225_v42, %v1221_v41  ;;  %v3105_v36 = vpack.c.bf16 %v1266_v31, %v1262_v30  ;;  %v1261_v37 = vld [vmem:[%s4110_s5 + $0x1f00] sm:$0xff]  ;;  %v1270_v42 = vld [vmem:[%s4110_s5 + $0x1f48] sm:$0xff] }
 0x242   : > { %3578 = vmatprep.subr.bf16.mxu1 %v3577_v48  ;;  %v1232_v48 = vld [vmem:[%s4110_s5 + $0x1e18] sm:$0xff]  ;;  %v3599_v51 = vpack.c.bf16 %v1227_v45, %v1223_v43  ;;  %v1267_v41 = vld [vmem:[%s4110_s5 + $0x1f30] sm:$0xff]  ;;  %v1274_v43 = vld [vmem:[%s4110_s5 + $0x1f68] sm:$0xff] }
 0x243   : > { %v1276_v45 = vld [vmem:[%s4110_s5 + $0x1f78] sm:$0xff]  ;;  %v2445_v31 = vld [vmem:[#allocation7] sm:$0xf] (!%p2602_p10) }
 0x244   : > { %3068 = vmatpush1.bf16.msra.mxu0 %v3067_v54  ;;  %v1233_v54 = vld [vmem:[%s4110_s5 + $0x1e20] sm:$0xff] }
 0x245   : > { %3580 = vmatpush1.bf16.msra.mxu1 %v3579_v55  ;;  %3070 = vmatprep.subr.bf16.mxu0 %v3069_v56  ;;  %v1231_v55 = vld [vmem:[%s4110_s5 + $0x1e10] sm:$0xff]  ;;  %v3601_v56 = vpack.c.bf16 %v1236_v49, %v1232_v48  ;;  %v3091_v62 = vpack.c.bf16 %v1233_v54, %v1229_v53  ;;  %v3109_v48 = vpack.c.bf16 %v1274_v43, %v1270_v42  ;;  %v1269_v49 = vld [vmem:[%s4110_s5 + $0x1f40] sm:$0xff]  ;;  %v1278_v54 = vld [vmem:[%s4110_s5 + $0x1f88] sm:$0xff] }
 0x246   : > { %3582 = vmatprep.subr.bf16.mxu1 %v3581_v60  ;;  %v1240_v60 = vld [vmem:[%s4110_s5 + $0x1e58] sm:$0xff]  ;;  %v3603_v63 = vpack.c.bf16 %v1235_v57, %v1231_v55  ;;  %v1275_v53 = vld [vmem:[%s4110_s5 + $0x1f70] sm:$0xff]  ;;  %v1282_v55 = vld [vmem:[%s4110_s5 + $0x1fa8] sm:$0xff] }
 0x247   : > { %v1284_v57 = vld [vmem:[%s4110_s5 + $0x1fb8] sm:$0xff] }
 0x248   : > { %3072 = vmatpush1.bf16.msra.mxu0 %v3071_v2  ;;  %v1241_v2 = vld [vmem:[%s4110_s5 + $0x1e60] sm:$0xff] }
 0x249   : > { %3584 = vmatpush1.bf16.msra.mxu1 %v3583_v3  ;;  %3074 = vmatprep.subr.bf16.mxu0 %v3073_v4  ;;  %v1239_v3 = vld [vmem:[%s4110_s5 + $0x1e50] sm:$0xff]  ;;  %v3605_v4 = vpack.c.bf16 %v1244_v61, %v1240_v60  ;;  %v3095_v10 = vpack.c.bf16 %v1241_v2, %v1237_v1  ;;  %v3113_v60 = vpack.c.bf16 %v1282_v55, %v1278_v54  ;;  %v1277_v61 = vld [vmem:[%s4110_s5 + $0x1f80] sm:$0xff]  ;;  %v1286_v2 = vld [vmem:[%s4110_s5 + $0x1fc8] sm:$0xff] }
 0x24a   : > { %3586 = vmatprep.subr.bf16.mxu1 %v3585_v8  ;;  %v1248_v8 = vld [vmem:[%s4110_s5 + $0x1e98] sm:$0xff]  ;;  %v3607_v11 = vpack.c.bf16 %v1243_v5, %v1239_v3  ;;  %v1283_v1 = vld [vmem:[%s4110_s5 + $0x1fb0] sm:$0xff]  ;;  %v1290_v3 = vld [vmem:[%s4110_s5 + $0x1fe8] sm:$0xff] }
 0x24b   : > { %v1292_v5 = vld [vmem:[%s4110_s5 + $0x1ff8] sm:$0xff] }
 0x24c   : > { %3076 = vmatpush1.bf16.msra.mxu0 %v3075_v14  ;;  %v1249_v14 = vld [vmem:[%s4110_s5 + $0x1ea0] sm:$0xff] }
 0x24d   : > { %3588 = vmatpush1.bf16.msra.mxu1 %v3587_v15  ;;  %3078 = vmatprep.subr.bf16.mxu0 %v3077_v16  ;;  %v1247_v15 = vld [vmem:[%s4110_s5 + $0x1e90] sm:$0xff]  ;;  %v3609_v16 = vpack.c.bf16 %v1252_v9, %v1248_v8  ;;  %v3099_v22 = vpack.c.bf16 %v1249_v14, %v1245_v13  ;;  %v3117_v8 = vpack.c.bf16 %v1290_v3, %v1286_v2  ;;  %v1285_v9 = vld [vmem:[%s4110_s5 + $0x1fc0] sm:$0xff] }
 0x24e   : > { %3590 = vmatprep.subr.bf16.mxu1 %v3589_v20  ;;  %v1256_v20 = vld [vmem:[%s4110_s5 + $0x1ed8] sm:$0xff]  ;;  %v3611_v23 = vpack.c.bf16 %v1251_v17, %v1247_v15  ;;  %v1291_v13 = vld [vmem:[%s4110_s5 + $0x1ff0] sm:$0xff]  ;;  %v265_v17 = vld [vmem:[#allocation8] sm:$0xff] }
 0x250   : > { %3080 = vmatpush1.bf16.msra.mxu0 %v3079_v26  ;;  %v1257_v26 = vld [vmem:[%s4110_s5 + $0x1ee0] sm:$0xff] }
 0x251   : > { %3592 = vmatpush1.bf16.msra.mxu1 %v3591_v27  ;;  %3082 = vmatprep.subr.bf16.mxu0 %v3081_v28  ;;  %v1255_v27 = vld [vmem:[%s4110_s5 + $0x1ed0] sm:$0xff]  ;;  %v3613_v28 = vpack.c.bf16 %v1260_v21, %v1256_v20  ;;  %v3103_v34 = vpack.c.bf16 %v1257_v26, %v1253_v25  ;;  %v268_v21 = vld [vmem:[#allocation8 + $0x18] sm:$0xff] }
 0x252   : > { %3594 = vmatprep.subr.bf16.mxu1 %v3593_v32  ;;  %v1264_v32 = vld [vmem:[%s4110_s5 + $0x1f18] sm:$0xff]  ;;  %v3615_v35 = vpack.c.bf16 %v1259_v29, %v1255_v27  ;;  %v2447_v29 = vlaneseq (!%p2602_p10) }
 0x254   : > { %3084 = vmatpush1.bf16.msra.mxu0 %v3083_v38  ;;  %v1265_v38 = vld [vmem:[%s4110_s5 + $0x1f20] sm:$0xff]  ;;  %v2448_v30 = vshrl.u32 (!%p2602_p10), %v2447_v29, 7 }
 0x255   : > { %3596 = vmatpush1.bf16.msra.mxu1 %v3595_v39  ;;  %3086 = vmatprep.subr.bf16.mxu0 %v3085_v40  ;;  %v1263_v39 = vld [vmem:[%s4110_s5 + $0x1f10] sm:$0xff]  ;;  %v3617_v40 = vpack.c.bf16 %v1268_v33, %v1264_v32  ;;  %v3107_v46 = vpack.c.bf16 %v1265_v38, %v1261_v37 }
 0x256   : > { %3598 = vmatprep.subr.bf16.mxu1 %v3597_v44  ;;  %v1272_v44 = vld [vmem:[%s4110_s5 + $0x1f58] sm:$0xff]  ;;  %v3619_v47 = vpack.c.bf16 %v1267_v41, %v1263_v39  ;;  %v2449_v33 = vsub.s32 (!%p2602_p10), 0, %v2448_v30 }
 0x258   : > { %3088 = vmatpush1.bf16.msra.mxu0 %v3087_v50  ;;  %v1273_v50 = vld [vmem:[%s4110_s5 + $0x1f60] sm:$0xff] }
 0x259   : > { %3600 = vmatpush1.bf16.msra.mxu1 %v3599_v51  ;;  %3090 = vmatprep.subr.bf16.mxu0 %v3089_v52  ;;  %v1271_v51 = vld [vmem:[%s4110_s5 + $0x1f50] sm:$0xff]  ;;  %v3621_v52 = vpack.c.bf16 %v1276_v45, %v1272_v44  ;;  %v3111_v58 = vpack.c.bf16 %v1273_v50, %v1269_v49 }
 0x25a   : > { %3602 = vmatprep.subr.bf16.mxu1 %v3601_v56  ;;  %v1280_v56 = vld [vmem:[%s4110_s5 + $0x1f98] sm:$0xff]  ;;  %v3623_v59 = vpack.c.bf16 %v1275_v53, %v1271_v51 }
 0x25c   : > { %3092 = vmatpush1.bf16.msra.mxu0 %v3091_v62  ;;  %v1281_v62 = vld [vmem:[%s4110_s5 + $0x1fa0] sm:$0xff] }
 0x25d   : > { %3604 = vmatpush1.bf16.msra.mxu1 %v3603_v63  ;;  %3094 = vmatprep.subr.bf16.mxu0 %v3093_v0  ;;  %v1279_v63 = vld [vmem:[%s4110_s5 + $0x1f90] sm:$0xff]  ;;  %v3625_v0 = vpack.c.bf16 %v1284_v57, %v1280_v56  ;;  %v3115_v6 = vpack.c.bf16 %v1281_v62, %v1277_v61 }
 0x25e   : > { %3606 = vmatprep.subr.bf16.mxu1 %v3605_v4  ;;  %v1288_v4 = vld [vmem:[%s4110_s5 + $0x1fd8] sm:$0xff]  ;;  %v3627_v7 = vpack.c.bf16 %v1283_v1, %v1279_v63 }
 0x260   : > { %3096 = vmatpush1.bf16.msra.mxu0 %v3095_v10  ;;  %v1289_v10 = vld [vmem:[%s4110_s5 + $0x1fe0] sm:$0xff] }
 0x261   : > { %3608 = vmatpush1.bf16.msra.mxu1 %v3607_v11  ;;  %3098 = vmatprep.subr.bf16.mxu0 %v3097_v12  ;;  %v3629_v11 = vpack.c.bf16 %v1292_v5, %v1288_v4  ;;  %v1287_v12 = vld [vmem:[%s4110_s5 + $0x1fd0] sm:$0xff]  ;;  %v3119_v14 = vpack.c.bf16 %v1289_v10, %v1285_v9 }
 0x262   : > { %3610 = vmatprep.subr.bf16.mxu1 %v3609_v16  ;;  %v3631_v15 = vpack.c.bf16 %v1291_v13, %v1287_v12  ;;  %v263_v16 = vld [vmem:[%s4223_s12 + $0x70] sm:$0xff] }
 0x264   : > { %3100 = vmatpush1.bf16.msra.mxu0 %v3099_v22 }
 0x265   : > { %3612 = vmatpush1.bf16.msra.mxu1 %v3611_v23  ;;  %3102 = vmatprep.subr.bf16.mxu0 %v3101_v24 }
 0x266   : > { %3614 = vmatprep.subr.bf16.mxu1 %v3613_v28 }
 0x268   : > { %3104 = vmatpush1.bf16.msra.mxu0 %v3103_v34  ;;  %v2453_v34 = vsub.s32 (!%p2602_p10), 1, %v2448_v30 }
 0x269   : > { %3616 = vmatpush1.bf16.msra.mxu1 %v3615_v35  ;;  %3106 = vmatprep.subr.bf16.mxu0 %v3105_v36  ;;  %v2457_v35 = vsub.s32 (!%p2602_p10), 2, %v2448_v30  ;;  %v2461_v36 = vsub.s32 (!%p2602_p10), 3, %v2448_v30 }
 0x26a   : > { %3618 = vmatprep.subr.bf16.mxu1 %v3617_v40  ;;  %v2450_v40 = vrot.slane (!%p2602_p10), %v2445_v31, %v2449_v33  ;;  %v2454_v41 = vrot.slane (!%p2602_p10), %v2445_v31, %v2453_v34 }
 0x26b   : > { %v2458_v42 = vrot.slane (!%p2602_p10), %v2445_v31, %v2457_v35  ;;  %v2462_v43 = vrot.slane (!%p2602_p10), %v2445_v31, %v2461_v36 }
 0x26c   : > { %3108 = vmatpush1.bf16.msra.mxu0 %v3107_v46 }
 0x26d   : > { %3620 = vmatpush1.bf16.msra.mxu1 %v3619_v47  ;;  %3110 = vmatprep.subr.bf16.mxu0 %v3109_v48 }
 0x26e   : > { %3622 = vmatprep.subr.bf16.mxu1 %v3621_v52 }
 0x270   : > { %3112 = vmatpush1.bf16.msra.mxu0 %v3111_v58 }
 0x271   : > { %3624 = vmatpush1.bf16.msra.mxu1 %v3623_v59  ;;  %3114 = vmatprep.subr.bf16.mxu0 %v3113_v60 }
 0x272   : > { %3626 = vmatprep.subr.bf16.mxu1 %v3625_v0 }
 0x274   : > { %3116 = vmatpush1.bf16.msra.mxu0 %v3115_v6 }
 0x275   : > { %3628 = vmatpush1.bf16.msra.mxu1 %v3627_v7  ;;  %3118 = vmatprep.subr.bf16.mxu0 %v3117_v8 }
 0x276   : > { %3630 = vmatprep.subr.bf16.mxu1 %v3629_v11 }
 0x278   : > { %3120 = vmatpush1.bf16.msra.mxu0 %v3119_v14 }
 0x279   : > { %3632 = vmatpush1.bf16.msra.mxu1 %v3631_v15 }
 0x27b   : > { %1855 = vmatmul.mubr.f32.vlgmr.msra.gmra.mrb[0].mxu0 %v263_v16 }
 0x27c   : > { %2423 = vmatmul.mubr.f32.vlgmr.msra.gmra.mrb[0].mxu1 %v263_v16 }
 0x34d   : > { %2440 = sbr.rel (%p2602_p10) target bundleno = 865 (0x361), region = 52 }
 0x34e   : > { %v1856_v20 = vpop.f32.mrb[0].mxu0 }
 0x34f   : > { %v2429_v22 = vadd.f32 %v1856_v20, %v265_v17  ;;  %v2424_v23 = vpop.f32.mrb[0].mxu1  ;;  %v1858_v24 = vpop.f32.mrb[1].mxu0 }
 0x350   : > { %v2431_v25 = vadd.f32 %v2424_v23, %v267_v18  ;;  %v2430_v26 = vadd.f32 %v1858_v24, %v266_v19  ;;  %v2426_v27 = vpop.f32.mrb[1].mxu1 }
 0x351   : > { %2433 = vst [vmem:[#allocation8] sm:$0xff] %v2429_v22  ;;  %v2432_v28 = vadd.f32 %v2426_v27, %v268_v21 }
 0x352   : > { %2435 = vst [vmem:[#allocation8 + $0x10] sm:$0xff] %v2431_v25  ;;  %2434 = vst [vmem:[#allocation8 + $0x8] sm:$0xff] %v2430_v26 }
 0x353   : > { %2436 = vst [vmem:[#allocation8 + $0x18] sm:$0xff] %v2432_v28 }
 0x358   : > { %v2441_v32 = vld [vmem:[#allocation8] sm:$0xff] }
 0x359   : > { %v2442_v37 = vld [vmem:[#allocation8 + $0x8] sm:$0xff]  ;;  %v2443_v38 = vld [vmem:[#allocation8 + $0x10] sm:$0xff]  ;;  %v2467_v44 = vadd.f32 %v2450_v40, %v2441_v32 }
 0x35a   : > { %v2444_v39 = vld [vmem:[#allocation8 + $0x18] sm:$0xff]  ;;  %v2468_v45 = vadd.f32 %v2454_v41, %v2442_v37  ;;  %v2469_v46 = vadd.f32 %v2458_v42, %v2443_v38 }
 0x35b   : > { %v2470_v47 = vadd.f32 %v2462_v43, %v2444_v39  ;;  %vm2471_vm0 = vcmp.ge.f32.partialorder %v2467_v44, 0.0  ;;  %v2475_v48 = vmul.f32 0.01, %v2467_v44 }
 0x35c   : > { %vm2472_vm1 = vcmp.ge.f32.partialorder %v2468_v45, 0.0  ;;  %v2476_v49 = vmul.f32 0.01, %v2468_v45  ;;  %vm2473_vm2 = vcmp.ge.f32.partialorder %v2469_v46, 0.0  ;;  %v2477_v50 = vmul.f32 0.01, %v2469_v46 }
 0x35d   : > { %vm2474_vm3 = vcmp.ge.f32.partialorder %v2470_v47, 0.0  ;;  %v2478_v51 = vmul.f32 0.01, %v2470_v47  ;;  %v2479_v52 = vsel %vm2471_vm0, %v2467_v44, %v2475_v48 }
 0x35e   : > { %v2480_v53 = vsel %vm2472_vm1, %v2468_v45, %v2476_v49  ;;  %2483 = vst [vmem:[#allocation8] sm:$0xff] %v2479_v52  ;;  %v2481_v54 = vsel %vm2473_vm2, %v2469_v46, %v2477_v50 }
 0x35f   : > { %2484 = vst [vmem:[#allocation8 + $0x8] sm:$0xff] %v2480_v53  ;;  %v2482_v55 = vsel %vm2474_vm3, %v2470_v47, %v2478_v51  ;;  %2485 = vst [vmem:[#allocation8 + $0x10] sm:$0xff] %v2481_v54 }
 0x360   : > { %2486 = vst [vmem:[#allocation8 + $0x18] sm:$0xff] %v2482_v55 }
 0x361 PF: > { %p3691_p0 = scmp.eq.s32.totalorder %s3979_s18, 1  ;;  %s3929_s15 = smov [#allocation8]  }
 0x362   : > { %s2497_s26 = sshll.u32 %s3929_s15, 4  ;;  %s2498_s26 = int_to_ptr.vmem [resolvable:$true] %s2497_s26 }
 0x363   : > { %s3833_s29 = scalar_lea.vmem %s2498_s26, 512  ;;  %p3840_p1 = scmp.lt.s32.totalorder %s2498_s26, %s2498_s26 }
 0x364   : > { %p3834_p11 = scmp.ne.s32.totalorder %s2498_s26, %s3833_s29  ;;  %p3841_p2 = scmp.lt.s32.totalorder %s3833_s29, %s3833_s29 }
 0x366   : > { %p3835_p13 = pnand %p3834_p11, %p3691_p0  ;;  %p3842_p6 = por %p3841_p2, %p3840_p1 }
 0x368   : > { %p3836_p8 = pneg %p3835_p13 }
 0x36a   : > { %p3843_p12 = pnand %p3842_p6, %p3836_p8 }
 0x36c   : > { %3846 = shalt.err (!%p3843_p12)
}
 0x36d   : > { %s3847_s19 = scalar_lea.hbm %s5212_s3, 512 }
 0x36e   : > { %p3848_p4 = scmp.ne.s32.totalorder %s5212_s3, %s3847_s19  ;;  %p3853_p7 = scmp.lt.u32.totalorder %s3847_s19, %s5212_s3 }
 0x370   : > { %p3849_p5 = pnand %p3848_p4, %p3691_p0 }
 0x372   : > { %p3850_p3 = pneg %p3849_p5 }
 0x374   : > { %p3855_p9 = pnand %p3853_p7, %p3850_p3 }
 0x376   : > { %3858 = shalt.err (!%p3855_p9)
}
 0x377   : > { %3672 = dma.vmem_to_hbm [thread:$0]  (%p3691_p0), %s2498_s26, 512, %s5212_s3, [#allocation4]  }
 0x378   : > { %3896 = dma.done.wait (%p3691_p0), [#allocation4], 512  }
 0x379   : > { %3898 = vsyncadd (%p3691_p0), [#allocation4], 4294966784 }
 0x37a PF: > { %s18_s17 = sadd.s32 1, %s3921_s17   ;;  %s5228_s12 = smov %s3905_s13 }
 0x37b   : > { %p15_p10 = scmp.ge.s32.totalorder %s18_s17, 4   ;;  %s5229_s13 = smov %s3909_s14 }
 0x37c   : > { %s5230_s14 = smov %s4072_s28  ;;  %s5231_s15 = smov %s3917_s16 }
 0x37d   : > { %s5232_s16 = smov %s5234_s7  ;;  %17 = sbr.rel (!%p15_p10) target bundleno = 6 (0x6), region = 89 }
 0x384   :  { %2510 = vsyncpa [#allocation3], 1 }
 0x385   :  { %2512 = vsyncpa [#allocation3 + $0x1], 1 }
 0x386   :  { %2513 = vsyncpa [#allocation6], 1 }
 0x387   :  { %2515 = vsyncpa [#allocation6 + $0x1], 1 }
 0x388   :  { %2516 = vsyncpa [#allocation4], 1 }
 0x389   :  { %2518 = vsyncpa [#allocation4 + $0x1], 1 }

</bundles_post_ra>
